<compile_context>
chip_gen: v7x
topology: tpu7x:2x2x1
jax: 0.10.0
libtpu: 0.0.40
codegen_flags: <defaults>
</compile_context>

<pallas_src>
import functools

import jax
import jax.numpy as jnp
from jax import lax
from jax.experimental import pallas as pl
from jax.experimental.pallas import tpu as pltpu


def _round_up(x, m):
    return (x + m - 1) // m * m


# Packed gate-column layout (8 blocks of width Hp, gate-major / direction-minor):
#   blk 0: i_fwd  1: i_bwd  2: f_fwd  3: f_bwd  4: o_fwd  5: o_bwd  6: g_fwd  7: g_bwd
# Sigmoid gates occupy blocks [0, 6), tanh (g) gates occupy [6, 8).
# Mapping from PyTorch gate order (i, f, g, o) to the target block base:
_GATE_BLOCKS = ((0, 0), (1, 2), (3, 4), (2, 6))   # (pytorch gate idx, base block)


def bilstm_head_kernel(x_ref, wih_ref, b_ref, whh_ref, ffw_ref, ffb_ref,
                       out_ref, gx_scr, *, T, Bp, Hp, unroll):
    """Fused bi-LSTM + max-pool + linear head.

    x_ref:   (T*Bp, Ep)   bf16 time-major embedded inputs (batch padded)
    wih_ref: (Ep, 8Hp)    bf16 input weights, packed gate-major layout
    b_ref:   (1, 8Hp)     f32  folded biases (b_ih + b_hh), same layout
    whh_ref: (2Hp, 8Hp)   bf16 block-diagonal recurrent weights
                          (rows 0:Hp -> fwd gate blocks, rows Hp:2Hp -> bwd)
    ffw_ref: (2Hp, Cp)    bf16 classifier weight (fwd rows | bwd rows of W^T)
    ffb_ref: (1, Cp)      f32  classifier bias (lane-padded)
    out_ref: (Bp, Cp)     f32  logits (real values in [:B, :2])
    gx_scr:  (T*Bp, 8Hp)  f32  precomputed input-gate pre-activations
    """
    H2, H4, H6, H8 = 2 * Hp, 4 * Hp, 6 * Hp, 8 * Hp

    # ---- Pass 1: hoisted input projection — ONE bf16 MXU GEMM over all T ----
    # TODO(synk): for production-size T, stream x / gx over a time-chunked grid
    # (dimension_semantics=("arbitrary",), h/c/max in persistent scratch) and
    # consider bf16 gx storage — mandatory on v7x's 64 MiB VMEM.
    gx_scr[...] = (jnp.dot(x_ref[...], wih_ref[...],
                           preferred_element_type=jnp.float32) + b_ref[...])

    # Recurrent weight stays resident in VMEM; loaded once outside the loop.
    whh = whh_ref[...]

    zeros = jnp.zeros((Bp, H2), jnp.float32)
    neg_inf = jnp.full((Bp, H2), -jnp.inf, jnp.float32)

    def gx_at(t):
        # Assemble the (Bp, 8Hp) gate-input tile for step t: fwd gate blocks
        # (even) come from time t, bwd gate blocks (odd) from time T-1-t.
        # Independent of h -> scheduled off the serial critical path.
        row_f = pl.multiple_of(t * Bp, Bp)
        row_b = pl.multiple_of((T - 1 - t) * Bp, Bp)

        def blk(row, k):
            return gx_scr[pl.ds(row, Bp), pl.ds(k * Hp, Hp)]

        return jnp.concatenate(
            [blk(row_f, 0), blk(row_b, 1), blk(row_f, 2), blk(row_b, 3),
             blk(row_f, 4), blk(row_b, 5), blk(row_f, 6), blk(row_b, 7)],
            axis=1)

    # ---- Pass 2: fused fwd+bwd recurrence, ONE K=2Hp matmul per step --------
    def step(t, carry):
        h, c, m = carry                                     # each (Bp, 2Hp)
        gates = gx_at(t) + jnp.dot(h.astype(jnp.bfloat16), whh,
                                   preferred_element_type=jnp.float32)
        sg = jax.nn.sigmoid(gates[:, 0:H6])                 # one EUP region
        g = jnp.tanh(gates[:, H6:H8])                       # [g_f | g_b]
        i, f, o = sg[:, 0:H2], sg[:, H2:H4], sg[:, H4:H6]   # stacked [fwd|bwd]
        c = f * c + i * g
        h = o * jnp.tanh(c)
        m = jnp.maximum(m, h)
        return h, c, m

    _, _, m = lax.fori_loop(0, T, step, (zeros, zeros, neg_inf), unroll=unroll)

    # ---- Head: single fused classifier matmul (K = 2Hp) ---------------------
    out_ref[...] = (jnp.dot(m.astype(jnp.bfloat16), ffw_ref[...],
                            preferred_element_type=jnp.float32) + ffb_ref[...])


def make_params(key, num_embeddings, embedding_dim, hidden_size):
    V, E, H = num_embeddings, embedding_dim, hidden_size
    ks = jax.random.split(key, 12)
    s = 1.0 / jnp.sqrt(jnp.float32(H))
    u = lambda k, shape: jax.random.uniform(k, shape, jnp.float32, -s, s)
    params = {
        "embedding": jax.random.normal(ks[0], (V, E), jnp.float32),
        # forward direction (PyTorch layout: (4H, E) / (4H, H) / (4H,))
        "w_ih_f": u(ks[1], (4 * H, E)),
        "w_hh_f": u(ks[2], (4 * H, H)),
        "b_ih_f": u(ks[3], (4 * H,)),
        "b_hh_f": u(ks[4], (4 * H,)),
        # reverse direction
        "w_ih_b": u(ks[5], (4 * H, E)),
        "w_hh_b": u(ks[6], (4 * H, H)),
        "b_ih_b": u(ks[7], (4 * H,)),
        "b_hh_b": u(ks[8], (4 * H,)),
        # classifier (PyTorch Linear: weight (2, 2H), bias (2,))
        "ff_w": u(ks[9], (2, 2 * H)),
        "ff_b": u(ks[10], (2,)),
    }
    return params


def lstm_forward(X_tokens, params, hidden_size):
    """use_mask=False path of the PyTorch module."""
    H = hidden_size
    B, T = X_tokens.shape
    E = params["embedding"].shape[1]

    Hp = _round_up(H, 128)   # lane-align each gate block
    Ep = _round_up(E, 128)   # lane-dense input features
    Bp = _round_up(B, 8)     # sublane-align batch
    Cp = 128                 # lane-padded class dim (real classes in [:2])

    # --- glue: gather directly into time-major layout, bf16 before padding ---
    x = params["embedding"][X_tokens.T].astype(jnp.bfloat16)     # (T, B, E)
    x = jnp.pad(x, ((0, 0), (0, Bp - B), (0, Ep - E)))
    x2d = x.reshape(T * Bp, Ep)                                  # (T*Bp, Ep)
    # TODO(synk): if E stays tiny (32), pack 4 timesteps per 128-lane row with a
    # block-structured W_ih to avoid 4x wasted Pass-1 contraction work.

    def pack_w(w, in_dim, in_pad, d):
        # PyTorch (4H, in_dim) gate order i,f,g,o -> (in_pad, 8Hp) packed
        # gate-major layout; direction d in {0: fwd, 1: bwd}.
        wt = w.T
        out = jnp.zeros((in_pad, 8 * Hp), jnp.float32)
        for pt, base in _GATE_BLOCKS:
            blk = base + d
            out = out.at[:in_dim, blk * Hp:blk * Hp + H].set(
                wt[:, pt * H:(pt + 1) * H])
        return out

    def pack_b(b, d):
        out = jnp.zeros((8 * Hp,), jnp.float32)
        for pt, base in _GATE_BLOCKS:
            blk = base + d
            out = out.at[blk * Hp:blk * Hp + H].set(b[pt * H:(pt + 1) * H])
        return out

    wih = (pack_w(params["w_ih_f"], E, Ep, 0)
           + pack_w(params["w_ih_b"], E, Ep, 1)).astype(jnp.bfloat16)
    bias = (pack_b(params["b_ih_f"] + params["b_hh_f"], 0)
            + pack_b(params["b_ih_b"] + params["b_hh_b"], 1)).reshape(1, 8 * Hp)
    # Block-diagonal recurrent weight: h_fwd rows hit only fwd (even) gate
    # blocks, h_bwd rows only bwd (odd) blocks -> one K=2Hp matmul per step.
    # TODO(synk): on v5e prefer two independent K=Hp matmuls (2 of 4 MXUs).
    whh = jnp.concatenate([pack_w(params["w_hh_f"], H, Hp, 0),
                           pack_w(params["w_hh_b"], H, Hp, 1)],
                          axis=0).astype(jnp.bfloat16)            # (2Hp, 8Hp)

    ffw_t = params["ff_w"].T                                      # (2H, 2)
    ffw = (jnp.zeros((2 * Hp, Cp), jnp.float32)
           .at[:H, :2].set(ffw_t[:H])
           .at[Hp:Hp + H, :2].set(ffw_t[H:])).astype(jnp.bfloat16)
    ffb = jnp.zeros((1, Cp), jnp.float32).at[0, :2].set(params["ff_b"])

    # VMEM budget from the actual resident footprint (+2x headroom), capped at
    # 64 MiB so the same request is valid on v7x.
    def nbytes(a):
        return a.size * a.dtype.itemsize
    footprint = (sum(nbytes(a) for a in (x2d, wih, bias, whh, ffw, ffb))
                 + Bp * Cp * 4                    # output
                 + T * Bp * 8 * Hp * 4)           # gx scratch (f32)
    vmem_limit = int(min(max(2 * footprint, 4 * 1024 * 1024), 64 * 1024 * 1024))
    # TODO(synk): on v7x, the two directions could instead be split across the
    # two TensorCores (grid axis of size 2, dimension_semantics=("parallel",)).

    vmem = pl.BlockSpec(memory_space=pltpu.MemorySpace.VMEM)
    kern = functools.partial(bilstm_head_kernel, T=T, Bp=Bp, Hp=Hp,
                             unroll=(T if T <= 16 else 4))
    out = pl.pallas_call(
        kern,
        out_shape=jax.ShapeDtypeStruct((Bp, Cp), jnp.float32),
        in_specs=[vmem] * 6,
        out_specs=vmem,
        scratch_shapes=[
            pltpu.VMEM((T * Bp, 8 * Hp), jnp.float32),   # hoisted gate inputs
        ],
        compiler_params=pltpu.CompilerParams(vmem_limit_bytes=vmem_limit),
    )(x2d, wih, bias, whh, ffw, ffb)
    return out[:B, :2]


def ref_forward(X_tokens, params, hidden_size):
    """Pure-JAX reference with the module's semantics, using the same matmul
    precision as the kernel (bf16 operands, f32 accumulation)."""
    H = hidden_size
    bf16 = jnp.bfloat16
    x = params["embedding"][X_tokens].astype(jnp.float32)   # (B, T, E)
    x_tm = jnp.transpose(x, (1, 0, 2))                       # (T, B, E)
    B = x.shape[0]

    def run_dir(x_seq, w_ih, w_hh, b_ih, b_hh):
        wih = w_ih.T.astype(bf16)                            # (E, 4H)
        whh = w_hh.T.astype(bf16)                            # (H, 4H)
        bias = (b_ih + b_hh)[None, :]

        def step(carry, x_t):
            h, c = carry
            gx = jnp.dot(x_t.astype(bf16), wih,
                         preferred_element_type=jnp.float32) + bias
            g = gx + jnp.dot(h.astype(bf16), whh,
                             preferred_element_type=jnp.float32)
            i = jax.nn.sigmoid(g[:, 0 * H:1 * H])
            f = jax.nn.sigmoid(g[:, 1 * H:2 * H])
            gg = jnp.tanh(g[:, 2 * H:3 * H])
            o = jax.nn.sigmoid(g[:, 3 * H:4 * H])
            c_new = f * c + i * gg
            h_new = o * jnp.tanh(c_new)
            return (h_new, c_new), h_new

        h0 = jnp.zeros((B, H), jnp.float32)
        _, hs = lax.scan(step, (h0, h0), x_seq)
        return hs                                            # (T, B, H)

    hs_f = run_dir(x_tm, params["w_ih_f"], params["w_hh_f"],
                   params["b_ih_f"], params["b_hh_f"])
    hs_b = run_dir(x_tm[::-1], params["w_ih_b"], params["w_hh_b"],
                   params["b_ih_b"], params["b_hh_b"])[::-1]
    out_seq = jnp.concatenate([hs_f, hs_b], axis=-1)         # (T, B, 2H)
    pooled = jnp.max(out_seq, axis=0)                        # (B, 2H)
    return (jnp.dot(pooled.astype(bf16), params["ff_w"].T.astype(bf16),
                    preferred_element_type=jnp.float32)
            + params["ff_b"])


if __name__ == "__main__":
    NUM_EMBEDDINGS = 16
    EMBEDDING_DIM = 32
    HIDDEN_SIZE = 32
    B, T = 2, 8

    key = jax.random.PRNGKey(0)
    pkey, xkey = jax.random.split(key)
    params = make_params(pkey, NUM_EMBEDDINGS, EMBEDDING_DIM, HIDDEN_SIZE)
    X = jax.random.randint(xkey, (B, T), 0, NUM_EMBEDDINGS, dtype=jnp.int32)

    logits = lstm_forward(X, params, HIDDEN_SIZE)
    jax.block_until_ready(logits)

    ref = ref_forward(X, params, HIDDEN_SIZE)
    assert logits.shape == (B, 2)
    assert jnp.allclose(logits, ref, atol=2e-3, rtol=2e-3), (
        float(jnp.max(jnp.abs(logits - ref))))

    print("KERNEL_OK")
</pallas_src>

<mosaic_0001>
module attributes {stable_mosaic.version = 11 : i64} {
  func.func @bilstm_head_kernel(%arg0: memref<64x128xbf16, #tpu.memory_space<vmem>>, %arg1: memref<128x1024xbf16, #tpu.memory_space<vmem>>, %arg2: memref<1x1024xf32, #tpu.memory_space<vmem>>, %arg3: memref<256x1024xbf16, #tpu.memory_space<vmem>>, %arg4: memref<256x128xbf16, #tpu.memory_space<vmem>>, %arg5: memref<1x128xf32, #tpu.memory_space<vmem>>, %arg6: memref<8x128xf32, #tpu.memory_space<vmem>>, %arg7: memref<64x1024xf32, #tpu.memory_space<vmem>>) attributes {dimension_semantics = [], scalar_prefetch = 0 : i64, scratch_operands = 1 : i64, tpu.core_type = #tpu.core_type<tc>} {
    %c0 = arith.constant 0 : index
    %c0_0 = arith.constant 0 : index
    %0 = vector.load %arg0[%c0, %c0_0] : memref<64x128xbf16, #tpu.memory_space<vmem>>, vector<64x128xbf16>
    %c0_1 = arith.constant 0 : index
    %c0_2 = arith.constant 0 : index
    %1 = vector.load %arg1[%c0_1, %c0_2] : memref<128x1024xbf16, #tpu.memory_space<vmem>>, vector<128x1024xbf16>
    %cst = arith.constant dense<0.000000e+00> : vector<64x1024xf32>
    %2 = tpu.matmul %0, %1, %cst {dimension_numbers = #tpu.dot_dimension_numbers<[1], [0], [0], [1], [0, 0, 1, 1], [], []>} : vector<64x128xbf16>, vector<128x1024xbf16>, vector<64x1024xf32> -> vector<64x1024xf32>
    %c0_3 = arith.constant 0 : index
    %c0_4 = arith.constant 0 : index
    %3 = vector.load %arg2[%c0_3, %c0_4] : memref<1x1024xf32, #tpu.memory_space<vmem>>, vector<1x1024xf32>
    %4 = vector.broadcast %3 : vector<1x1024xf32> to vector<64x1024xf32>
    %5 = arith.addf %2, %4 : vector<64x1024xf32>
    %c0_5 = arith.constant 0 : index
    %c0_6 = arith.constant 0 : index
    %6 = vector.load %arg7[%c0_5, %c0_6] : memref<64x1024xf32, #tpu.memory_space<vmem>>, vector<64x1024xf32>
    tpu.vector_store %arg7[%c0_5, %c0_6], %5 {strides = array<i32>} : memref<64x1024xf32, #tpu.memory_space<vmem>>, vector<64x1024xf32>,
    %c0_7 = arith.constant 0 : index
    %c0_8 = arith.constant 0 : index
    %7 = vector.load %arg3[%c0_7, %c0_8] : memref<256x1024xbf16, #tpu.memory_space<vmem>>, vector<256x1024xbf16>
    %cst_9 = arith.constant 0.000000e+00 : f32
    %8 = vector.broadcast %cst_9 : f32 to vector<8x256xf32>
    %cst_10 = arith.constant 0xFF800000 : f32
    %9 = vector.broadcast %cst_10 : f32 to vector<8x256xf32>
    %c0_i32 = arith.constant 0 : i32
    %c8_i32 = arith.constant 8 : i32
    %10 = arith.muli %c0_i32, %c8_i32 : i32
    %11 = tpu.assume_multiple %10, 8 : i32
    %c7_i32 = arith.constant 7 : i32
    %12 = arith.subi %c7_i32, %c0_i32 : i32
    %c8_i32_11 = arith.constant 8 : i32
    %13 = arith.muli %12, %c8_i32_11 : i32
    %14 = tpu.assume_multiple %13, 8 : i32
    %15 = arith.index_cast %11 : i32 to index
    %c0_12 = arith.constant 0 : index
    %16 = vector.load %arg7[%15, %c0_12] : memref<64x1024xf32, #tpu.memory_space<vmem>>, vector<8x128xf32>
    %17 = arith.index_cast %14 : i32 to index
    %c128 = arith.constant 128 : index
    %18 = vector.load %arg7[%17, %c128] : memref<64x1024xf32, #tpu.memory_space<vmem>>, vector<8x128xf32>
    %19 = arith.index_cast %11 : i32 to index
    %c256 = arith.constant 256 : index
    %20 = vector.load %arg7[%19, %c256] : memref<64x1024xf32, #tpu.memory_space<vmem>>, vector<8x128xf32>
    %21 = arith.index_cast %14 : i32 to index
    %c384 = arith.constant 384 : index
    %22 = vector.load %arg7[%21, %c384] : memref<64x1024xf32, #tpu.memory_space<vmem>>, vector<8x128xf32>
    %23 = arith.index_cast %11 : i32 to index
    %c512 = arith.constant 512 : index
    %24 = vector.load %arg7[%23, %c512] : memref<64x1024xf32, #tpu.memory_space<vmem>>, vector<8x128xf32>
    %25 = arith.index_cast %14 : i32 to index
    %c640 = arith.constant 640 : index
    %26 = vector.load %arg7[%25, %c640] : memref<64x1024xf32, #tpu.memory_space<vmem>>, vector<8x128xf32>
    %27 = arith.index_cast %11 : i32 to index
    %c768 = arith.constant 768 : index
    %28 = vector.load %arg7[%27, %c768] : memref<64x1024xf32, #tpu.memory_space<vmem>>, vector<8x128xf32>
    %29 = arith.index_cast %14 : i32 to index
    %c896 = arith.constant 896 : index
    %30 = vector.load %arg7[%29, %c896] : memref<64x1024xf32, #tpu.memory_space<vmem>>, vector<8x128xf32>
    %31 = tpu.concatenate %16, %18, %20, %22, %24, %26, %28, %30 in 1 : vector<8x128xf32>, vector<8x128xf32>, vector<8x128xf32>, vector<8x128xf32>, vector<8x128xf32>, vector<8x128xf32>, vector<8x128xf32>, vector<8x128xf32> -> vector<8x1024xf32>
    %32 = arith.truncf %8 : vector<8x256xf32> to vector<8x256xbf16>
    %cst_13 = arith.constant dense<0.000000e+00> : vector<8x1024xf32>
    %33 = tpu.matmul %32, %7, %cst_13 {dimension_numbers = #tpu.dot_dimension_numbers<[1], [0], [0], [1], [0, 0, 1, 1], [], []>} : vector<8x256xbf16>, vector<256x1024xbf16>, vector<8x1024xf32> -> vector<8x1024xf32>
    %34 = arith.addf %31, %33 : vector<8x1024xf32>
    %35 = vector.extract_strided_slice %34 {offsets = [0, 0], sizes = [8, 768], strides = [1, 1]} : vector<8x1024xf32> to vector<8x768xf32>
    %36 = arith.negf %35 : vector<8x768xf32>
    %37 = math.exp %36 : vector<8x768xf32>
    %cst_14 = arith.constant 1.000000e+00 : f32
    %38 = vector.broadcast %cst_14 : f32 to vector<8x768xf32>
    %39 = arith.addf %38, %37 : vector<8x768xf32>
    %40 = arith.divf %38, %39 : vector<8x768xf32>
    %41 = vector.extract_strided_slice %34 {offsets = [0, 768], sizes = [8, 256], strides = [1, 1]} : vector<8x1024xf32> to vector<8x256xf32>
    %42 = math.tanh %41 : vector<8x256xf32>
    %43 = vector.extract_strided_slice %40 {offsets = [0, 0], sizes = [8, 256], strides = [1, 1]} : vector<8x768xf32> to vector<8x256xf32>
    %44 = vector.extract_strided_slice %40 {offsets = [0, 256], sizes = [8, 256], strides = [1, 1]} : vector<8x768xf32> to vector<8x256xf32>
    %45 = vector.extract_strided_slice %40 {offsets = [0, 512], sizes = [8, 256], strides = [1, 1]} : vector<8x768xf32> to vector<8x256xf32>
    %46 = arith.mulf %44, %8 : vector<8x256xf32>
    %47 = arith.mulf %43, %42 : vector<8x256xf32>
    %48 = arith.addf %46, %47 : vector<8x256xf32>
    %49 = math.tanh %48 : vector<8x256xf32>
    %50 = arith.mulf %45, %49 : vector<8x256xf32>
    %51 = arith.maximumf %9, %50 : vector<8x256xf32>
    %c1_i32 = arith.constant 1 : i32
    %c8_i32_15 = arith.constant 8 : i32
    %52 = arith.muli %c1_i32, %c8_i32_15 : i32
    %53 = tpu.assume_multiple %52, 8 : i32
    %c7_i32_16 = arith.constant 7 : i32
    %54 = arith.subi %c7_i32_16, %c1_i32 : i32
    %c8_i32_17 = arith.constant 8 : i32
    %55 = arith.muli %54, %c8_i32_17 : i32
    %56 = tpu.assume_multiple %55, 8 : i32
    %57 = arith.index_cast %53 : i32 to index
    %c0_18 = arith.constant 0 : index
    %58 = vector.load %arg7[%57, %c0_18] : memref<64x1024xf32, #tpu.memory_space<vmem>>, vector<8x128xf32>
    %59 = arith.index_cast %56 : i32 to index
    %c128_19 = arith.constant 128 : index
    %60 = vector.load %arg7[%59, %c128_19] : memref<64x1024xf32, #tpu.memory_space<vmem>>, vector<8x128xf32>
    %61 = arith.index_cast %53 : i32 to index
    %c256_20 = arith.constant 256 : index
    %62 = vector.load %arg7[%61, %c256_20] : memref<64x1024xf32, #tpu.memory_space<vmem>>, vector<8x128xf32>
    %63 = arith.index_cast %56 : i32 to index
    %c384_21 = arith.constant 384 : index
    %64 = vector.load %arg7[%63, %c384_21] : memref<64x1024xf32, #tpu.memory_space<vmem>>, vector<8x128xf32>
    %65 = arith.index_cast %53 : i32 to index
    %c512_22 = arith.constant 512 : index
    %66 = vector.load %arg7[%65, %c512_22] : memref<64x1024xf32, #tpu.memory_space<vmem>>, vector<8x128xf32>
    %67 = arith.index_cast %56 : i32 to index
    %c640_23 = arith.constant 640 : index
    %68 = vector.load %arg7[%67, %c640_23] : memref<64x1024xf32, #tpu.memory_space<vmem>>, vector<8x128xf32>
    %69 = arith.index_cast %53 : i32 to index
    %c768_24 = arith.constant 768 : index
    %70 = vector.load %arg7[%69, %c768_24] : memref<64x1024xf32, #tpu.memory_space<vmem>>, vector<8x128xf32>
    %71 = arith.index_cast %56 : i32 to index
    %c896_25 = arith.constant 896 : index
    %72 = vector.load %arg7[%71, %c896_25] : memref<64x1024xf32, #tpu.memory_space<vmem>>, vector<8x128xf32>
    %73 = tpu.concatenate %58, %60, %62, %64, %66, %68, %70, %72 in 1 : vector<8x128xf32>, vector<8x128xf32>, vector<8x128xf32>, vector<8x128xf32>, vector<8x128xf32>, vector<8x128xf32>, vector<8x128xf32>, vector<8x128xf32> -> vector<8x1024xf32>
    %74 = arith.truncf %50 : vector<8x256xf32> to vector<8x256xbf16>
    %cst_26 = arith.constant dense<0.000000e+00> : vector<8x1024xf32>
    %75 = tpu.matmul %74, %7, %cst_26 {dimension_numbers = #tpu.dot_dimension_numbers<[1], [0], [0], [1], [0, 0, 1, 1], [], []>} : vector<8x256xbf16>, vector<256x1024xbf16>, vector<8x1024xf32> -> vector<8x1024xf32>
    %76 = arith.addf %73, %75 : vector<8x1024xf32>
    %77 = vector.extract_strided_slice %76 {offsets = [0, 0], sizes = [8, 768], strides = [1, 1]} : vector<8x1024xf32> to vector<8x768xf32>
    %78 = arith.negf %77 : vector<8x768xf32>
    %79 = math.exp %78 : vector<8x768xf32>
    %cst_27 = arith.constant 1.000000e+00 : f32
    %80 = vector.broadcast %cst_27 : f32 to vector<8x768xf32>
    %81 = arith.addf %80, %79 : vector<8x768xf32>
    %82 = arith.divf %80, %81 : vector<8x768xf32>
    %83 = vector.extract_strided_slice %76 {offsets = [0, 768], sizes = [8, 256], strides = [1, 1]} : vector<8x1024xf32> to vector<8x256xf32>
    %84 = math.tanh %83 : vector<8x256xf32>
    %85 = vector.extract_strided_slice %82 {offsets = [0, 0], sizes = [8, 256], strides = [1, 1]} : vector<8x768xf32> to vector<8x256xf32>
    %86 = vector.extract_strided_slice %82 {offsets = [0, 256], sizes = [8, 256], strides = [1, 1]} : vector<8x768xf32> to vector<8x256xf32>
    %87 = vector.extract_strided_slice %82 {offsets = [0, 512], sizes = [8, 256], strides = [1, 1]} : vector<8x768xf32> to vector<8x256xf32>
    %88 = arith.mulf %86, %48 : vector<8x256xf32>
    %89 = arith.mulf %85, %84 : vector<8x256xf32>
    %90 = arith.addf %88, %89 : vector<8x256xf32>
    %91 = math.tanh %90 : vector<8x256xf32>
    %92 = arith.mulf %87, %91 : vector<8x256xf32>
    %93 = arith.maximumf %51, %92 : vector<8x256xf32>
    %c2_i32 = arith.constant 2 : i32
    %c8_i32_28 = arith.constant 8 : i32
    %94 = arith.muli %c2_i32, %c8_i32_28 : i32
    %95 = tpu.assume_multiple %94, 8 : i32
    %c7_i32_29 = arith.constant 7 : i32
    %96 = arith.subi %c7_i32_29, %c2_i32 : i32
    %c8_i32_30 = arith.constant 8 : i32
    %97 = arith.muli %96, %c8_i32_30 : i32
    %98 = tpu.assume_multiple %97, 8 : i32
    %99 = arith.index_cast %95 : i32 to index
    %c0_31 = arith.constant 0 : index
    %100 = vector.load %arg7[%99, %c0_31] : memref<64x1024xf32, #tpu.memory_space<vmem>>, vector<8x128xf32>
    %101 = arith.index_cast %98 : i32 to index
    %c128_32 = arith.constant 128 : index
    %102 = vector.load %arg7[%101, %c128_32] : memref<64x1024xf32, #tpu.memory_space<vmem>>, vector<8x128xf32>
    %103 = arith.index_cast %95 : i32 to index
    %c256_33 = arith.constant 256 : index
    %104 = vector.load %arg7[%103, %c256_33] : memref<64x1024xf32, #tpu.memory_space<vmem>>, vector<8x128xf32>
    %105 = arith.index_cast %98 : i32 to index
    %c384_34 = arith.constant 384 : index
    %106 = vector.load %arg7[%105, %c384_34] : memref<64x1024xf32, #tpu.memory_space<vmem>>, vector<8x128xf32>
    %107 = arith.index_cast %95 : i32 to index
    %c512_35 = arith.constant 512 : index
    %108 = vector.load %arg7[%107, %c512_35] : memref<64x1024xf32, #tpu.memory_space<vmem>>, vector<8x128xf32>
    %109 = arith.index_cast %98 : i32 to index
    %c640_36 = arith.constant 640 : index
    %110 = vector.load %arg7[%109, %c640_36] : memref<64x1024xf32, #tpu.memory_space<vmem>>, vector<8x128xf32>
    %111 = arith.index_cast %95 : i32 to index
    %c768_37 = arith.constant 768 : index
    %112 = vector.load %arg7[%111, %c768_37] : memref<64x1024xf32, #tpu.memory_space<vmem>>, vector<8x128xf32>
    %113 = arith.index_cast %98 : i32 to index
    %c896_38 = arith.constant 896 : index
    %114 = vector.load %arg7[%113, %c896_38] : memref<64x1024xf32, #tpu.memory_space<vmem>>, vector<8x128xf32>
    %115 = tpu.concatenate %100, %102, %104, %106, %108, %110, %112, %114 in 1 : vector<8x128xf32>, vector<8x128xf32>, vector<8x128xf32>, vector<8x128xf32>, vector<8x128xf32>, vector<8x128xf32>, vector<8x128xf32>, vector<8x128xf32> -> vector<8x1024xf32>
    %116 = arith.truncf %92 : vector<8x256xf32> to vector<8x256xbf16>
    %cst_39 = arith.constant dense<0.000000e+00> : vector<8x1024xf32>
    %117 = tpu.matmul %116, %7, %cst_39 {dimension_numbers = #tpu.dot_dimension_numbers<[1], [0], [0], [1], [0, 0, 1, 1], [], []>} : vector<8x256xbf16>, vector<256x1024xbf16>, vector<8x1024xf32> -> vector<8x1024xf32>
    %118 = arith.addf %115, %117 : vector<8x1024xf32>
    %119 = vector.extract_strided_slice %118 {offsets = [0, 0], sizes = [8, 768], strides = [1, 1]} : vector<8x1024xf32> to vector<8x768xf32>
    %120 = arith.negf %119 : vector<8x768xf32>
    %121 = math.exp %120 : vector<8x768xf32>
    %cst_40 = arith.constant 1.000000e+00 : f32
    %122 = vector.broadcast %cst_40 : f32 to vector<8x768xf32>
    %123 = arith.addf %122, %121 : vector<8x768xf32>
    %124 = arith.divf %122, %123 : vector<8x768xf32>
    %125 = vector.extract_strided_slice %118 {offsets = [0, 768], sizes = [8, 256], strides = [1, 1]} : vector<8x1024xf32> to vector<8x256xf32>
    %126 = math.tanh %125 : vector<8x256xf32>
    %127 = vector.extract_strided_slice %124 {offsets = [0, 0], sizes = [8, 256], strides = [1, 1]} : vector<8x768xf32> to vector<8x256xf32>
    %128 = vector.extract_strided_slice %124 {offsets = [0, 256], sizes = [8, 256], strides = [1, 1]} : vector<8x768xf32> to vector<8x256xf32>
    %129 = vector.extract_strided_slice %124 {offsets = [0, 512], sizes = [8, 256], strides = [1, 1]} : vector<8x768xf32> to vector<8x256xf32>
    %130 = arith.mulf %128, %90 : vector<8x256xf32>
    %131 = arith.mulf %127, %126 : vector<8x256xf32>
    %132 = arith.addf %130, %131 : vector<8x256xf32>
    %133 = math.tanh %132 : vector<8x256xf32>
    %134 = arith.mulf %129, %133 : vector<8x256xf32>
    %135 = arith.maximumf %93, %134 : vector<8x256xf32>
    %c3_i32 = arith.constant 3 : i32
    %c8_i32_41 = arith.constant 8 : i32
    %136 = arith.muli %c3_i32, %c8_i32_41 : i32
    %137 = tpu.assume_multiple %136, 8 : i32
    %c7_i32_42 = arith.constant 7 : i32
    %138 = arith.subi %c7_i32_42, %c3_i32 : i32
    %c8_i32_43 = arith.constant 8 : i32
    %139 = arith.muli %138, %c8_i32_43 : i32
    %140 = tpu.assume_multiple %139, 8 : i32
    %141 = arith.index_cast %137 : i32 to index
    %c0_44 = arith.constant 0 : index
    %142 = vector.load %arg7[%141, %c0_44] : memref<64x1024xf32, #tpu.memory_space<vmem>>, vector<8x128xf32>
    %143 = arith.index_cast %140 : i32 to index
    %c128_45 = arith.constant 128 : index
    %144 = vector.load %arg7[%143, %c128_45] : memref<64x1024xf32, #tpu.memory_space<vmem>>, vector<8x128xf32>
    %145 = arith.index_cast %137 : i32 to index
    %c256_46 = arith.constant 256 : index
    %146 = vector.load %arg7[%145, %c256_46] : memref<64x1024xf32, #tpu.memory_space<vmem>>, vector<8x128xf32>
    %147 = arith.index_cast %140 : i32 to index
    %c384_47 = arith.constant 384 : index
    %148 = vector.load %arg7[%147, %c384_47] : memref<64x1024xf32, #tpu.memory_space<vmem>>, vector<8x128xf32>
    %149 = arith.index_cast %137 : i32 to index
    %c512_48 = arith.constant 512 : index
    %150 = vector.load %arg7[%149, %c512_48] : memref<64x1024xf32, #tpu.memory_space<vmem>>, vector<8x128xf32>
    %151 = arith.index_cast %140 : i32 to index
    %c640_49 = arith.constant 640 : index
    %152 = vector.load %arg7[%151, %c640_49] : memref<64x1024xf32, #tpu.memory_space<vmem>>, vector<8x128xf32>
    %153 = arith.index_cast %137 : i32 to index
    %c768_50 = arith.constant 768 : index
    %154 = vector.load %arg7[%153, %c768_50] : memref<64x1024xf32, #tpu.memory_space<vmem>>, vector<8x128xf32>
    %155 = arith.index_cast %140 : i32 to index
    %c896_51 = arith.constant 896 : index
    %156 = vector.load %arg7[%155, %c896_51] : memref<64x1024xf32, #tpu.memory_space<vmem>>, vector<8x128xf32>
    %157 = tpu.concatenate %142, %144, %146, %148, %150, %152, %154, %156 in 1 : vector<8x128xf32>, vector<8x128xf32>, vector<8x128xf32>, vector<8x128xf32>, vector<8x128xf32>, vector<8x128xf32>, vector<8x128xf32>, vector<8x128xf32> -> vector<8x1024xf32>
    %158 = arith.truncf %134 : vector<8x256xf32> to vector<8x256xbf16>
    %cst_52 = arith.constant dense<0.000000e+00> : vector<8x1024xf32>
    %159 = tpu.matmul %158, %7, %cst_52 {dimension_numbers = #tpu.dot_dimension_numbers<[1], [0], [0], [1], [0, 0, 1, 1], [], []>} : vector<8x256xbf16>, vector<256x1024xbf16>, vector<8x1024xf32> -> vector<8x1024xf32>
    %160 = arith.addf %157, %159 : vector<8x1024xf32>
    %161 = vector.extract_strided_slice %160 {offsets = [0, 0], sizes = [8, 768], strides = [1, 1]} : vector<8x1024xf32> to vector<8x768xf32>
    %162 = arith.negf %161 : vector<8x768xf32>
    %163 = math.exp %162 : vector<8x768xf32>
    %cst_53 = arith.constant 1.000000e+00 : f32
    %164 = vector.broadcast %cst_53 : f32 to vector<8x768xf32>
    %165 = arith.addf %164, %163 : vector<8x768xf32>
    %166 = arith.divf %164, %165 : vector<8x768xf32>
    %167 = vector.extract_strided_slice %160 {offsets = [0, 768], sizes = [8, 256], strides = [1, 1]} : vector<8x1024xf32> to vector<8x256xf32>
    %168 = math.tanh %167 : vector<8x256xf32>
    %169 = vector.extract_strided_slice %166 {offsets = [0, 0], sizes = [8, 256], strides = [1, 1]} : vector<8x768xf32> to vector<8x256xf32>
    %170 = vector.extract_strided_slice %166 {offsets = [0, 256], sizes = [8, 256], strides = [1, 1]} : vector<8x768xf32> to vector<8x256xf32>
    %171 = vector.extract_strided_slice %166 {offsets = [0, 512], sizes = [8, 256], strides = [1, 1]} : vector<8x768xf32> to vector<8x256xf32>
    %172 = arith.mulf %170, %132 : vector<8x256xf32>
    %173 = arith.mulf %169, %168 : vector<8x256xf32>
    %174 = arith.addf %172, %173 : vector<8x256xf32>
    %175 = math.tanh %174 : vector<8x256xf32>
    %176 = arith.mulf %171, %175 : vector<8x256xf32>
    %177 = arith.maximumf %135, %176 : vector<8x256xf32>
    %c4_i32 = arith.constant 4 : i32
    %c8_i32_54 = arith.constant 8 : i32
    %178 = arith.muli %c4_i32, %c8_i32_54 : i32
    %179 = tpu.assume_multiple %178, 8 : i32
    %c7_i32_55 = arith.constant 7 : i32
    %180 = arith.subi %c7_i32_55, %c4_i32 : i32
    %c8_i32_56 = arith.constant 8 : i32
    %181 = arith.muli %180, %c8_i32_56 : i32
    %182 = tpu.assume_multiple %181, 8 : i32
    %183 = arith.index_cast %179 : i32 to index
    %c0_57 = arith.constant 0 : index
    %184 = vector.load %arg7[%183, %c0_57] : memref<64x1024xf32, #tpu.memory_space<vmem>>, vector<8x128xf32>
    %185 = arith.index_cast %182 : i32 to index
    %c128_58 = arith.constant 128 : index
    %186 = vector.load %arg7[%185, %c128_58] : memref<64x1024xf32, #tpu.memory_space<vmem>>, vector<8x128xf32>
    %187 = arith.index_cast %179 : i32 to index
    %c256_59 = arith.constant 256 : index
    %188 = vector.load %arg7[%187, %c256_59] : memref<64x1024xf32, #tpu.memory_space<vmem>>, vector<8x128xf32>
    %189 = arith.index_cast %182 : i32 to index
    %c384_60 = arith.constant 384 : index
    %190 = vector.load %arg7[%189, %c384_60] : memref<64x1024xf32, #tpu.memory_space<vmem>>, vector<8x128xf32>
    %191 = arith.index_cast %179 : i32 to index
    %c512_61 = arith.constant 512 : index
    %192 = vector.load %arg7[%191, %c512_61] : memref<64x1024xf32, #tpu.memory_space<vmem>>, vector<8x128xf32>
    %193 = arith.index_cast %182 : i32 to index
    %c640_62 = arith.constant 640 : index
    %194 = vector.load %arg7[%193, %c640_62] : memref<64x1024xf32, #tpu.memory_space<vmem>>, vector<8x128xf32>
    %195 = arith.index_cast %179 : i32 to index
    %c768_63 = arith.constant 768 : index
    %196 = vector.load %arg7[%195, %c768_63] : memref<64x1024xf32, #tpu.memory_space<vmem>>, vector<8x128xf32>
    %197 = arith.index_cast %182 : i32 to index
    %c896_64 = arith.constant 896 : index
    %198 = vector.load %arg7[%197, %c896_64] : memref<64x1024xf32, #tpu.memory_space<vmem>>, vector<8x128xf32>
    %199 = tpu.concatenate %184, %186, %188, %190, %192, %194, %196, %198 in 1 : vector<8x128xf32>, vector<8x128xf32>, vector<8x128xf32>, vector<8x128xf32>, vector<8x128xf32>, vector<8x128xf32>, vector<8x128xf32>, vector<8x128xf32> -> vector<8x1024xf32>
    %200 = arith.truncf %176 : vector<8x256xf32> to vector<8x256xbf16>
    %cst_65 = arith.constant dense<0.000000e+00> : vector<8x1024xf32>
    %201 = tpu.matmul %200, %7, %cst_65 {dimension_numbers = #tpu.dot_dimension_numbers<[1], [0], [0], [1], [0, 0, 1, 1], [], []>} : vector<8x256xbf16>, vector<256x1024xbf16>, vector<8x1024xf32> -> vector<8x1024xf32>
    %202 = arith.addf %199, %201 : vector<8x1024xf32>
    %203 = vector.extract_strided_slice %202 {offsets = [0, 0], sizes = [8, 768], strides = [1, 1]} : vector<8x1024xf32> to vector<8x768xf32>
    %204 = arith.negf %203 : vector<8x768xf32>
    %205 = math.exp %204 : vector<8x768xf32>
    %cst_66 = arith.constant 1.000000e+00 : f32
    %206 = vector.broadcast %cst_66 : f32 to vector<8x768xf32>
    %207 = arith.addf %206, %205 : vector<8x768xf32>
    %208 = arith.divf %206, %207 : vector<8x768xf32>
    %209 = vector.extract_strided_slice %202 {offsets = [0, 768], sizes = [8, 256], strides = [1, 1]} : vector<8x1024xf32> to vector<8x256xf32>
    %210 = math.tanh %209 : vector<8x256xf32>
    %211 = vector.extract_strided_slice %208 {offsets = [0, 0], sizes = [8, 256], strides = [1, 1]} : vector<8x768xf32> to vector<8x256xf32>
    %212 = vector.extract_strided_slice %208 {offsets = [0, 256], sizes = [8, 256], strides = [1, 1]} : vector<8x768xf32> to vector<8x256xf32>
    %213 = vector.extract_strided_slice %208 {offsets = [0, 512], sizes = [8, 256], strides = [1, 1]} : vector<8x768xf32> to vector<8x256xf32>
    %214 = arith.mulf %212, %174 : vector<8x256xf32>
    %215 = arith.mulf %211, %210 : vector<8x256xf32>
    %216 = arith.addf %214, %215 : vector<8x256xf32>
    %217 = math.tanh %216 : vector<8x256xf32>
    %218 = arith.mulf %213, %217 : vector<8x256xf32>
    %219 = arith.maximumf %177, %218 : vector<8x256xf32>
    %c5_i32 = arith.constant 5 : i32
    %c8_i32_67 = arith.constant 8 : i32
    %220 = arith.muli %c5_i32, %c8_i32_67 : i32
    %221 = tpu.assume_multiple %220, 8 : i32
    %c7_i32_68 = arith.constant 7 : i32
    %222 = arith.subi %c7_i32_68, %c5_i32 : i32
    %c8_i32_69 = arith.constant 8 : i32
    %223 = arith.muli %222, %c8_i32_69 : i32
    %224 = tpu.assume_multiple %223, 8 : i32
    %225 = arith.index_cast %221 : i32 to index
    %c0_70 = arith.constant 0 : index
    %226 = vector.load %arg7[%225, %c0_70] : memref<64x1024xf32, #tpu.memory_space<vmem>>, vector<8x128xf32>
    %227 = arith.index_cast %224 : i32 to index
    %c128_71 = arith.constant 128 : index
    %228 = vector.load %arg7[%227, %c128_71] : memref<64x1024xf32, #tpu.memory_space<vmem>>, vector<8x128xf32>
    %229 = arith.index_cast %221 : i32 to index
    %c256_72 = arith.constant 256 : index
    %230 = vector.load %arg7[%229, %c256_72] : memref<64x1024xf32, #tpu.memory_space<vmem>>, vector<8x128xf32>
    %231 = arith.index_cast %224 : i32 to index
    %c384_73 = arith.constant 384 : index
    %232 = vector.load %arg7[%231, %c384_73] : memref<64x1024xf32, #tpu.memory_space<vmem>>, vector<8x128xf32>
    %233 = arith.index_cast %221 : i32 to index
    %c512_74 = arith.constant 512 : index
    %234 = vector.load %arg7[%233, %c512_74] : memref<64x1024xf32, #tpu.memory_space<vmem>>, vector<8x128xf32>
    %235 = arith.index_cast %224 : i32 to index
    %c640_75 = arith.constant 640 : index
    %236 = vector.load %arg7[%235, %c640_75] : memref<64x1024xf32, #tpu.memory_space<vmem>>, vector<8x128xf32>
    %237 = arith.index_cast %221 : i32 to index
    %c768_76 = arith.constant 768 : index
    %238 = vector.load %arg7[%237, %c768_76] : memref<64x1024xf32, #tpu.memory_space<vmem>>, vector<8x128xf32>
    %239 = arith.index_cast %224 : i32 to index
    %c896_77 = arith.constant 896 : index
    %240 = vector.load %arg7[%239, %c896_77] : memref<64x1024xf32, #tpu.memory_space<vmem>>, vector<8x128xf32>
    %241 = tpu.concatenate %226, %228, %230, %232, %234, %236, %238, %240 in 1 : vector<8x128xf32>, vector<8x128xf32>, vector<8x128xf32>, vector<8x128xf32>, vector<8x128xf32>, vector<8x128xf32>, vector<8x128xf32>, vector<8x128xf32> -> vector<8x1024xf32>
    %242 = arith.truncf %218 : vector<8x256xf32> to vector<8x256xbf16>
    %cst_78 = arith.constant dense<0.000000e+00> : vector<8x1024xf32>
    %243 = tpu.matmul %242, %7, %cst_78 {dimension_numbers = #tpu.dot_dimension_numbers<[1], [0], [0], [1], [0, 0, 1, 1], [], []>} : vector<8x256xbf16>, vector<256x1024xbf16>, vector<8x1024xf32> -> vector<8x1024xf32>
    %244 = arith.addf %241, %243 : vector<8x1024xf32>
    %245 = vector.extract_strided_slice %244 {offsets = [0, 0], sizes = [8, 768], strides = [1, 1]} : vector<8x1024xf32> to vector<8x768xf32>
    %246 = arith.negf %245 : vector<8x768xf32>
    %247 = math.exp %246 : vector<8x768xf32>
    %cst_79 = arith.constant 1.000000e+00 : f32
    %248 = vector.broadcast %cst_79 : f32 to vector<8x768xf32>
    %249 = arith.addf %248, %247 : vector<8x768xf32>
    %250 = arith.divf %248, %249 : vector<8x768xf32>
    %251 = vector.extract_strided_slice %244 {offsets = [0, 768], sizes = [8, 256], strides = [1, 1]} : vector<8x1024xf32> to vector<8x256xf32>
    %252 = math.tanh %251 : vector<8x256xf32>
    %253 = vector.extract_strided_slice %250 {offsets = [0, 0], sizes = [8, 256], strides = [1, 1]} : vector<8x768xf32> to vector<8x256xf32>
    %254 = vector.extract_strided_slice %250 {offsets = [0, 256], sizes = [8, 256], strides = [1, 1]} : vector<8x768xf32> to vector<8x256xf32>
    %255 = vector.extract_strided_slice %250 {offsets = [0, 512], sizes = [8, 256], strides = [1, 1]} : vector<8x768xf32> to vector<8x256xf32>
    %256 = arith.mulf %254, %216 : vector<8x256xf32>
    %257 = arith.mulf %253, %252 : vector<8x256xf32>
    %258 = arith.addf %256, %257 : vector<8x256xf32>
    %259 = math.tanh %258 : vector<8x256xf32>
    %260 = arith.mulf %255, %259 : vector<8x256xf32>
    %261 = arith.maximumf %219, %260 : vector<8x256xf32>
    %c6_i32 = arith.constant 6 : i32
    %c8_i32_80 = arith.constant 8 : i32
    %262 = arith.muli %c6_i32, %c8_i32_80 : i32
    %263 = tpu.assume_multiple %262, 8 : i32
    %c7_i32_81 = arith.constant 7 : i32
    %264 = arith.subi %c7_i32_81, %c6_i32 : i32
    %c8_i32_82 = arith.constant 8 : i32
    %265 = arith.muli %264, %c8_i32_82 : i32
    %266 = tpu.assume_multiple %265, 8 : i32
    %267 = arith.index_cast %263 : i32 to index
    %c0_83 = arith.constant 0 : index
    %268 = vector.load %arg7[%267, %c0_83] : memref<64x1024xf32, #tpu.memory_space<vmem>>, vector<8x128xf32>
    %269 = arith.index_cast %266 : i32 to index
    %c128_84 = arith.constant 128 : index
    %270 = vector.load %arg7[%269, %c128_84] : memref<64x1024xf32, #tpu.memory_space<vmem>>, vector<8x128xf32>
    %271 = arith.index_cast %263 : i32 to index
    %c256_85 = arith.constant 256 : index
    %272 = vector.load %arg7[%271, %c256_85] : memref<64x1024xf32, #tpu.memory_space<vmem>>, vector<8x128xf32>
    %273 = arith.index_cast %266 : i32 to index
    %c384_86 = arith.constant 384 : index
    %274 = vector.load %arg7[%273, %c384_86] : memref<64x1024xf32, #tpu.memory_space<vmem>>, vector<8x128xf32>
    %275 = arith.index_cast %263 : i32 to index
    %c512_87 = arith.constant 512 : index
    %276 = vector.load %arg7[%275, %c512_87] : memref<64x1024xf32, #tpu.memory_space<vmem>>, vector<8x128xf32>
    %277 = arith.index_cast %266 : i32 to index
    %c640_88 = arith.constant 640 : index
    %278 = vector.load %arg7[%277, %c640_88] : memref<64x1024xf32, #tpu.memory_space<vmem>>, vector<8x128xf32>
    %279 = arith.index_cast %263 : i32 to index
    %c768_89 = arith.constant 768 : index
    %280 = vector.load %arg7[%279, %c768_89] : memref<64x1024xf32, #tpu.memory_space<vmem>>, vector<8x128xf32>
    %281 = arith.index_cast %266 : i32 to index
    %c896_90 = arith.constant 896 : index
    %282 = vector.load %arg7[%281, %c896_90] : memref<64x1024xf32, #tpu.memory_space<vmem>>, vector<8x128xf32>
    %283 = tpu.concatenate %268, %270, %272, %274, %276, %278, %280, %282 in 1 : vector<8x128xf32>, vector<8x128xf32>, vector<8x128xf32>, vector<8x128xf32>, vector<8x128xf32>, vector<8x128xf32>, vector<8x128xf32>, vector<8x128xf32> -> vector<8x1024xf32>
    %284 = arith.truncf %260 : vector<8x256xf32> to vector<8x256xbf16>
    %cst_91 = arith.constant dense<0.000000e+00> : vector<8x1024xf32>
    %285 = tpu.matmul %284, %7, %cst_91 {dimension_numbers = #tpu.dot_dimension_numbers<[1], [0], [0], [1], [0, 0, 1, 1], [], []>} : vector<8x256xbf16>, vector<256x1024xbf16>, vector<8x1024xf32> -> vector<8x1024xf32>
    %286 = arith.addf %283, %285 : vector<8x1024xf32>
    %287 = vector.extract_strided_slice %286 {offsets = [0, 0], sizes = [8, 768], strides = [1, 1]} : vector<8x1024xf32> to vector<8x768xf32>
    %288 = arith.negf %287 : vector<8x768xf32>
    %289 = math.exp %288 : vector<8x768xf32>
    %cst_92 = arith.constant 1.000000e+00 : f32
    %290 = vector.broadcast %cst_92 : f32 to vector<8x768xf32>
    %291 = arith.addf %290, %289 : vector<8x768xf32>
    %292 = arith.divf %290, %291 : vector<8x768xf32>
    %293 = vector.extract_strided_slice %286 {offsets = [0, 768], sizes = [8, 256], strides = [1, 1]} : vector<8x1024xf32> to vector<8x256xf32>
    %294 = math.tanh %293 : vector<8x256xf32>
    %295 = vector.extract_strided_slice %292 {offsets = [0, 0], sizes = [8, 256], strides = [1, 1]} : vector<8x768xf32> to vector<8x256xf32>
    %296 = vector.extract_strided_slice %292 {offsets = [0, 256], sizes = [8, 256], strides = [1, 1]} : vector<8x768xf32> to vector<8x256xf32>
    %297 = vector.extract_strided_slice %292 {offsets = [0, 512], sizes = [8, 256], strides = [1, 1]} : vector<8x768xf32> to vector<8x256xf32>
    %298 = arith.mulf %296, %258 : vector<8x256xf32>
    %299 = arith.mulf %295, %294 : vector<8x256xf32>
    %300 = arith.addf %298, %299 : vector<8x256xf32>
    %301 = math.tanh %300 : vector<8x256xf32>
    %302 = arith.mulf %297, %301 : vector<8x256xf32>
    %303 = arith.maximumf %261, %302 : vector<8x256xf32>
    %c7_i32_93 = arith.constant 7 : i32
    %c8_i32_94 = arith.constant 8 : i32
    %304 = arith.muli %c7_i32_93, %c8_i32_94 : i32
    %305 = tpu.assume_multiple %304, 8 : i32
    %c7_i32_95 = arith.constant 7 : i32
    %306 = arith.subi %c7_i32_95, %c7_i32_93 : i32
    %c8_i32_96 = arith.constant 8 : i32
    %307 = arith.muli %306, %c8_i32_96 : i32
    %308 = tpu.assume_multiple %307, 8 : i32
    %309 = arith.index_cast %305 : i32 to index
    %c0_97 = arith.constant 0 : index
    %310 = vector.load %arg7[%309, %c0_97] : memref<64x1024xf32, #tpu.memory_space<vmem>>, vector<8x128xf32>
    %311 = arith.index_cast %308 : i32 to index
    %c128_98 = arith.constant 128 : index
    %312 = vector.load %arg7[%311, %c128_98] : memref<64x1024xf32, #tpu.memory_space<vmem>>, vector<8x128xf32>
    %313 = arith.index_cast %305 : i32 to index
    %c256_99 = arith.constant 256 : index
    %314 = vector.load %arg7[%313, %c256_99] : memref<64x1024xf32, #tpu.memory_space<vmem>>, vector<8x128xf32>
    %315 = arith.index_cast %308 : i32 to index
    %c384_100 = arith.constant 384 : index
    %316 = vector.load %arg7[%315, %c384_100] : memref<64x1024xf32, #tpu.memory_space<vmem>>, vector<8x128xf32>
    %317 = arith.index_cast %305 : i32 to index
    %c512_101 = arith.constant 512 : index
    %318 = vector.load %arg7[%317, %c512_101] : memref<64x1024xf32, #tpu.memory_space<vmem>>, vector<8x128xf32>
    %319 = arith.index_cast %308 : i32 to index
    %c640_102 = arith.constant 640 : index
    %320 = vector.load %arg7[%319, %c640_102] : memref<64x1024xf32, #tpu.memory_space<vmem>>, vector<8x128xf32>
    %321 = arith.index_cast %305 : i32 to index
    %c768_103 = arith.constant 768 : index
    %322 = vector.load %arg7[%321, %c768_103] : memref<64x1024xf32, #tpu.memory_space<vmem>>, vector<8x128xf32>
    %323 = arith.index_cast %308 : i32 to index
    %c896_104 = arith.constant 896 : index
    %324 = vector.load %arg7[%323, %c896_104] : memref<64x1024xf32, #tpu.memory_space<vmem>>, vector<8x128xf32>
    %325 = tpu.concatenate %310, %312, %314, %316, %318, %320, %322, %324 in 1 : vector<8x128xf32>, vector<8x128xf32>, vector<8x128xf32>, vector<8x128xf32>, vector<8x128xf32>, vector<8x128xf32>, vector<8x128xf32>, vector<8x128xf32> -> vector<8x1024xf32>
    %326 = arith.truncf %302 : vector<8x256xf32> to vector<8x256xbf16>
    %cst_105 = arith.constant dense<0.000000e+00> : vector<8x1024xf32>
    %327 = tpu.matmul %326, %7, %cst_105 {dimension_numbers = #tpu.dot_dimension_numbers<[1], [0], [0], [1], [0, 0, 1, 1], [], []>} : vector<8x256xbf16>, vector<256x1024xbf16>, vector<8x1024xf32> -> vector<8x1024xf32>
    %328 = arith.addf %325, %327 : vector<8x1024xf32>
    %329 = vector.extract_strided_slice %328 {offsets = [0, 0], sizes = [8, 768], strides = [1, 1]} : vector<8x1024xf32> to vector<8x768xf32>
    %330 = arith.negf %329 : vector<8x768xf32>
    %331 = math.exp %330 : vector<8x768xf32>
    %cst_106 = arith.constant 1.000000e+00 : f32
    %332 = vector.broadcast %cst_106 : f32 to vector<8x768xf32>
    %333 = arith.addf %332, %331 : vector<8x768xf32>
    %334 = arith.divf %332, %333 : vector<8x768xf32>
    %335 = vector.extract_strided_slice %328 {offsets = [0, 768], sizes = [8, 256], strides = [1, 1]} : vector<8x1024xf32> to vector<8x256xf32>
    %336 = math.tanh %335 : vector<8x256xf32>
    %337 = vector.extract_strided_slice %334 {offsets = [0, 0], sizes = [8, 256], strides = [1, 1]} : vector<8x768xf32> to vector<8x256xf32>
    %338 = vector.extract_strided_slice %334 {offsets = [0, 256], sizes = [8, 256], strides = [1, 1]} : vector<8x768xf32> to vector<8x256xf32>
    %339 = vector.extract_strided_slice %334 {offsets = [0, 512], sizes = [8, 256], strides = [1, 1]} : vector<8x768xf32> to vector<8x256xf32>
    %340 = arith.mulf %338, %300 : vector<8x256xf32>
    %341 = arith.mulf %337, %336 : vector<8x256xf32>
    %342 = arith.addf %340, %341 : vector<8x256xf32>
    %343 = math.tanh %342 : vector<8x256xf32>
    %344 = arith.mulf %339, %343 : vector<8x256xf32>
    %345 = arith.maximumf %303, %344 : vector<8x256xf32>
    %c8_i32_107 = arith.constant 8 : i32
    %346 = arith.truncf %345 : vector<8x256xf32> to vector<8x256xbf16>
    %c0_108 = arith.constant 0 : index
    %c0_109 = arith.constant 0 : index
    %347 = vector.load %arg4[%c0_108, %c0_109] : memref<256x128xbf16, #tpu.memory_space<vmem>>, vector<256x128xbf16>
    %cst_110 = arith.constant dense<0.000000e+00> : vector<8x128xf32>
    %348 = tpu.matmul %346, %347, %cst_110 {dimension_numbers = #tpu.dot_dimension_numbers<[1], [0], [0], [1], [0, 0, 1, 1], [], []>} : vector<8x256xbf16>, vector<256x128xbf16>, vector<8x128xf32> -> vector<8x128xf32>
    %c0_111 = arith.constant 0 : index
    %c0_112 = arith.constant 0 : index
    %349 = vector.load %arg5[%c0_111, %c0_112] : memref<1x128xf32, #tpu.memory_space<vmem>>, vector<1x128xf32>
    %350 = vector.broadcast %349 : vector<1x128xf32> to vector<8x128xf32>
    %351 = arith.addf %348, %350 : vector<8x128xf32>
    %c0_113 = arith.constant 0 : index
    %c0_114 = arith.constant 0 : index
    %352 = vector.load %arg6[%c0_113, %c0_114] : memref<8x128xf32, #tpu.memory_space<vmem>>, vector<8x128xf32>
    tpu.vector_store %arg6[%c0_113, %c0_114], %351 {strides = array<i32>} : memref<8x128xf32, #tpu.memory_space<vmem>>, vector<8x128xf32>,
    return
  }
}

</mosaic_0001>

<bundles_post_ra>
// kernel: tpu_custom_call.1
= control target key start
LH: loop header
LB: loop body
LE: loop exit
PB: predicated region body
PF: predicated region fallthrough
CT: control target
= control target key end

     0   :  { %11 = vsyncpa [#allocation4], 0  ;;  %s6370_s0 = inlined_call_operand.hbm [shape: bf16[64,128], index: 0, kind: input, shape index: {}]   ;;  %s6371_s1 = inlined_call_operand.hbm [shape: bf16[128,1024], index: 1, kind: input, shape index: {}]   ;;  %s6372_s2 = inlined_call_operand.hbm [shape: f32[1,1024], index: 2, kind: input, shape index: {}]   ;;  %s6373_s3 = inlined_call_operand.hbm [shape: bf16[256,1024], index: 3, kind: input, shape index: {}]   ;;  %s6374_s4 = inlined_call_operand.hbm [shape: bf16[256,128], index: 4, kind: input, shape index: {}]   ;;  %s6375_s5 = inlined_call_operand.vmem [shape: f32[1,128], index: 5, kind: input, shape index: {}]   ;;  %s6376_s6 = inlined_call_operand.hbm [shape: f32[8,128], index: 6, kind: output, shape index: {}]  }
   0x1   :  { %12 = vsyncpa [#allocation7], 0 }
   0x2   :  { %13 = vsyncpa [#allocation10], 0 }
   0x3   :  { %14 = vsyncpa [#allocation5], 0  ;;  %s4461_s21 = smov [#allocation6]   ;;  %s4321_s25 = scalar_lea.hbm %s6371_s1, 8192 }
   0x4   :  { %s32_s22 = sshll.u32 %s4461_s21, 4  ;;  %p4322_p0 = scmp.ne.s32.totalorder %s6371_s1, %s4321_s25  ;;  %s33_s22 = int_to_ptr.vmem [resolvable:$true] %s32_s22 }
   0x5   :  { %p4325_p1 = scmp.lt.u32.totalorder %s4321_s25, %s6371_s1 }
   0x7   :  { %p4327_p2 = pnand %p4325_p1, %p4322_p0 }
   0x9   :  { %4330 = shalt.err (!%p4327_p2)
}
   0xa   :  { %s4331_s30 = scalar_lea.vmem %s33_s22, 8192  ;;  %p4336_p4 = scmp.lt.s32.totalorder %s33_s22, %s33_s22 }
   0xb   :  { %p4332_p3 = scmp.ne.s32.totalorder %s33_s22, %s4331_s30  ;;  %p4337_p5 = scmp.lt.s32.totalorder %s4331_s30, %s4331_s30 }
   0xd   :  { %p4338_p6 = por %p4337_p5, %p4336_p4 }
   0xf   :  { %p4339_p7 = pnand %p4338_p6, %p4332_p3 }
  0x11   :  { %4342 = shalt.err (!%p4339_p7)
}
  0x12   :  { %s4462_s7 = smov 512   ;;  %s4463_s8 = smov 32  }
  0x13   :  { %38 = dma.hbm_to_vmem [thread:$0]  %s6371_s1, 8192, %s33_s22, [#allocation7], %s4462_s7, %s4462_s7, %s4463_s8  }
  0x14   :  { %s4464_s11 = smov [#allocation9]   ;;  %s4465_s13 = smov [#allocation3]  }
  0x15   :  { %s54_s12 = sshll.u32 %s4464_s11, 4  ;;  %s20_s14 = sshll.u32 %s4465_s13, 4  ;;  %s55_s12 = int_to_ptr.vmem [resolvable:$true] %s54_s12  ;;  %s21_s14 = int_to_ptr.vmem [resolvable:$true] %s20_s14 }
  0x16   :  { %s4343_s17 = scalar_lea.hbm %s6373_s3, 16384 }
  0x17   :  { %p4344_p8 = scmp.ne.s32.totalorder %s6373_s3, %s4343_s17  ;;  %p4347_p9 = scmp.lt.u32.totalorder %s4343_s17, %s6373_s3 }
  0x19   :  { %p4349_p10 = pnand %p4347_p9, %p4344_p8 }
  0x1b   :  { %4352 = shalt.err (!%p4349_p10)
}
  0x1c   :  { %s4353_s1 = scalar_lea.vmem %s55_s12, 16384  ;;  %p4358_p12 = scmp.lt.s32.totalorder %s55_s12, %s55_s12 }
  0x1d   :  { %p4354_p11 = scmp.ne.s32.totalorder %s55_s12, %s4353_s1  ;;  %p4359_p13 = scmp.lt.s32.totalorder %s4353_s1, %s4353_s1 }
  0x1f   :  { %p4360_p0 = por %p4359_p13, %p4358_p12 }
  0x21   :  { %p4361_p1 = pnand %p4360_p0, %p4354_p11 }
  0x23   :  { %4364 = shalt.err (!%p4361_p1)
}
  0x24   :  { %60 = dma.hbm_to_vmem [thread:$0]  %s6373_s3, 16384, %s55_s12, [#allocation10], %s4462_s7, %s4462_s7, %s4463_s8  }
  0x25   :  { %s4365_s26 = scalar_lea.hbm %s6370_s0, 512 }
  0x26   :  { %p4366_p2 = scmp.ne.s32.totalorder %s6370_s0, %s4365_s26  ;;  %p4369_p3 = scmp.lt.u32.totalorder %s4365_s26, %s6370_s0 }
  0x28   :  { %p4371_p4 = pnand %p4369_p3, %p4366_p2 }
  0x2a   :  { %4374 = shalt.err (!%p4371_p4)
}
  0x2b   :  { %s4375_s9 = scalar_lea.vmem %s21_s14, 512  ;;  %p4380_p6 = scmp.lt.s32.totalorder %s21_s14, %s21_s14 }
  0x2c   :  { %p4376_p5 = scmp.ne.s32.totalorder %s21_s14, %s4375_s9  ;;  %p4381_p7 = scmp.lt.s32.totalorder %s4375_s9, %s4375_s9 }
  0x2e   :  { %p4382_p8 = por %p4381_p7, %p4380_p6 }
  0x30   :  { %p4383_p9 = pnand %p4382_p8, %p4376_p5 }
  0x32   :  { %4386 = shalt.err (!%p4383_p9)
}
  0x33   :  { %s4466_s3 = smov 64   ;;  %s4467_s7 = smov 4  }
  0x34   :  { %26 = dma.hbm_to_vmem [thread:$0]  %s6370_s0, 512, %s21_s14, [#allocation4], %s4466_s3, %s4466_s3, %s4467_s7  }
  0x35   :  { %s4468_s11 = smov [#allocation8]   ;;  %s4469_s13 = smov [#allocation11]  }
  0x36   :  { %s45_s12 = sshll.u32 %s4468_s11, 4  ;;  %s66_s15 = sshll.u32 %s4469_s13, 4  ;;  %s46_s12 = int_to_ptr.vmem [resolvable:$true] %s45_s12  ;;  %s67_s15 = int_to_ptr.vmem [resolvable:$true] %s66_s15 }
  0x37   :  { %s4387_s18 = scalar_lea.hbm %s6372_s2, 128 }
  0x38   :  { %p4388_p10 = scmp.ne.s32.totalorder %s6372_s2, %s4387_s18  ;;  %p4391_p11 = scmp.lt.u32.totalorder %s4387_s18, %s6372_s2 }
  0x3a   :  { %p4393_p12 = pnand %p4391_p11, %p4388_p10 }
  0x3c   :  { %4396 = shalt.err (!%p4393_p12)
}
  0x3d   :  { %s4397_s0 = scalar_lea.vmem %s46_s12, 128  ;;  %p4402_p0 = scmp.lt.s32.totalorder %s46_s12, %s46_s12 }
  0x3e   :  { %p4398_p13 = scmp.ne.s32.totalorder %s46_s12, %s4397_s0  ;;  %p4403_p1 = scmp.lt.s32.totalorder %s4397_s0, %s4397_s0 }
  0x40   :  { %p4404_p2 = por %p4403_p1, %p4402_p0 }
  0x42   :  { %p4405_p3 = pnand %p4404_p2, %p4398_p13 }
  0x44   :  { %4408 = shalt.err (!%p4405_p3)
}
  0x45   :  { %48 = dma.hbm_to_vmem [thread:$0]  %s6372_s2, 128, %s46_s12, [#allocation7]  }
  0x46   :  { %s4409_s25 = scalar_lea.hbm %s6374_s4, 2048 }
  0x47   :  { %p4410_p4 = scmp.ne.s32.totalorder %s6374_s4, %s4409_s25  ;;  %p4413_p5 = scmp.lt.u32.totalorder %s4409_s25, %s6374_s4 }
  0x49   :  { %p4415_p6 = pnand %p4413_p5, %p4410_p4 }
  0x4b   :  { %4418 = shalt.err (!%p4415_p6)
}
  0x4c   :  { %s4419_s30 = scalar_lea.vmem %s67_s15, 2048  ;;  %p4424_p8 = scmp.lt.s32.totalorder %s67_s15, %s67_s15 }
  0x4d   :  { %p4420_p7 = scmp.ne.s32.totalorder %s67_s15, %s4419_s30  ;;  %p4425_p9 = scmp.lt.s32.totalorder %s4419_s30, %s4419_s30 }
  0x4f   :  { %p4426_p10 = por %p4425_p9, %p4424_p8 }
  0x51   :  { %p4427_p11 = pnand %p4426_p10, %p4420_p7 }
  0x53   :  { %4430 = shalt.err (!%p4427_p11)
}
  0x54   :  { %72 = dma.hbm_to_vmem [thread:$0]  %s6374_s4, 2048, %s67_s15, [#allocation10], %s4466_s3, %s4466_s3, %s4467_s7  }
  0x55   :  { %4453 = dma.done.wait [#allocation4], 512  }
  0x56   :  { %4454 = vsyncadd [#allocation4], 4294966784 }
  0x57   :  { %4455 = dma.done.wait [#allocation7], 8320  }
  0x58   :  { %4456 = vsyncadd [#allocation7], 4294958976 }
  0x59   :  { %4457 = dma.done.wait [#allocation10], 18432  }
  0x5a   :  { %4458 = vsyncadd [#allocation10], 4294948864  ;;  %v6377_v0 = vmov 0   ;;  %v99_v1 = vld [vmem:[#allocation6] sm:$0xff]  ;;  %v100_v3 = vld [vmem:[#allocation6 + $0x8] sm:$0xff]  ;;  %s4471_s7 = smov [#allocation12]  }
  0x5b   :  { %581 = vmatprep.mubr.bf16.mxu0 %v6377_v0  ;;  %654 = vmatprep.mubr.bf16.mxu1 %v6377_v0  ;;  %v103_v2 = vld [vmem:[#allocation6 + $0x20] sm:$0xff]  ;;  %v104_v5 = vld [vmem:[#allocation6 + $0x28] sm:$0xff]  ;;  %v101_v63 = vld [vmem:[#allocation6 + $0x10] sm:$0xff]  ;;  %s3733_s8 = sshll.u32 %s4471_s7, 4  ;;  %s3734_s8 = int_to_ptr.vmem [resolvable:$true] %s3733_s8 }
  0x5c   :  { %v3756_v4 = vcombine.high %v99_v1, %v103_v2  ;;  %v3755_v6 = vcombine.low %v99_v1, %v103_v2  ;;  %v107_v7 = vld [vmem:[#allocation6 + $0x40] sm:$0xff]  ;;  %v3758_v9 = vcombine.high %v100_v3, %v104_v5  ;;  %v3757_v10 = vcombine.low %v100_v3, %v104_v5  ;;  %v108_v12 = vld [vmem:[#allocation6 + $0x48] sm:$0xff]  ;;  %v105_v1 = vld [vmem:[#allocation6 + $0x30] sm:$0xff]  ;;  %s4431_s10 = scalar_lea.vmem %s3734_s8, 128  ;;  %p4436_p13 = scmp.lt.s32.totalorder %s3734_s8, %s3734_s8 }
  0x5d   :  { %v111_v8 = vld [vmem:[#allocation6 + $0x60] sm:$0xff]  ;;  %v112_v13 = vld [vmem:[#allocation6 + $0x68] sm:$0xff]  ;;  %v102_v2 = vld [vmem:[#allocation6 + $0x18] sm:$0xff]  ;;  %p4432_p12 = scmp.ne.s32.totalorder %s3734_s8, %s4431_s10  ;;  %p4437_p0 = scmp.lt.s32.totalorder %s4431_s10, %s4431_s10 }
  0x5e   :  { %v3764_v11 = vcombine.high %v107_v7, %v111_v8  ;;  %v115_v14 = vld [vmem:[#allocation6 + $0x80] sm:$0xff]  ;;  %549 = vmatprep.subr.bf16.mxu0 %v3756_v4  ;;  %v3766_v15 = vcombine.high %v108_v12, %v112_v13  ;;  %v116_v17 = vld [vmem:[#allocation6 + $0x88] sm:$0xff]  ;;  %622 = vmatprep.subr.bf16.mxu1 %v3758_v9  ;;  %v3763_v19 = vcombine.low %v107_v7, %v111_v8  ;;  %v106_v3 = vld [vmem:[#allocation6 + $0x38] sm:$0xff] }
  0x5f   :  { %v119_v16 = vld [vmem:[#allocation6 + $0xa0] sm:$0xff]  ;;  %v120_v18 = vld [vmem:[#allocation6 + $0xa8] sm:$0xff]  ;;  %550 = vmatpush1.bf16.msra.mxu0 %v3755_v6  ;;  %623 = vmatpush1.bf16.msra.mxu1 %v3757_v10  ;;  %v3765_v20 = vcombine.low %v108_v12, %v112_v13  ;;  %v3760_v6 = vcombine.high %v101_v63, %v105_v1  ;;  %v3762_v7 = vcombine.high %v102_v2, %v106_v3  ;;  %v109_v8 = vld [vmem:[#allocation6 + $0x50] sm:$0xff]  ;;  %p4438_p1 = por %p4437_p0, %p4436_p13 }
  0x60   :  { %551 = vmatprep.subr.bf16.mxu0 %v3764_v11  ;;  %v3772_v21 = vcombine.high %v115_v14, %v119_v16  ;;  %624 = vmatprep.subr.bf16.mxu1 %v3766_v15  ;;  %v3774_v22 = vcombine.high %v116_v17, %v120_v18  ;;  %v123_v23 = vld [vmem:[#allocation6 + $0xc0] sm:$0xff]  ;;  %v124_v25 = vld [vmem:[#allocation6 + $0xc8] sm:$0xff]  ;;  %v3771_v27 = vcombine.low %v115_v14, %v119_v16  ;;  %v113_v9 = vld [vmem:[#allocation6 + $0x70] sm:$0xff] }
  0x61   :  { %v127_v24 = vld [vmem:[#allocation6 + $0xe0] sm:$0xff]  ;;  %v128_v26 = vld [vmem:[#allocation6 + $0xe8] sm:$0xff]  ;;  %v3773_v28 = vcombine.low %v116_v17, %v120_v18  ;;  %v110_v11 = vld [vmem:[#allocation6 + $0x58] sm:$0xff]  ;;  %v3759_v13 = vcombine.low %v101_v63, %v105_v1  ;;  %v3761_v14 = vcombine.low %v102_v2, %v106_v3  ;;  %v3768_v15 = vcombine.high %v109_v8, %v113_v9  ;;  %p4439_p2 = pnand %p4438_p1, %p4432_p12 }
  0x62   :  { %v3780_v29 = vcombine.high %v123_v23, %v127_v24  ;;  %v3782_v30 = vcombine.high %v124_v25, %v128_v26  ;;  %v131_v31 = vld [vmem:[#allocation6 + $0x100] sm:$0xff]  ;;  %v132_v33 = vld [vmem:[#allocation6 + $0x108] sm:$0xff]  ;;  %v3779_v35 = vcombine.low %v123_v23, %v127_v24  ;;  %v3781_v36 = vcombine.low %v124_v25, %v128_v26  ;;  %v114_v12 = vld [vmem:[#allocation6 + $0x78] sm:$0xff] }
  0x63   :  { %552 = vmatpush1.bf16.msra.mxu0 %v3763_v19  ;;  %625 = vmatpush1.bf16.msra.mxu1 %v3765_v20  ;;  %v135_v32 = vld [vmem:[#allocation6 + $0x120] sm:$0xff]  ;;  %v136_v34 = vld [vmem:[#allocation6 + $0x128] sm:$0xff]  ;;  %v3770_v16 = vcombine.high %v110_v11, %v114_v12  ;;  %v117_v17 = vld [vmem:[#allocation6 + $0x90] sm:$0xff] }
  0x64   :  { %553 = vmatprep.subr.bf16.mxu0 %v3772_v21  ;;  %626 = vmatprep.subr.bf16.mxu1 %v3774_v22  ;;  %v3788_v37 = vcombine.high %v131_v31, %v135_v32  ;;  %v139_v38 = vld [vmem:[#allocation6 + $0x140] sm:$0xff]  ;;  %v3790_v39 = vcombine.high %v132_v33, %v136_v34  ;;  %v140_v41 = vld [vmem:[#allocation6 + $0x148] sm:$0xff]  ;;  %v3787_v43 = vcombine.low %v131_v31, %v135_v32  ;;  %v121_v18 = vld [vmem:[#allocation6 + $0xb0] sm:$0xff] }
  0x65   :  { %v143_v40 = vld [vmem:[#allocation6 + $0x160] sm:$0xff]  ;;  %v144_v42 = vld [vmem:[#allocation6 + $0x168] sm:$0xff]  ;;  %v3789_v44 = vcombine.low %v132_v33, %v136_v34  ;;  %v118_v19 = vld [vmem:[#allocation6 + $0x98] sm:$0xff]  ;;  %v3767_v21 = vcombine.low %v109_v8, %v113_v9  ;;  %v3769_v22 = vcombine.low %v110_v11, %v114_v12  ;;  %v3776_v23 = vcombine.high %v117_v17, %v121_v18 }
  0x66   :  { %v3796_v45 = vcombine.high %v139_v38, %v143_v40  ;;  %v147_v46 = vld [vmem:[#allocation6 + $0x180] sm:$0xff]  ;;  %v3798_v47 = vcombine.high %v140_v41, %v144_v42  ;;  %v148_v49 = vld [vmem:[#allocation6 + $0x188] sm:$0xff]  ;;  %v3795_v51 = vcombine.low %v139_v38, %v143_v40  ;;  %v3797_v52 = vcombine.low %v140_v41, %v144_v42  ;;  %v122_v20 = vld [vmem:[#allocation6 + $0xb8] sm:$0xff] }
  0x67   :  { %554 = vmatpush1.bf16.msra.mxu0 %v3771_v27  ;;  %627 = vmatpush1.bf16.msra.mxu1 %v3773_v28  ;;  %v151_v48 = vld [vmem:[#allocation6 + $0x1a0] sm:$0xff]  ;;  %v152_v50 = vld [vmem:[#allocation6 + $0x1a8] sm:$0xff]  ;;  %v3778_v24 = vcombine.high %v118_v19, %v122_v20  ;;  %v125_v25 = vld [vmem:[#allocation6 + $0xd0] sm:$0xff]  ;;  %v3777_v31 = vcombine.low %v118_v19, %v122_v20 }
  0x68   :  { %555 = vmatprep.subr.bf16.mxu0 %v3780_v29  ;;  %628 = vmatprep.subr.bf16.mxu1 %v3782_v30  ;;  %v3804_v53 = vcombine.high %v147_v46, %v151_v48  ;;  %v3806_v54 = vcombine.high %v148_v49, %v152_v50  ;;  %v155_v55 = vld [vmem:[#allocation6 + $0x1c0] sm:$0xff]  ;;  %v156_v57 = vld [vmem:[#allocation6 + $0x1c8] sm:$0xff]  ;;  %v3803_v59 = vcombine.low %v147_v46, %v151_v48  ;;  %v129_v26 = vld [vmem:[#allocation6 + $0xf0] sm:$0xff] }
  0x69   :  { %v159_v56 = vld [vmem:[#allocation6 + $0x1e0] sm:$0xff]  ;;  %v160_v58 = vld [vmem:[#allocation6 + $0x1e8] sm:$0xff]  ;;  %v3805_v60 = vcombine.low %v148_v49, %v152_v50  ;;  %v126_v28 = vld [vmem:[#allocation6 + $0xd8] sm:$0xff]  ;;  %v3775_v30 = vcombine.low %v117_v17, %v121_v18  ;;  %v3784_v32 = vcombine.high %v125_v25, %v129_v26  ;;  %v3783_v38 = vcombine.low %v125_v25, %v129_v26 }
  0x6a   :  { %v3812_v61 = vcombine.high %v155_v55, %v159_v56  ;;  %v3814_v62 = vcombine.high %v156_v57, %v160_v58  ;;  %v3811_v4 = vcombine.low %v155_v55, %v159_v56  ;;  %v3813_v5 = vcombine.low %v156_v57, %v160_v58  ;;  %v4575_v10 = vld [vmem:[#allocation3] sm:$0xff]   ;;  %v4581_v27 = vld [vmem:[#allocation3 + $0x8] sm:$0xff]   ;;  %v130_v29 = vld [vmem:[#allocation6 + $0xf8] sm:$0xff] }
  0x6b   :  { %556 = vmatpush1.bf16.msra.mxu0 %v3779_v35  ;;  %629 = vmatpush1.bf16.msra.mxu1 %v3781_v36  ;;  %v3786_v33 = vcombine.high %v126_v28, %v130_v29  ;;  %v133_v34 = vld [vmem:[#allocation6 + $0x110] sm:$0xff]  ;;  %v134_v36 = vld [vmem:[#allocation6 + $0x118] sm:$0xff] }
  0x6c   :  { %557 = vmatprep.subr.bf16.mxu0 %v3788_v37  ;;  %630 = vmatprep.subr.bf16.mxu1 %v3790_v39  ;;  %v137_v35 = vld [vmem:[#allocation6 + $0x130] sm:$0xff]  ;;  %v138_v37 = vld [vmem:[#allocation6 + $0x138] sm:$0xff]  ;;  %v3785_v39 = vcombine.low %v126_v28, %v130_v29  ;;  %v929_v28 = vld [vmem:[#allocation9 + $0xc0] sm:$0xff] }
  0x6d   :  { %v3792_v40 = vcombine.high %v133_v34, %v137_v35  ;;  %v3794_v41 = vcombine.high %v134_v36, %v138_v37  ;;  %v141_v42 = vld [vmem:[#allocation6 + $0x150] sm:$0xff]  ;;  %v146_v46 = vld [vmem:[#allocation6 + $0x178] sm:$0xff]  ;;  %v3793_v48 = vcombine.low %v134_v36, %v138_v37  ;;  %v933_v29 = vld [vmem:[#allocation9 + $0xe0] sm:$0xff] }
  0x6e   :  { %v162_v63 = vld [vmem:[#allocation6 + $0x1f8] sm:$0xff]  ;;  %v910_v8 = vld [vmem:[#allocation9 + $0x28] sm:$0xff]  ;;  %v941_v36 = vld [vmem:[#allocation9 + $0x120] sm:$0xff] }
  0x6f   :  { %558 = vmatpush1.bf16.msra.mxu0 %v3787_v43  ;;  %631 = vmatpush1.bf16.msra.mxu1 %v3789_v44  ;;  %v145_v43 = vld [vmem:[#allocation6 + $0x170] sm:$0xff] }
  0x70   :  { %559 = vmatprep.subr.bf16.mxu0 %v3796_v45  ;;  %632 = vmatprep.subr.bf16.mxu1 %v3798_v47  ;;  %v4587_v44 = vld [vmem:[#allocation3 + $0x10] sm:$0xff]   ;;  %v142_v45 = vld [vmem:[#allocation6 + $0x158] sm:$0xff]  ;;  %v3791_v47 = vcombine.low %v133_v34, %v137_v35  ;;  %v3800_v49 = vcombine.high %v141_v42, %v145_v43  ;;  %v3799_v55 = vcombine.low %v141_v42, %v145_v43  ;;  %v937_v35 = vld [vmem:[#allocation9 + $0x100] sm:$0xff] }
  0x71   :  { %v3802_v50 = vcombine.high %v142_v45, %v146_v46  ;;  %v3801_v56 = vcombine.low %v142_v45, %v146_v46  ;;  %v918_v17 = vld [vmem:[#allocation9 + $0x68] sm:$0xff]  ;;  %v4643_v42 = vcombine.low %v929_v28, %v933_v29  ;;  %v945_v43 = vld [vmem:[#allocation9 + $0x140] sm:$0xff] }
  0x72   :  { %v926_v25 = vld [vmem:[#allocation9 + $0xa8] sm:$0xff]  ;;  %v949_v45 = vld [vmem:[#allocation9 + $0x160] sm:$0xff] }
  0x73   :  { %560 = vmatpush1.bf16.msra.mxu0 %v3795_v51  ;;  %633 = vmatpush1.bf16.msra.mxu1 %v3797_v52  ;;  %v149_v51 = vld [vmem:[#allocation6 + $0x190] sm:$0xff]  ;;  %6665 = vst [vmem:[#allocation31_spill] sm:$0xff] %v4643_v42 }
  0x74   :  { %561 = vmatprep.subr.bf16.mxu0 %v3804_v53  ;;  %634 = vmatprep.subr.bf16.mxu1 %v3806_v54  ;;  %v153_v52 = vld [vmem:[#allocation6 + $0x1b0] sm:$0xff]  ;;  %v150_v53 = vld [vmem:[#allocation6 + $0x198] sm:$0xff] }
  0x75   :  { %v154_v54 = vld [vmem:[#allocation6 + $0x1b8] sm:$0xff]  ;;  %v3808_v57 = vcombine.high %v149_v51, %v153_v52  ;;  %v3807_v1 = vcombine.low %v149_v51, %v153_v52  ;;  %v4664_v52 = vcombine.high %v945_v43, %v949_v45 }
  0x76   :  { %v3810_v58 = vcombine.high %v150_v53, %v154_v54  ;;  %v3809_v2 = vcombine.low %v150_v53, %v154_v54  ;;  %v953_v54 = vld [vmem:[#allocation9 + $0x180] sm:$0xff] }
  0x77   :  { %562 = vmatpush1.bf16.msra.mxu0 %v3803_v59  ;;  %635 = vmatpush1.bf16.msra.mxu1 %v3805_v60  ;;  %v157_v59 = vld [vmem:[#allocation6 + $0x1d0] sm:$0xff]  ;;  %6671 = vst [vmem:[#allocation37_spill] sm:$0xff] %v4664_v52 }
  0x78   :  { %563 = vmatprep.subr.bf16.mxu0 %v3812_v61  ;;  %636 = vmatprep.subr.bf16.mxu1 %v3814_v62  ;;  %v161_v60 = vld [vmem:[#allocation6 + $0x1f0] sm:$0xff]  ;;  %v4593_v61 = vld [vmem:[#allocation3 + $0x18] sm:$0xff]  }
  0x79   :  { %v158_v62 = vld [vmem:[#allocation6 + $0x1d8] sm:$0xff]  ;;  %v3816_v3 = vcombine.high %v157_v59, %v161_v60  ;;  %v3815_v9 = vcombine.low %v157_v59, %v161_v60 }
  0x7a   :  { %v3817_v11 = vcombine.low %v158_v62, %v162_v63 }
  0x7b   :  { %564 = vmatpush1.bf16.msra.mxu0 %v3811_v4  ;;  %637 = vmatpush1.bf16.msra.mxu1 %v3813_v5  ;;  %v3818_v4 = vcombine.high %v158_v62, %v162_v63  ;;  %v905_v5 = vld [vmem:[#allocation9] sm:$0xff] }
  0x7c   :  { %695 = vmatprep.subr.bf16.mxu0 %v3760_v6  ;;  %768 = vmatprep.subr.bf16.mxu1 %v3762_v7  ;;  %v909_v6 = vld [vmem:[#allocation9 + $0x20] sm:$0xff]  ;;  %v906_v7 = vld [vmem:[#allocation9 + $0x8] sm:$0xff] }
  0x7d   :  { %v4597_v12 = vcombine.high %v905_v5, %v909_v6  ;;  %v4603_v18 = vcombine.low %v905_v5, %v909_v6  ;;  %v4606_v19 = vcombine.low %v906_v7, %v910_v8  ;;  %v961_v63 = vld [vmem:[#allocation9 + $0x1c0] sm:$0xff] }
  0x7e   :  { %582 = vmatmul.mubr.bf16.vlgmr.msra.gmra.mrb[0].mxu0 %v4575_v10  ;;  %655 = vmatmul.mubr.bf16.vlgmr.msra.gmra.mrb[0].mxu1 %v4575_v10 }
  0x7f   :  { %696 = vmatpush1.bf16.msra.mxu0 %v3759_v13  ;;  %769 = vmatpush1.bf16.msra.mxu1 %v3761_v14  ;;  %6651 = vst [vmem:[#allocation17_spill] sm:$0xff] %v4597_v12  ;;  %v4600_v13 = vcombine.high %v906_v7, %v910_v8  ;;  %v913_v14 = vld [vmem:[#allocation9 + $0x40] sm:$0xff]  ;;  %6653 = vst [vmem:[#allocation19_spill] sm:$0xff] %v4603_v18 }
  0x80   :  { %697 = vmatprep.subr.bf16.mxu0 %v3768_v15  ;;  %770 = vmatprep.subr.bf16.mxu1 %v3770_v16  ;;  %v917_v15 = vld [vmem:[#allocation9 + $0x60] sm:$0xff]  ;;  %v914_v16 = vld [vmem:[#allocation9 + $0x48] sm:$0xff]  ;;  %6654 = vst [vmem:[#allocation20_spill] sm:$0xff] %v4606_v19 }
  0x81   :  { %591 = vmatprep.mubr.bf16.mxu0 %v6377_v0  ;;  %664 = vmatprep.mubr.bf16.mxu1 %v6377_v0  ;;  %6652 = vst [vmem:[#allocation18_spill] sm:$0xff] %v4600_v13  ;;  %v4608_v20 = vcombine.high %v913_v14, %v917_v15  ;;  %v4616_v26 = vcombine.low %v913_v14, %v917_v15  ;;  %v969_v7 = vld [vmem:[#allocation9 + $0x200] sm:$0xff] }
  0x82   :  { %v973_v8 = vld [vmem:[#allocation9 + $0x220] sm:$0xff] }
  0x83   :  { %698 = vmatpush1.bf16.msra.mxu0 %v3767_v21  ;;  %771 = vmatpush1.bf16.msra.mxu1 %v3769_v22  ;;  %6655 = vst [vmem:[#allocation21_spill] sm:$0xff] %v4608_v20  ;;  %v4611_v21 = vcombine.high %v914_v16, %v918_v17  ;;  %v921_v22 = vld [vmem:[#allocation9 + $0x80] sm:$0xff]  ;;  %6657 = vst [vmem:[#allocation23_spill] sm:$0xff] %v4616_v26 }
  0x84   :  { %699 = vmatprep.subr.bf16.mxu0 %v3776_v23  ;;  %772 = vmatprep.subr.bf16.mxu1 %v3778_v24  ;;  %v925_v23 = vld [vmem:[#allocation9 + $0xa0] sm:$0xff]  ;;  %v922_v24 = vld [vmem:[#allocation9 + $0x88] sm:$0xff] }
  0x85   :  { %6656 = vst [vmem:[#allocation22_spill] sm:$0xff] %v4611_v21  ;;  %v4630_v34 = vcombine.low %v921_v22, %v925_v23  ;;  %v4634_v37 = vcombine.low %v922_v24, %v926_v25 }
  0x86   :  { %592 = vmatmul.mubr.bf16.gmra.mrb[4].mxu0 %v4581_v27  ;;  %665 = vmatmul.mubr.bf16.gmra.mrb[4].mxu1 %v4581_v27 }
  0x87   :  { %700 = vmatpush1.bf16.msra.mxu0 %v3775_v30  ;;  %773 = vmatpush1.bf16.msra.mxu1 %v3777_v31  ;;  %v4620_v30 = vcombine.low %v914_v16, %v918_v17  ;;  %v4622_v31 = vcombine.high %v921_v22, %v925_v23  ;;  %6661 = vst [vmem:[#allocation27_spill] sm:$0xff] %v4630_v34  ;;  %6662 = vst [vmem:[#allocation28_spill] sm:$0xff] %v4634_v37  ;;  %v977_v22 = vld [vmem:[#allocation9 + $0x240] sm:$0xff] }
  0x88   :  { %701 = vmatprep.subr.bf16.mxu0 %v3784_v32  ;;  %774 = vmatprep.subr.bf16.mxu1 %v3786_v33  ;;  %v930_v32 = vld [vmem:[#allocation9 + $0xc8] sm:$0xff]  ;;  %v4625_v33 = vcombine.high %v922_v24, %v926_v25  ;;  %v4706_v16 = vcombine.high %v969_v7, %v973_v8  ;;  %v981_v23 = vld [vmem:[#allocation9 + $0x260] sm:$0xff] }
  0x89   :  { %601 = vmatprep.mubr.bf16.mxu0 %v6377_v0  ;;  %674 = vmatprep.mubr.bf16.mxu1 %v6377_v0  ;;  %6658 = vst [vmem:[#allocation24_spill] sm:$0xff] %v4620_v30  ;;  %6659 = vst [vmem:[#allocation25_spill] sm:$0xff] %v4622_v31  ;;  %v978_v24 = vld [vmem:[#allocation9 + $0x248] sm:$0xff] }
  0x8a   :  { %6660 = vst [vmem:[#allocation26_spill] sm:$0xff] %v4625_v33  ;;  %6683 = vst [vmem:[#allocation49_spill] sm:$0xff] %v4706_v16  ;;  %v982_v25 = vld [vmem:[#allocation9 + $0x268] sm:$0xff] }
  0x8b   :  { %702 = vmatpush1.bf16.msra.mxu0 %v3783_v38  ;;  %775 = vmatpush1.bf16.msra.mxu1 %v3785_v39  ;;  %v4636_v38 = vcombine.high %v929_v28, %v933_v29  ;;  %v938_v39 = vld [vmem:[#allocation9 + $0x108] sm:$0xff]  ;;  %v4720_v29 = vcombine.high %v977_v22, %v981_v23 }
  0x8c   :  { %703 = vmatprep.subr.bf16.mxu0 %v3792_v40  ;;  %776 = vmatprep.subr.bf16.mxu1 %v3794_v41  ;;  %v942_v40 = vld [vmem:[#allocation9 + $0x128] sm:$0xff] }
  0x8d   :  { %6663 = vst [vmem:[#allocation29_spill] sm:$0xff] %v4636_v38  ;;  %v4662_v51 = vcombine.low %v938_v39, %v942_v40  ;;  %6687 = vst [vmem:[#allocation53_spill] sm:$0xff] %v4720_v29 }
  0x8e   :  { %602 = vmatmul.mubr.bf16.gmra.mrb[8].mxu0 %v4587_v44  ;;  %675 = vmatmul.mubr.bf16.gmra.mrb[8].mxu1 %v4587_v44 }
  0x8f   :  { %704 = vmatpush1.bf16.msra.mxu0 %v3791_v47  ;;  %777 = vmatpush1.bf16.msra.mxu1 %v3793_v48  ;;  %v4650_v47 = vcombine.high %v937_v35, %v941_v36  ;;  %v946_v48 = vld [vmem:[#allocation9 + $0x148] sm:$0xff]  ;;  %6670 = vst [vmem:[#allocation36_spill] sm:$0xff] %v4662_v51 }
  0x90   :  { %705 = vmatprep.subr.bf16.mxu0 %v3800_v49  ;;  %778 = vmatprep.subr.bf16.mxu1 %v3802_v50  ;;  %v4653_v49 = vcombine.high %v938_v39, %v942_v40  ;;  %v950_v50 = vld [vmem:[#allocation9 + $0x168] sm:$0xff]  ;;  %v4726_v40 = vcombine.low %v977_v22, %v981_v23 }
  0x91   :  { %611 = vmatprep.mubr.bf16.mxu0 %v6377_v0  ;;  %684 = vmatprep.mubr.bf16.mxu1 %v6377_v0  ;;  %6667 = vst [vmem:[#allocation33_spill] sm:$0xff] %v4650_v47  ;;  %v4667_v53 = vcombine.high %v946_v48, %v950_v50  ;;  %v4676_v59 = vcombine.low %v946_v48, %v950_v50  ;;  %v990_v39 = vld [vmem:[#allocation9 + $0x2a8] sm:$0xff]  ;;  %v993_v50 = vld [vmem:[#allocation9 + $0x2c0] sm:$0xff] }
  0x92   :  { %6668 = vst [vmem:[#allocation34_spill] sm:$0xff] %v4653_v49  ;;  %6689 = vst [vmem:[#allocation55_spill] sm:$0xff] %v4726_v40 }
  0x93   :  { %706 = vmatpush1.bf16.msra.mxu0 %v3799_v55  ;;  %779 = vmatpush1.bf16.msra.mxu1 %v3801_v56  ;;  %6672 = vst [vmem:[#allocation38_spill] sm:$0xff] %v4667_v53  ;;  %v957_v55 = vld [vmem:[#allocation9 + $0x1a0] sm:$0xff]  ;;  %v954_v56 = vld [vmem:[#allocation9 + $0x188] sm:$0xff]  ;;  %6674 = vst [vmem:[#allocation40_spill] sm:$0xff] %v4676_v59 }
  0x94   :  { %707 = vmatprep.subr.bf16.mxu0 %v3808_v57  ;;  %780 = vmatprep.subr.bf16.mxu1 %v3810_v58  ;;  %v958_v57 = vld [vmem:[#allocation9 + $0x1a8] sm:$0xff]  ;;  %v4671_v58 = vcombine.low %v945_v43, %v949_v45  ;;  %v4678_v60 = vcombine.high %v953_v54, %v957_v55  ;;  %v4730_v43 = vcombine.low %v978_v24, %v982_v25 }
  0x95   :  { %v4681_v62 = vcombine.high %v954_v56, %v958_v57 }
  0x96   :  { %612 = vmatmul.mubr.bf16.gmra.mrb[12].mxu0 %v4593_v61  ;;  %685 = vmatmul.mubr.bf16.gmra.mrb[12].mxu1 %v4593_v61  ;;  %6673 = vst [vmem:[#allocation39_spill] sm:$0xff] %v4671_v58  ;;  %6675 = vst [vmem:[#allocation41_spill] sm:$0xff] %v4678_v60 }
  0x97   :  { %708 = vmatpush1.bf16.msra.mxu0 %v3807_v1  ;;  %781 = vmatpush1.bf16.msra.mxu1 %v3809_v2  ;;  %6676 = vst [vmem:[#allocation42_spill] sm:$0xff] %v4681_v62  ;;  %v965_v1 = vld [vmem:[#allocation9 + $0x1e0] sm:$0xff]  ;;  %v962_v2 = vld [vmem:[#allocation9 + $0x1c8] sm:$0xff]  ;;  %6690 = vst [vmem:[#allocation56_spill] sm:$0xff] %v4730_v43 }
  0x98   :  { %709 = vmatprep.subr.bf16.mxu0 %v3816_v3  ;;  %782 = vmatprep.subr.bf16.mxu1 %v3818_v4  ;;  %v966_v3 = vld [vmem:[#allocation9 + $0x1e8] sm:$0xff]  ;;  %v4690_v4 = vcombine.low %v954_v56, %v958_v57  ;;  %v4692_v5 = vcombine.high %v961_v63, %v965_v1  ;;  %v4699_v14 = vcombine.low %v961_v63, %v965_v1 }
  0x99   :  { %727 = vmatprep.mubr.bf16.mxu0 %v6377_v0  ;;  %800 = vmatprep.mubr.bf16.mxu1 %v6377_v0  ;;  %v4695_v6 = vcombine.high %v962_v2, %v966_v3  ;;  %v4704_v15 = vcombine.low %v962_v2, %v966_v3  ;;  %v998_v56 = vld [vmem:[#allocation9 + $0x2e8] sm:$0xff]  ;;  %v1001_v3 = vld [vmem:[#allocation9 + $0x300] sm:$0xff] }
  0x9a   :  { %6678 = vst [vmem:[#allocation44_spill] sm:$0xff] %v4690_v4  ;;  %6679 = vst [vmem:[#allocation45_spill] sm:$0xff] %v4692_v5 }
  0x9b   :  { %710 = vmatpush1.bf16.msra.mxu0 %v3815_v9  ;;  %783 = vmatpush1.bf16.msra.mxu1 %v3817_v11  ;;  %6680 = vst [vmem:[#allocation46_spill] sm:$0xff] %v4695_v6  ;;  %v970_v9 = vld [vmem:[#allocation9 + $0x208] sm:$0xff]  ;;  %6681 = vst [vmem:[#allocation47_spill] sm:$0xff] %v4699_v14 }
  0x9c   :  { %1687 = vmatprep.subr.bf16.mxu0 %v4597_v12  ;;  %1728 = vmatprep.subr.bf16.mxu1 %v4600_v13  ;;  %v974_v11 = vld [vmem:[#allocation9 + $0x228] sm:$0xff]  ;;  %6682 = vst [vmem:[#allocation48_spill] sm:$0xff] %v4704_v15 }
  0x9d   :  { %v4709_v17 = vcombine.high %v970_v9, %v974_v11  ;;  %v4718_v28 = vcombine.low %v970_v9, %v974_v11  ;;  %v1006_v9 = vld [vmem:[#allocation9 + $0x328] sm:$0xff] }
  0x9e   :  { %728 = vmatmul.mubr.bf16.vlgmr.msra.gmra.mrb[16].mxu0 %v4575_v10  ;;  %801 = vmatmul.mubr.bf16.vlgmr.msra.gmra.mrb[16].mxu1 %v4575_v10  ;;  %v934_v10 = vld [vmem:[#allocation9 + $0xe8] sm:$0xff] }
  0x9f   :  { %1688 = vmatpush1.bf16.msra.mxu0 %v4603_v18  ;;  %1729 = vmatpush1.bf16.msra.mxu1 %v4606_v19  ;;  %v4639_v41 = vcombine.high %v930_v32, %v934_v10  ;;  %v4648_v46 = vcombine.low %v930_v32, %v934_v10  ;;  %6684 = vst [vmem:[#allocation50_spill] sm:$0xff] %v4709_v17  ;;  %6686 = vst [vmem:[#allocation52_spill] sm:$0xff] %v4718_v28  ;;  %v985_v10 = vld [vmem:[#allocation9 + $0x280] sm:$0xff] }
  0xa0   :  { %1689 = vmatprep.subr.bf16.mxu0 %v4608_v20  ;;  %1730 = vmatprep.subr.bf16.mxu1 %v4611_v21  ;;  %v4723_v32 = vcombine.high %v978_v24, %v982_v25  ;;  %v1009_v25 = vld [vmem:[#allocation9 + $0x340] sm:$0xff] }
  0xa1   :  { %737 = vmatprep.mubr.bf16.mxu0 %v6377_v0  ;;  %810 = vmatprep.mubr.bf16.mxu1 %v6377_v0  ;;  %6664 = vst [vmem:[#allocation30_spill] sm:$0xff] %v4639_v41  ;;  %6666 = vst [vmem:[#allocation32_spill] sm:$0xff] %v4648_v46 }
  0xa2   :  { %6688 = vst [vmem:[#allocation54_spill] sm:$0xff] %v4723_v32 }
  0xa3   :  { %1690 = vmatpush1.bf16.msra.mxu0 %v4616_v26  ;;  %1731 = vmatpush1.bf16.msra.mxu1 %v4620_v30 }
  0xa4   :  { %1691 = vmatprep.subr.bf16.mxu0 %v4622_v31  ;;  %1732 = vmatprep.subr.bf16.mxu1 %v4625_v33 }
  0xa6   :  { %738 = vmatmul.mubr.bf16.gmra.mrb[20].mxu0 %v4581_v27  ;;  %811 = vmatmul.mubr.bf16.gmra.mrb[20].mxu1 %v4581_v27  ;;  %v4658_v27 = vcombine.low %v937_v35, %v941_v36  ;;  %v989_v35 = vld [vmem:[#allocation9 + $0x2a0] sm:$0xff]  ;;  %v986_v36 = vld [vmem:[#allocation9 + $0x288] sm:$0xff] }
  0xa7   :  { %1692 = vmatpush1.bf16.msra.mxu0 %v4630_v34  ;;  %1733 = vmatpush1.bf16.msra.mxu1 %v4634_v37  ;;  %v4732_v45 = vcombine.high %v985_v10, %v989_v35  ;;  %v4735_v48 = vcombine.high %v986_v36, %v990_v39  ;;  %v4738_v57 = vcombine.low %v985_v10, %v989_v35  ;;  %v1013_v10 = vld [vmem:[#allocation9 + $0x360] sm:$0xff]  ;;  %v1010_v35 = vld [vmem:[#allocation9 + $0x348] sm:$0xff] }
  0xa8   :  { %1693 = vmatprep.subr.bf16.mxu0 %v4636_v38  ;;  %1734 = vmatprep.subr.bf16.mxu1 %v4639_v41  ;;  %6669 = vst [vmem:[#allocation35_spill] sm:$0xff] %v4658_v27  ;;  %v4742_v63 = vcombine.low %v986_v36, %v990_v39  ;;  %v1014_v36 = vld [vmem:[#allocation9 + $0x368] sm:$0xff] }
  0xa9   :  { %747 = vmatprep.mubr.bf16.mxu0 %v6377_v0  ;;  %820 = vmatprep.mubr.bf16.mxu1 %v6377_v0  ;;  %6691 = vst [vmem:[#allocation57_spill] sm:$0xff] %v4732_v45  ;;  %6692 = vst [vmem:[#allocation58_spill] sm:$0xff] %v4735_v48 }
  0xaa   :  { %6693 = vst [vmem:[#allocation59_spill] sm:$0xff] %v4738_v57  ;;  %6694 = vst [vmem:[#allocation60_spill] sm:$0xff] %v4742_v63 }
  0xab   :  { %1694 = vmatpush1.bf16.msra.mxu0 %v4643_v42  ;;  %1735 = vmatpush1.bf16.msra.mxu1 %v4648_v46 }
  0xac   :  { %1695 = vmatprep.subr.bf16.mxu0 %v4650_v47  ;;  %1736 = vmatprep.subr.bf16.mxu1 %v4653_v49 }
  0xae   :  { %748 = vmatmul.mubr.bf16.gmra.mrb[24].mxu0 %v4587_v44  ;;  %821 = vmatmul.mubr.bf16.gmra.mrb[24].mxu1 %v4587_v44  ;;  %v4686_v44 = vcombine.low %v953_v54, %v957_v55  ;;  %v997_v54 = vld [vmem:[#allocation9 + $0x2e0] sm:$0xff]  ;;  %v994_v55 = vld [vmem:[#allocation9 + $0x2c8] sm:$0xff] }
  0xaf   :  { %1696 = vmatpush1.bf16.msra.mxu0 %v4658_v27  ;;  %1737 = vmatpush1.bf16.msra.mxu1 %v4662_v51  ;;  %v4744_v1 = vcombine.high %v993_v50, %v997_v54  ;;  %v4747_v2 = vcombine.high %v994_v55, %v998_v56  ;;  %v4750_v11 = vcombine.low %v993_v50, %v997_v54 }
  0xb0   :  { %1697 = vmatprep.subr.bf16.mxu0 %v4664_v52  ;;  %1738 = vmatprep.subr.bf16.mxu1 %v4667_v53  ;;  %6677 = vst [vmem:[#allocation43_spill] sm:$0xff] %v4686_v44  ;;  %v4754_v22 = vcombine.low %v994_v55, %v998_v56  ;;  %v4768_v54 = vcombine.high %v1009_v25, %v1013_v10  ;;  %v1017_v56 = vld [vmem:[#allocation9 + $0x380] sm:$0xff] }
  0xb1   :  { %757 = vmatprep.mubr.bf16.mxu0 %v6377_v0  ;;  %830 = vmatprep.mubr.bf16.mxu1 %v6377_v0  ;;  %6695 = vst [vmem:[#allocation61_spill] sm:$0xff] %v4744_v1  ;;  %6696 = vst [vmem:[#allocation62_spill] sm:$0xff] %v4747_v2  ;;  %v4771_v55 = vcombine.high %v1010_v35, %v1014_v36 }
  0xb2   :  { %6697 = vst [vmem:[#allocation63_spill] sm:$0xff] %v4750_v11  ;;  %6698 = vst [vmem:[#allocation64_spill] sm:$0xff] %v4754_v22 }
  0xb3   :  { %1698 = vmatpush1.bf16.msra.mxu0 %v4671_v58  ;;  %1739 = vmatpush1.bf16.msra.mxu1 %v4676_v59  ;;  %6703 = vst [vmem:[#allocation69_spill] sm:$0xff] %v4768_v54  ;;  %6704 = vst [vmem:[#allocation70_spill] sm:$0xff] %v4771_v55 }
  0xb4   :  { %1699 = vmatprep.subr.bf16.mxu0 %v4678_v60  ;;  %1740 = vmatprep.subr.bf16.mxu1 %v4681_v62 }
  0xb6   :  { %758 = vmatmul.mubr.bf16.gmra.mrb[28].mxu0 %v4593_v61  ;;  %831 = vmatmul.mubr.bf16.gmra.mrb[28].mxu1 %v4593_v61  ;;  %v4714_v61 = vcombine.low %v969_v7, %v973_v8  ;;  %v1005_v7 = vld [vmem:[#allocation9 + $0x320] sm:$0xff]  ;;  %v1002_v8 = vld [vmem:[#allocation9 + $0x308] sm:$0xff] }
  0xb7   :  { %1700 = vmatpush1.bf16.msra.mxu0 %v4686_v44  ;;  %1741 = vmatpush1.bf16.msra.mxu1 %v4690_v4  ;;  %v4756_v23 = vcombine.high %v1001_v3, %v1005_v7  ;;  %v4759_v24 = vcombine.high %v1002_v8, %v1006_v9  ;;  %v4762_v39 = vcombine.low %v1001_v3, %v1005_v7 }
  0xb8   :  { %1701 = vmatprep.subr.bf16.mxu0 %v4692_v5  ;;  %1742 = vmatprep.subr.bf16.mxu1 %v4695_v6  ;;  %6685 = vst [vmem:[#allocation51_spill] sm:$0xff] %v4714_v61  ;;  %v4766_v50 = vcombine.low %v1002_v8, %v1006_v9  ;;  %v4774_v3 = vcombine.low %v1009_v25, %v1013_v10 }
  0xb9   :  { %1719 = vmatprep.mubr.bf16.mxu0 %v6377_v0  ;;  %1760 = vmatprep.mubr.bf16.mxu1 %v6377_v0  ;;  %6699 = vst [vmem:[#allocation65_spill] sm:$0xff] %v4756_v23  ;;  %6700 = vst [vmem:[#allocation66_spill] sm:$0xff] %v4759_v24  ;;  %v1021_v0 = vld [vmem:[#allocation9 + $0x3a0] sm:$0xff]  ;;  %v4778_v7 = vcombine.low %v1010_v35, %v1014_v36 }
  0xba   :  { %6701 = vst [vmem:[#allocation67_spill] sm:$0xff] %v4762_v39  ;;  %6702 = vst [vmem:[#allocation68_spill] sm:$0xff] %v4766_v50  ;;  %v4780_v8 = vcombine.high %v1017_v56, %v1021_v0  ;;  %v4786_v25 = vcombine.low %v1017_v56, %v1021_v0 }
  0xbb   :  { %1702 = vmatpush1.bf16.msra.mxu0 %v4699_v14  ;;  %1743 = vmatpush1.bf16.msra.mxu1 %v4704_v15  ;;  %6705 = vst [vmem:[#allocation71_spill] sm:$0xff] %v4774_v3  ;;  %6706 = vst [vmem:[#allocation72_spill] sm:$0xff] %v4778_v7 }
  0xbc   :  { %1703 = vmatprep.subr.bf16.mxu0 %v4706_v16  ;;  %1744 = vmatprep.subr.bf16.mxu1 %v4709_v17  ;;  %6707 = vst [vmem:[#allocation73_spill] sm:$0xff] %v4780_v8  ;;  %6709 = vst [vmem:[#allocation75_spill] sm:$0xff] %v4786_v25 }
  0xbf   :  { %1704 = vmatpush1.bf16.msra.mxu0 %v4714_v61  ;;  %1745 = vmatpush1.bf16.msra.mxu1 %v4718_v28 }
  0xc0   :  { %1705 = vmatprep.subr.bf16.mxu0 %v4720_v29  ;;  %1746 = vmatprep.subr.bf16.mxu1 %v4723_v32 }
  0xc3   :  { %1706 = vmatpush1.bf16.msra.mxu0 %v4726_v40  ;;  %1747 = vmatpush1.bf16.msra.mxu1 %v4730_v43 }
  0xc4   :  { %1707 = vmatprep.subr.bf16.mxu0 %v4732_v45  ;;  %1748 = vmatprep.subr.bf16.mxu1 %v4735_v48 }
  0xc7   :  { %1708 = vmatpush1.bf16.msra.mxu0 %v4738_v57  ;;  %1749 = vmatpush1.bf16.msra.mxu1 %v4742_v63  ;;  %v944_v63 = vld [vmem:[#allocation9 + $0x138] sm:$0xff] }
  0xc8   :  { %1709 = vmatprep.subr.bf16.mxu0 %v4744_v1  ;;  %1750 = vmatprep.subr.bf16.mxu1 %v4747_v2  ;;  %v1018_v2 = vld [vmem:[#allocation9 + $0x388] sm:$0xff] }
  0xc9   :  { %v1022_v1 = vld [vmem:[#allocation9 + $0x3a8] sm:$0xff] }
  0xca   :  { %v4783_v9 = vcombine.high %v1018_v2, %v1022_v1  ;;  %v4790_v10 = vcombine.low %v1018_v2, %v1022_v1 }
  0xcb   :  { %1710 = vmatpush1.bf16.msra.mxu0 %v4750_v11  ;;  %1751 = vmatpush1.bf16.msra.mxu1 %v4754_v22  ;;  %v1026_v22 = vld [vmem:[#allocation9 + $0x3c8] sm:$0xff] }
  0xcc   :  { %1711 = vmatprep.subr.bf16.mxu0 %v4756_v23  ;;  %1752 = vmatprep.subr.bf16.mxu1 %v4759_v24  ;;  %6708 = vst [vmem:[#allocation74_spill] sm:$0xff] %v4783_v9  ;;  %v1025_v24 = vld [vmem:[#allocation9 + $0x3c0] sm:$0xff]  ;;  %v1030_v11 = vld [vmem:[#allocation9 + $0x3e8] sm:$0xff]  ;;  %6710 = vst [vmem:[#allocation76_spill] sm:$0xff] %v4790_v10 }
  0xcd   :  { %v1029_v23 = vld [vmem:[#allocation9 + $0x3e0] sm:$0xff]  ;;  %v4795_v36 = vcombine.high %v1026_v22, %v1030_v11  ;;  %v4802_v1 = vcombine.low %v1026_v22, %v1030_v11 }
  0xce   :  { %v4792_v35 = vcombine.high %v1025_v24, %v1029_v23  ;;  %v4798_v0 = vcombine.low %v1025_v24, %v1029_v23 }
  0xcf   :  { %1712 = vmatpush1.bf16.msra.mxu0 %v4762_v39  ;;  %1753 = vmatpush1.bf16.msra.mxu1 %v4766_v50  ;;  %6712 = vst [vmem:[#allocation78_spill] sm:$0xff] %v4795_v36  ;;  %v908_v50 = vld [vmem:[#allocation9 + $0x18] sm:$0xff]  ;;  %6714 = vst [vmem:[#allocation80_spill] sm:$0xff] %v4802_v1 }
  0xd0   :  { %1713 = vmatprep.subr.bf16.mxu0 %v4768_v54  ;;  %1754 = vmatprep.subr.bf16.mxu1 %v4771_v55  ;;  %6711 = vst [vmem:[#allocation77_spill] sm:$0xff] %v4792_v35  ;;  %v907_v55 = vld [vmem:[#allocation9 + $0x10] sm:$0xff]  ;;  %v912_v39 = vld [vmem:[#allocation9 + $0x38] sm:$0xff]  ;;  %6713 = vst [vmem:[#allocation79_spill] sm:$0xff] %v4798_v0 }
  0xd1   :  { %v911_v54 = vld [vmem:[#allocation9 + $0x30] sm:$0xff]  ;;  %v4807_v56 = vcombine.high %v908_v50, %v912_v39  ;;  %v4814_v11 = vcombine.low %v908_v50, %v912_v39 }
  0xd2   :  { %v4804_v2 = vcombine.high %v907_v55, %v911_v54  ;;  %v4810_v23 = vcombine.low %v907_v55, %v911_v54 }
  0xd3   :  { %1714 = vmatpush1.bf16.msra.mxu0 %v4774_v3  ;;  %1755 = vmatpush1.bf16.msra.mxu1 %v4778_v7  ;;  %6716 = vst [vmem:[#allocation82_spill] sm:$0xff] %v4807_v56  ;;  %v916_v7 = vld [vmem:[#allocation9 + $0x58] sm:$0xff]  ;;  %6718 = vst [vmem:[#allocation84_spill] sm:$0xff] %v4814_v11 }
  0xd4   :  { %1715 = vmatprep.subr.bf16.mxu0 %v4780_v8  ;;  %1756 = vmatprep.subr.bf16.mxu1 %v4783_v9  ;;  %6715 = vst [vmem:[#allocation81_spill] sm:$0xff] %v4804_v2  ;;  %v915_v9 = vld [vmem:[#allocation9 + $0x50] sm:$0xff]  ;;  %v920_v3 = vld [vmem:[#allocation9 + $0x78] sm:$0xff]  ;;  %6717 = vst [vmem:[#allocation83_spill] sm:$0xff] %v4810_v23 }
  0xd5   :  { %v919_v8 = vld [vmem:[#allocation9 + $0x70] sm:$0xff]  ;;  %v4819_v24 = vcombine.high %v916_v7, %v920_v3  ;;  %v4828_v39 = vcombine.low %v916_v7, %v920_v3 }
  0xd6   :  { %v4816_v22 = vcombine.high %v915_v9, %v919_v8  ;;  %v4824_v54 = vcombine.low %v915_v9, %v919_v8 }
  0xd7   :  { %1716 = vmatpush1.bf16.msra.mxu0 %v4786_v25  ;;  %1757 = vmatpush1.bf16.msra.mxu1 %v4790_v10  ;;  %6720 = vst [vmem:[#allocation86_spill] sm:$0xff] %v4819_v24  ;;  %v6721_v10 = vmov 0   ;;  %v924_v25 = vld [vmem:[#allocation9 + $0x98] sm:$0xff]  ;;  %6723 = vst [vmem:[#allocation88_spill] sm:$0xff] %v4828_v39 }
  0xd8   :  { %1717 = vmatprep.subr.bf16.mxu0 %v4792_v35  ;;  %1758 = vmatprep.subr.bf16.mxu1 %v4795_v36  ;;  %6719 = vst [vmem:[#allocation85_spill] sm:$0xff] %v4816_v22  ;;  %v923_v36 = vld [vmem:[#allocation9 + $0x90] sm:$0xff]  ;;  %6722 = vst [vmem:[#allocation87_spill] sm:$0xff] %v4824_v54 }
  0xd9   :  { %v927_v35 = vld [vmem:[#allocation9 + $0xb0] sm:$0xff] }
  0xda   :  { %v4830_v50 = vcombine.high %v923_v36, %v927_v35  ;;  %v4838_v8 = vcombine.low %v923_v36, %v927_v35 }
  0xdb   :  { %1718 = vmatpush1.bf16.msra.mxu0 %v4798_v0  ;;  %1759 = vmatpush1.bf16.msra.mxu1 %v4802_v1  ;;  %v928_v0 = vld [vmem:[#allocation9 + $0xb8] sm:$0xff] }
  0xdc   :  { %1769 = vmatprep.subr.bf16.mxu0 %v4804_v2  ;;  %1810 = vmatprep.subr.bf16.mxu1 %v4807_v56  ;;  %6724 = vst [vmem:[#allocation89_spill] sm:$0xff] %v4830_v50  ;;  %v4833_v55 = vcombine.high %v924_v25, %v928_v0  ;;  %v931_v56 = vld [vmem:[#allocation9 + $0xd0] sm:$0xff]  ;;  %v932_v1 = vld [vmem:[#allocation9 + $0xd8] sm:$0xff]  ;;  %6726 = vst [vmem:[#allocation91_spill] sm:$0xff] %v4838_v8  ;;  %v4842_v3 = vcombine.low %v924_v25, %v928_v0 }
  0xdd   :  { %v935_v2 = vld [vmem:[#allocation9 + $0xf0] sm:$0xff] }
  0xde   :  { %1720 = vmatmul.mubr.bf16.vlgmr.msra.gmra.mrb[32].mxu0 %v6721_v10  ;;  %1761 = vmatmul.mubr.bf16.vlgmr.msra.gmra.mrb[32].mxu1 %v6721_v10  ;;  %6725 = vst [vmem:[#allocation90_spill] sm:$0xff] %v4833_v55  ;;  %6727 = vst [vmem:[#allocation92_spill] sm:$0xff] %v4842_v3  ;;  %v4844_v7 = vcombine.high %v931_v56, %v935_v2  ;;  %v4850_v35 = vcombine.low %v931_v56, %v935_v2 }
  0xdf   :  { %1770 = vmatpush1.bf16.msra.mxu0 %v4810_v23  ;;  %1811 = vmatpush1.bf16.msra.mxu1 %v4814_v11  ;;  %v936_v23 = vld [vmem:[#allocation9 + $0xf8] sm:$0xff] }
  0xe0   :  { %1771 = vmatprep.subr.bf16.mxu0 %v4816_v22  ;;  %1812 = vmatprep.subr.bf16.mxu1 %v4819_v24  ;;  %6728 = vst [vmem:[#allocation93_spill] sm:$0xff] %v4844_v7  ;;  %v4847_v9 = vcombine.high %v932_v1, %v936_v23  ;;  %v939_v24 = vld [vmem:[#allocation9 + $0x110] sm:$0xff]  ;;  %v940_v11 = vld [vmem:[#allocation9 + $0x118] sm:$0xff]  ;;  %6730 = vst [vmem:[#allocation95_spill] sm:$0xff] %v4850_v35  ;;  %v4854_v25 = vcombine.low %v932_v1, %v936_v23 }
  0xe1   :  { %1801 = vmatprep.mubr.bf16.mxu0 %v6721_v10  ;;  %1842 = vmatprep.mubr.bf16.mxu1 %v6721_v10  ;;  %v943_v22 = vld [vmem:[#allocation9 + $0x130] sm:$0xff]  ;;  %v4859_v0 = vcombine.high %v940_v11, %v944_v63  ;;  %v4866_v1 = vcombine.low %v940_v11, %v944_v63 }
  0xe2   :  { %6729 = vst [vmem:[#allocation94_spill] sm:$0xff] %v4847_v9  ;;  %6731 = vst [vmem:[#allocation96_spill] sm:$0xff] %v4854_v25  ;;  %v4856_v36 = vcombine.high %v939_v24, %v943_v22  ;;  %v4862_v2 = vcombine.low %v939_v24, %v943_v22 }
  0xe3   :  { %1772 = vmatpush1.bf16.msra.mxu0 %v4824_v54  ;;  %1813 = vmatpush1.bf16.msra.mxu1 %v4828_v39  ;;  %6733 = vst [vmem:[#allocation98_spill] sm:$0xff] %v4859_v0  ;;  %v948_v39 = vld [vmem:[#allocation9 + $0x158] sm:$0xff]  ;;  %6735 = vst [vmem:[#allocation100_spill] sm:$0xff] %v4866_v1 }
  0xe4   :  { %1773 = vmatprep.subr.bf16.mxu0 %v4830_v50  ;;  %1814 = vmatprep.subr.bf16.mxu1 %v4833_v55  ;;  %6732 = vst [vmem:[#allocation97_spill] sm:$0xff] %v4856_v36  ;;  %v947_v55 = vld [vmem:[#allocation9 + $0x150] sm:$0xff]  ;;  %v952_v54 = vld [vmem:[#allocation9 + $0x178] sm:$0xff]  ;;  %6734 = vst [vmem:[#allocation99_spill] sm:$0xff] %v4862_v2 }
  0xe5   :  { %v951_v50 = vld [vmem:[#allocation9 + $0x170] sm:$0xff]  ;;  %v4871_v23 = vcombine.high %v948_v39, %v952_v54  ;;  %v4878_v63 = vcombine.low %v948_v39, %v952_v54 }
  0xe6   :  { %v4868_v56 = vcombine.high %v947_v55, %v951_v50  ;;  %v4874_v22 = vcombine.low %v947_v55, %v951_v50 }
  0xe7   :  { %1774 = vmatpush1.bf16.msra.mxu0 %v4838_v8  ;;  %1815 = vmatpush1.bf16.msra.mxu1 %v4842_v3  ;;  %6737 = vst [vmem:[#allocation102_spill] sm:$0xff] %v4871_v23  ;;  %v956_v3 = vld [vmem:[#allocation9 + $0x198] sm:$0xff]  ;;  %6739 = vst [vmem:[#allocation104_spill] sm:$0xff] %v4878_v63 }
  0xe8   :  { %1775 = vmatprep.subr.bf16.mxu0 %v4844_v7  ;;  %1816 = vmatprep.subr.bf16.mxu1 %v4847_v9  ;;  %6736 = vst [vmem:[#allocation101_spill] sm:$0xff] %v4868_v56  ;;  %v955_v9 = vld [vmem:[#allocation9 + $0x190] sm:$0xff]  ;;  %v960_v8 = vld [vmem:[#allocation9 + $0x1b8] sm:$0xff]  ;;  %6738 = vst [vmem:[#allocation103_spill] sm:$0xff] %v4874_v22 }
  0xe9   :  { %v959_v7 = vld [vmem:[#allocation9 + $0x1b0] sm:$0xff]  ;;  %v4883_v24 = vcombine.high %v956_v3, %v960_v8  ;;  %v4890_v54 = vcombine.low %v956_v3, %v960_v8 }
  0xea   :  { %v4880_v11 = vcombine.high %v955_v9, %v959_v7  ;;  %v4886_v50 = vcombine.low %v955_v9, %v959_v7 }
  0xeb   :  { %1776 = vmatpush1.bf16.msra.mxu0 %v4850_v35  ;;  %1817 = vmatpush1.bf16.msra.mxu1 %v4854_v25  ;;  %6741 = vst [vmem:[#allocation106_spill] sm:$0xff] %v4883_v24  ;;  %v964_v25 = vld [vmem:[#allocation9 + $0x1d8] sm:$0xff]  ;;  %6743 = vst [vmem:[#allocation108_spill] sm:$0xff] %v4890_v54 }
  0xec   :  { %1777 = vmatprep.subr.bf16.mxu0 %v4856_v36  ;;  %1818 = vmatprep.subr.bf16.mxu1 %v4859_v0  ;;  %6740 = vst [vmem:[#allocation105_spill] sm:$0xff] %v4880_v11  ;;  %v963_v0 = vld [vmem:[#allocation9 + $0x1d0] sm:$0xff]  ;;  %v968_v35 = vld [vmem:[#allocation9 + $0x1f8] sm:$0xff]  ;;  %6742 = vst [vmem:[#allocation107_spill] sm:$0xff] %v4886_v50 }
  0xed   :  { %v967_v36 = vld [vmem:[#allocation9 + $0x1f0] sm:$0xff]  ;;  %v4895_v55 = vcombine.high %v964_v25, %v968_v35  ;;  %v4902_v8 = vcombine.low %v964_v25, %v968_v35 }
  0xee   :  { %v4892_v39 = vcombine.high %v963_v0, %v967_v36  ;;  %v4898_v7 = vcombine.low %v963_v0, %v967_v36 }
  0xef   :  { %1778 = vmatpush1.bf16.msra.mxu0 %v4862_v2  ;;  %1819 = vmatpush1.bf16.msra.mxu1 %v4866_v1  ;;  %6745 = vst [vmem:[#allocation110_spill] sm:$0xff] %v4895_v55  ;;  %v972_v1 = vld [vmem:[#allocation9 + $0x218] sm:$0xff]  ;;  %6747 = vst [vmem:[#allocation112_spill] sm:$0xff] %v4902_v8 }
  0xf0   :  { %1779 = vmatprep.subr.bf16.mxu0 %v4868_v56  ;;  %1820 = vmatprep.subr.bf16.mxu1 %v4871_v23  ;;  %6744 = vst [vmem:[#allocation109_spill] sm:$0xff] %v4892_v39  ;;  %v971_v23 = vld [vmem:[#allocation9 + $0x210] sm:$0xff]  ;;  %v976_v2 = vld [vmem:[#allocation9 + $0x238] sm:$0xff]  ;;  %6746 = vst [vmem:[#allocation111_spill] sm:$0xff] %v4898_v7 }
  0xf1   :  { %v975_v56 = vld [vmem:[#allocation9 + $0x230] sm:$0xff]  ;;  %v4907_v9 = vcombine.high %v972_v1, %v976_v2  ;;  %v4914_v35 = vcombine.low %v972_v1, %v976_v2 }
  0xf2   :  { %v4904_v3 = vcombine.high %v971_v23, %v975_v56  ;;  %v4910_v36 = vcombine.low %v971_v23, %v975_v56 }
  0xf3   :  { %1780 = vmatpush1.bf16.msra.mxu0 %v4874_v22  ;;  %1821 = vmatpush1.bf16.msra.mxu1 %v4878_v63  ;;  %6749 = vst [vmem:[#allocation114_spill] sm:$0xff] %v4907_v9  ;;  %v980_v63 = vld [vmem:[#allocation9 + $0x258] sm:$0xff]  ;;  %6751 = vst [vmem:[#allocation116_spill] sm:$0xff] %v4914_v35 }
  0xf4   :  { %1781 = vmatprep.subr.bf16.mxu0 %v4880_v11  ;;  %1822 = vmatprep.subr.bf16.mxu1 %v4883_v24  ;;  %6748 = vst [vmem:[#allocation113_spill] sm:$0xff] %v4904_v3  ;;  %v979_v24 = vld [vmem:[#allocation9 + $0x250] sm:$0xff]  ;;  %v984_v22 = vld [vmem:[#allocation9 + $0x278] sm:$0xff]  ;;  %6750 = vst [vmem:[#allocation115_spill] sm:$0xff] %v4910_v36 }
  0xf5   :  { %v983_v11 = vld [vmem:[#allocation9 + $0x270] sm:$0xff]  ;;  %v4919_v0 = vcombine.high %v980_v63, %v984_v22  ;;  %v4926_v2 = vcombine.low %v980_v63, %v984_v22 }
  0xf6   :  { %v4916_v25 = vcombine.high %v979_v24, %v983_v11  ;;  %v4922_v56 = vcombine.low %v979_v24, %v983_v11 }
  0xf7   :  { %1782 = vmatpush1.bf16.msra.mxu0 %v4886_v50  ;;  %1823 = vmatpush1.bf16.msra.mxu1 %v4890_v54  ;;  %6753 = vst [vmem:[#allocation118_spill] sm:$0xff] %v4919_v0  ;;  %v988_v54 = vld [vmem:[#allocation9 + $0x298] sm:$0xff]  ;;  %6755 = vst [vmem:[#allocation120_spill] sm:$0xff] %v4926_v2 }
  0xf8   :  { %1783 = vmatprep.subr.bf16.mxu0 %v4892_v39  ;;  %1824 = vmatprep.subr.bf16.mxu1 %v4895_v55  ;;  %6752 = vst [vmem:[#allocation117_spill] sm:$0xff] %v4916_v25  ;;  %v987_v55 = vld [vmem:[#allocation9 + $0x290] sm:$0xff]  ;;  %v992_v50 = vld [vmem:[#allocation9 + $0x2b8] sm:$0xff]  ;;  %6754 = vst [vmem:[#allocation119_spill] sm:$0xff] %v4922_v56 }
  0xf9   :  { %v991_v39 = vld [vmem:[#allocation9 + $0x2b0] sm:$0xff]  ;;  %v4931_v23 = vcombine.high %v988_v54, %v992_v50  ;;  %v4938_v22 = vcombine.low %v988_v54, %v992_v50 }
  0xfa   :  { %v4928_v1 = vcombine.high %v987_v55, %v991_v39  ;;  %v4934_v11 = vcombine.low %v987_v55, %v991_v39 }
  0xfb   :  { %1784 = vmatpush1.bf16.msra.mxu0 %v4898_v7  ;;  %1825 = vmatpush1.bf16.msra.mxu1 %v4902_v8  ;;  %6757 = vst [vmem:[#allocation122_spill] sm:$0xff] %v4931_v23  ;;  %v996_v8 = vld [vmem:[#allocation9 + $0x2d8] sm:$0xff]  ;;  %6759 = vst [vmem:[#allocation124_spill] sm:$0xff] %v4938_v22 }
  0xfc   :  { %1785 = vmatprep.subr.bf16.mxu0 %v4904_v3  ;;  %1826 = vmatprep.subr.bf16.mxu1 %v4907_v9  ;;  %6756 = vst [vmem:[#allocation121_spill] sm:$0xff] %v4928_v1  ;;  %v995_v9 = vld [vmem:[#allocation9 + $0x2d0] sm:$0xff]  ;;  %v1000_v7 = vld [vmem:[#allocation9 + $0x2f8] sm:$0xff]  ;;  %6758 = vst [vmem:[#allocation123_spill] sm:$0xff] %v4934_v11 }
  0xfd   :  { %v999_v3 = vld [vmem:[#allocation9 + $0x2f0] sm:$0xff]  ;;  %v4943_v24 = vcombine.high %v996_v8, %v1000_v7  ;;  %v4950_v50 = vcombine.low %v996_v8, %v1000_v7 }
  0xfe   :  { %v4940_v63 = vcombine.high %v995_v9, %v999_v3  ;;  %v4946_v39 = vcombine.low %v995_v9, %v999_v3 }
  0xff   :  { %1786 = vmatpush1.bf16.msra.mxu0 %v4910_v36  ;;  %1827 = vmatpush1.bf16.msra.mxu1 %v4914_v35  ;;  %6761 = vst [vmem:[#allocation126_spill] sm:$0xff] %v4943_v24  ;;  %v1004_v35 = vld [vmem:[#allocation9 + $0x318] sm:$0xff]  ;;  %6763 = vst [vmem:[#allocation128_spill] sm:$0xff] %v4950_v50 }
 0x100   :  { %1787 = vmatprep.subr.bf16.mxu0 %v4916_v25  ;;  %1828 = vmatprep.subr.bf16.mxu1 %v4919_v0  ;;  %6760 = vst [vmem:[#allocation125_spill] sm:$0xff] %v4940_v63  ;;  %v1003_v0 = vld [vmem:[#allocation9 + $0x310] sm:$0xff]  ;;  %v1008_v36 = vld [vmem:[#allocation9 + $0x338] sm:$0xff]  ;;  %6762 = vst [vmem:[#allocation127_spill] sm:$0xff] %v4946_v39 }
 0x101   :  { %v1007_v25 = vld [vmem:[#allocation9 + $0x330] sm:$0xff]  ;;  %v4955_v55 = vcombine.high %v1004_v35, %v1008_v36  ;;  %v4962_v7 = vcombine.low %v1004_v35, %v1008_v36 }
 0x102   :  { %v4952_v54 = vcombine.high %v1003_v0, %v1007_v25  ;;  %v4958_v3 = vcombine.low %v1003_v0, %v1007_v25 }
 0x103   :  { %1788 = vmatpush1.bf16.msra.mxu0 %v4922_v56  ;;  %1829 = vmatpush1.bf16.msra.mxu1 %v4926_v2  ;;  %6765 = vst [vmem:[#allocation130_spill] sm:$0xff] %v4955_v55  ;;  %v1012_v2 = vld [vmem:[#allocation9 + $0x358] sm:$0xff]  ;;  %6767 = vst [vmem:[#allocation132_spill] sm:$0xff] %v4962_v7 }
 0x104   :  { %1789 = vmatprep.subr.bf16.mxu0 %v4928_v1  ;;  %1830 = vmatprep.subr.bf16.mxu1 %v4931_v23  ;;  %6764 = vst [vmem:[#allocation129_spill] sm:$0xff] %v4952_v54  ;;  %v1011_v23 = vld [vmem:[#allocation9 + $0x350] sm:$0xff]  ;;  %v1016_v56 = vld [vmem:[#allocation9 + $0x378] sm:$0xff]  ;;  %6766 = vst [vmem:[#allocation131_spill] sm:$0xff] %v4958_v3 }
 0x105   :  { %v1015_v1 = vld [vmem:[#allocation9 + $0x370] sm:$0xff]  ;;  %v4967_v9 = vcombine.high %v1012_v2, %v1016_v56  ;;  %v4974_v36 = vcombine.low %v1012_v2, %v1016_v56 }
 0x106   :  { %v4964_v8 = vcombine.high %v1011_v23, %v1015_v1  ;;  %v4970_v25 = vcombine.low %v1011_v23, %v1015_v1 }
 0x107   :  { %1790 = vmatpush1.bf16.msra.mxu0 %v4934_v11  ;;  %1831 = vmatpush1.bf16.msra.mxu1 %v4938_v22  ;;  %6769 = vst [vmem:[#allocation134_spill] sm:$0xff] %v4967_v9  ;;  %v1020_v22 = vld [vmem:[#allocation9 + $0x398] sm:$0xff]  ;;  %6771 = vst [vmem:[#allocation136_spill] sm:$0xff] %v4974_v36 }
 0x108   :  { %1791 = vmatprep.subr.bf16.mxu0 %v4940_v63  ;;  %1832 = vmatprep.subr.bf16.mxu1 %v4943_v24  ;;  %6768 = vst [vmem:[#allocation133_spill] sm:$0xff] %v4964_v8  ;;  %v1019_v24 = vld [vmem:[#allocation9 + $0x390] sm:$0xff]  ;;  %v1024_v11 = vld [vmem:[#allocation9 + $0x3b8] sm:$0xff]  ;;  %6770 = vst [vmem:[#allocation135_spill] sm:$0xff] %v4970_v25 }
 0x109   :  { %v1023_v63 = vld [vmem:[#allocation9 + $0x3b0] sm:$0xff]  ;;  %v4979_v0 = vcombine.high %v1020_v22, %v1024_v11  ;;  %v4986_v56 = vcombine.low %v1020_v22, %v1024_v11  ;;  %v6780_v22 = vld [vmem:[#allocation60_spill] sm:$0xff] }
 0x10a   :  { %v4976_v35 = vcombine.high %v1019_v24, %v1023_v63  ;;  %v4982_v1 = vcombine.low %v1019_v24, %v1023_v63  ;;  %v6781_v24 = vld [vmem:[#allocation61_spill] sm:$0xff] }
 0x10b   :  { %1792 = vmatpush1.bf16.msra.mxu0 %v4946_v39  ;;  %1833 = vmatpush1.bf16.msra.mxu1 %v4950_v50  ;;  %6773 = vst [vmem:[#allocation138_spill] sm:$0xff] %v4979_v0  ;;  %v1028_v50 = vld [vmem:[#allocation9 + $0x3d8] sm:$0xff]  ;;  %6775 = vst [vmem:[#allocation140_spill] sm:$0xff] %v4986_v56 }
 0x10c   :  { %1793 = vmatprep.subr.bf16.mxu0 %v4952_v54  ;;  %1834 = vmatprep.subr.bf16.mxu1 %v4955_v55  ;;  %6772 = vst [vmem:[#allocation137_spill] sm:$0xff] %v4976_v35  ;;  %v1027_v55 = vld [vmem:[#allocation9 + $0x3d0] sm:$0xff]  ;;  %v1032_v39 = vld [vmem:[#allocation9 + $0x3f8] sm:$0xff]  ;;  %6774 = vst [vmem:[#allocation139_spill] sm:$0xff] %v4982_v1 }
 0x10d   :  { %v1031_v54 = vld [vmem:[#allocation9 + $0x3f0] sm:$0xff]  ;;  %v4991_v23 = vcombine.high %v1028_v50, %v1032_v39  ;;  %v4998_v63 = vcombine.low %v1028_v50, %v1032_v39 }
 0x10e   :  { %v4988_v2 = vcombine.high %v1027_v55, %v1031_v54  ;;  %v6782_v39 = vld [vmem:[#allocation62_spill] sm:$0xff] }
 0x10f   :  { %1794 = vmatpush1.bf16.msra.mxu0 %v4958_v3  ;;  %1835 = vmatpush1.bf16.msra.mxu1 %v4962_v7  ;;  %6777 = vst [vmem:[#allocation142_spill] sm:$0xff] %v4991_v23  ;;  %6779 = vst [vmem:[#allocation144_spill] sm:$0xff] %v4998_v63 }
 0x110   :  { %1795 = vmatprep.subr.bf16.mxu0 %v4964_v8  ;;  %1836 = vmatprep.subr.bf16.mxu1 %v4967_v9  ;;  %6776 = vst [vmem:[#allocation141_spill] sm:$0xff] %v4988_v2  ;;  %v4994_v9 = vcombine.low %v1027_v55, %v1031_v54  ;;  %v6783_v54 = vld [vmem:[#allocation63_spill] sm:$0xff] }
 0x111   :  { %v5055_v55 = vld [vmem:[#allocation8] sm:$0xff] }
 0x112   :  { %6778 = vst [vmem:[#allocation143_spill] sm:$0xff] %v4994_v9 }
 0x113   :  { %1796 = vmatpush1.bf16.msra.mxu0 %v4970_v25  ;;  %1837 = vmatpush1.bf16.msra.mxu1 %v4974_v36 }
 0x114   :  { %1797 = vmatprep.subr.bf16.mxu0 %v4976_v35  ;;  %1838 = vmatprep.subr.bf16.mxu1 %v4979_v0 }
 0x117   :  { %1798 = vmatpush1.bf16.msra.mxu0 %v4982_v1  ;;  %1839 = vmatpush1.bf16.msra.mxu1 %v4986_v56 }
 0x118   :  { %1799 = vmatprep.subr.bf16.mxu0 %v4988_v2  ;;  %1840 = vmatprep.subr.bf16.mxu1 %v4991_v23 }
 0x11b   :  { %1800 = vmatpush1.bf16.msra.mxu0 %v4994_v9  ;;  %1841 = vmatpush1.bf16.msra.mxu1 %v4998_v63 }
 0x11c   :  { %1923 = vmatprep.subr.bf16.mxu0 %v4597_v12  ;;  %1964 = vmatprep.subr.bf16.mxu1 %v4600_v13 }
 0x11e   :  { %1802 = vmatmul.mubr.bf16.vlgmr.msra.gmra.mrb[36].mxu0 %v6721_v10  ;;  %1843 = vmatmul.mubr.bf16.vlgmr.msra.gmra.mrb[36].mxu1 %v6721_v10  ;;  %v165_v10 = vlaneseq }
 0x11f   :  { %1924 = vmatpush1.bf16.msra.mxu0 %v4603_v18  ;;  %1965 = vmatpush1.bf16.msra.mxu1 %v4606_v19 }
 0x120   :  { %1925 = vmatprep.subr.bf16.mxu0 %v4608_v20  ;;  %1966 = vmatprep.subr.bf16.mxu1 %v4611_v21  ;;  %v5047_v11 = vshrl.u32 %v165_v10, 7  ;;  %v6784_v10 = vld [vmem:[#allocation64_spill] sm:$0xff] }
 0x122   :  { %v171_v50 = vsub.s32 1, %v5047_v11 }
 0x123   :  { %1926 = vmatpush1.bf16.msra.mxu0 %v4616_v26  ;;  %1967 = vmatpush1.bf16.msra.mxu1 %v4620_v30 }
 0x124   :  { %1927 = vmatprep.subr.bf16.mxu0 %v4622_v31  ;;  %1968 = vmatprep.subr.bf16.mxu1 %v4625_v33 }
 0x127   :  { %1928 = vmatpush1.bf16.msra.mxu0 %v4630_v34  ;;  %1969 = vmatpush1.bf16.msra.mxu1 %v4634_v37 }
 0x128   :  { %1929 = vmatprep.subr.bf16.mxu0 %v4636_v38  ;;  %1970 = vmatprep.subr.bf16.mxu1 %v4639_v41 }
 0x12b   :  { %1930 = vmatpush1.bf16.msra.mxu0 %v4643_v42  ;;  %1971 = vmatpush1.bf16.msra.mxu1 %v4648_v46 }
 0x12c   :  { %1931 = vmatprep.subr.bf16.mxu0 %v4650_v47  ;;  %1972 = vmatprep.subr.bf16.mxu1 %v4653_v49 }
 0x12f   :  { %1932 = vmatpush1.bf16.msra.mxu0 %v4658_v27  ;;  %1973 = vmatpush1.bf16.msra.mxu1 %v4662_v51 }
 0x130   :  { %1933 = vmatprep.subr.bf16.mxu0 %v4664_v52  ;;  %1974 = vmatprep.subr.bf16.mxu1 %v4667_v53 }
 0x133   :  { %1934 = vmatpush1.bf16.msra.mxu0 %v4671_v58  ;;  %1975 = vmatpush1.bf16.msra.mxu1 %v4676_v59 }
 0x134   :  { %1935 = vmatprep.subr.bf16.mxu0 %v4678_v60  ;;  %1976 = vmatprep.subr.bf16.mxu1 %v4681_v62 }
 0x137   :  { %1936 = vmatpush1.bf16.msra.mxu0 %v4686_v44  ;;  %1977 = vmatpush1.bf16.msra.mxu1 %v4690_v4 }
 0x138   :  { %1937 = vmatprep.subr.bf16.mxu0 %v4692_v5  ;;  %1978 = vmatprep.subr.bf16.mxu1 %v4695_v6 }
 0x13b   :  { %1938 = vmatpush1.bf16.msra.mxu0 %v4699_v14  ;;  %1979 = vmatpush1.bf16.msra.mxu1 %v4704_v15  ;;  %v6812_v14 = vld [vmem:[#allocation81_spill] sm:$0xff] }
 0x13c   :  { %1939 = vmatprep.subr.bf16.mxu0 %v4706_v16  ;;  %1980 = vmatprep.subr.bf16.mxu1 %v4709_v17  ;;  %v6795_v16 = vld [vmem:[#allocation72_spill] sm:$0xff] }
 0x13f   :  { %1940 = vmatpush1.bf16.msra.mxu0 %v4714_v61  ;;  %1981 = vmatpush1.bf16.msra.mxu1 %v4718_v28  ;;  %v6792_v61 = vld [vmem:[#allocation71_spill] sm:$0xff] }
 0x140   :  { %1941 = vmatprep.subr.bf16.mxu0 %v4720_v29  ;;  %1982 = vmatprep.subr.bf16.mxu1 %v4723_v32  ;;  %v6788_v32 = vld [vmem:[#allocation68_spill] sm:$0xff] }
 0x143   :  { %1942 = vmatpush1.bf16.msra.mxu0 %v4726_v40  ;;  %1983 = vmatpush1.bf16.msra.mxu1 %v4730_v43  ;;  %v6785_v43 = vld [vmem:[#allocation65_spill] sm:$0xff] }
 0x144   :  { %1943 = vmatprep.subr.bf16.mxu0 %v4732_v45  ;;  %1984 = vmatprep.subr.bf16.mxu1 %v4735_v48  ;;  %v167_v45 = vsub.s32 0, %v5047_v11  ;;  %v179_v48 = vsub.s32 3, %v5047_v11 }
 0x146   :  { %v5071_v40 = vrot.slane %v5055_v55, %v179_v48 }
 0x147   :  { %1944 = vmatpush1.bf16.msra.mxu0 %v4738_v57  ;;  %1985 = vmatpush1.bf16.msra.mxu1 %v6780_v22  ;;  %v175_v22 = vsub.s32 2, %v5047_v11  ;;  %v6786_v57 = vld [vmem:[#allocation66_spill] sm:$0xff] }
 0x148   :  { %1945 = vmatprep.subr.bf16.mxu0 %v6781_v24  ;;  %1986 = vmatprep.subr.bf16.mxu1 %v6782_v39  ;;  %v5064_v39 = vrot.slane %v5055_v55, %v171_v50  ;;  %v6787_v24 = vld [vmem:[#allocation67_spill] sm:$0xff] }
 0x149   :  { %v5078_v29 = vrot.slane %v5055_v55, %v175_v22 }
 0x14b   :  { %1946 = vmatpush1.bf16.msra.mxu0 %v6783_v54  ;;  %1987 = vmatpush1.bf16.msra.mxu1 %v6784_v10  ;;  %v5068_v54 = vrot.slane %v5055_v55, %v167_v45  ;;  %v6789_v10 = vld [vmem:[#allocation69_spill] sm:$0xff] }
 0x14c   :  { %1947 = vmatprep.subr.bf16.mxu0 %v6785_v43  ;;  %1988 = vmatprep.subr.bf16.mxu1 %v6786_v57  ;;  %v6790_v57 = vld [vmem:[#allocation70_spill] sm:$0xff] }
 0x14f   :  { %1948 = vmatpush1.bf16.msra.mxu0 %v6787_v24  ;;  %1989 = vmatpush1.bf16.msra.mxu1 %v6788_v32 }
 0x150   :  { %1949 = vmatprep.subr.bf16.mxu0 %v6789_v10  ;;  %1990 = vmatprep.subr.bf16.mxu1 %v6790_v57  ;;  %v6796_v57 = vld [vmem:[#allocation73_spill] sm:$0xff] }
 0x151   :  { %v5075_v43 = vpop.f32.mrb[0].mxu0  ;;  %v5081_v50 = vpop.f32.mrb[0].mxu1 }
 0x152   :  { %v585_v24 = vpop.f32.mrb[1].mxu0  ;;  %v658_v28 = vpop.f32.mrb[1].mxu1 }
 0x153   :  { %v5084_v45 = vadd.f32 %v585_v24, %v5064_v39  ;;  %v587_v48 = vpop.f32.mrb[2].mxu0  ;;  %1950 = vmatpush1.bf16.msra.mxu0 %v6792_v61  ;;  %v5088_v32 = vadd.f32 %v658_v28, %v5071_v40  ;;  %v660_v22 = vpop.f32.mrb[2].mxu1  ;;  %1991 = vmatpush1.bf16.msra.mxu1 %v6795_v16  ;;  %v6799_v61 = vld [vmem:[#allocation74_spill] sm:$0xff] }
 0x154   :  { %v5091_v10 = vadd.f32 %v587_v48, %v5068_v54  ;;  %v589_v17 = vpop.f32.mrb[3].mxu0  ;;  %1951 = vmatprep.subr.bf16.mxu0 %v6796_v57  ;;  %v5096_v15 = vadd.f32 %v660_v22, %v5078_v29  ;;  %1992 = vmatprep.subr.bf16.mxu1 %v6799_v61  ;;  %v6801_v48 = vld [vmem:[#allocation75_spill] sm:$0xff]  ;;  %v6804_v57 = vld [vmem:[#allocation78_spill] sm:$0xff] }
 0x155   :  { %6791 = vst [vmem:[#allocation145_spill] sm:$0xff] %v5084_v45  ;;  %6793 = vst [vmem:[#allocation146_spill] sm:$0xff] %v5088_v32  ;;  %v5099_v24 = vadd.f32 %v589_v17, %v5064_v39  ;;  %v662_v45 = vpop.f32.mrb[3].mxu1  ;;  %v6802_v32 = vld [vmem:[#allocation76_spill] sm:$0xff]  ;;  %v6808_v61 = vld [vmem:[#allocation79_spill] sm:$0xff] }
 0x156   :  { %6794 = vst [vmem:[#allocation147_spill] sm:$0xff] %v5091_v10  ;;  %6797 = vst [vmem:[#allocation148_spill] sm:$0xff] %v5096_v15  ;;  %v5103_v28 = vadd.f32 %v662_v45, %v5071_v40  ;;  %v6803_v10 = vld [vmem:[#allocation77_spill] sm:$0xff] }
 0x157   :  { %6798 = vst [vmem:[#allocation149_spill] sm:$0xff] %v5099_v24  ;;  %1952 = vmatpush1.bf16.msra.mxu0 %v6801_v48  ;;  %1993 = vmatpush1.bf16.msra.mxu1 %v6802_v32  ;;  %v6811_v32 = vld [vmem:[#allocation80_spill] sm:$0xff] }
 0x158   :  { %6800 = vst [vmem:[#allocation150_spill] sm:$0xff] %v5103_v28  ;;  %1953 = vmatprep.subr.bf16.mxu0 %v6803_v10  ;;  %1994 = vmatprep.subr.bf16.mxu1 %v6804_v57 }
 0x159   :  { %v593_v16 = vpop.f32.mrb[4].mxu0  ;;  %v666_v17 = vpop.f32.mrb[4].mxu1 }
 0x15a   :  { %v5110_v22 = vadd.f32 %v593_v16, %v5068_v54  ;;  %v595_v24 = vpop.f32.mrb[5].mxu0  ;;  %v5113_v15 = vadd.f32 %v666_v17, %v5078_v29  ;;  %v668_v28 = vpop.f32.mrb[5].mxu1 }
 0x15b   :  { %v5116_v45 = vadd.f32 %v595_v24, %v5064_v39  ;;  %v597_v48 = vpop.f32.mrb[6].mxu0  ;;  %1954 = vmatpush1.bf16.msra.mxu0 %v6808_v61  ;;  %v5120_v10 = vadd.f32 %v668_v28, %v5071_v40  ;;  %v670_v16 = vpop.f32.mrb[6].mxu1  ;;  %1995 = vmatpush1.bf16.msra.mxu1 %v6811_v32 }
 0x15c   :  { %6805 = vst [vmem:[#allocation151_spill] sm:$0xff] %v5110_v22  ;;  %6806 = vst [vmem:[#allocation152_spill] sm:$0xff] %v5113_v15  ;;  %v5123_v57 = vadd.f32 %v597_v48, %v5068_v54  ;;  %v599_v22 = vpop.f32.mrb[7].mxu0  ;;  %2005 = vmatprep.subr.bf16.mxu0 %v6812_v14  ;;  %v5128_v17 = vadd.f32 %v670_v16, %v5078_v29  ;;  %v6815_v15 = vld [vmem:[#allocation82_spill] sm:$0xff] }
 0x15d   :  { %6807 = vst [vmem:[#allocation153_spill] sm:$0xff] %v5116_v45  ;;  %6809 = vst [vmem:[#allocation154_spill] sm:$0xff] %v5120_v10  ;;  %v5131_v24 = vadd.f32 %v599_v22, %v5064_v39  ;;  %v672_v45 = vpop.f32.mrb[7].mxu1  ;;  %2046 = vmatprep.subr.bf16.mxu1 %v6815_v15 }
 0x15e   :  { %6810 = vst [vmem:[#allocation155_spill] sm:$0xff] %v5123_v57  ;;  %6813 = vst [vmem:[#allocation156_spill] sm:$0xff] %v5128_v17  ;;  %v5135_v28 = vadd.f32 %v672_v45, %v5071_v40 }
 0x15f   :  { %6814 = vst [vmem:[#allocation157_spill] sm:$0xff] %v5131_v24 }
 0x160   :  { %6816 = vst [vmem:[#allocation158_spill] sm:$0xff] %v5135_v28 }
 0x161   :  { %v603_v48 = vpop.f32.mrb[8].mxu0  ;;  %v676_v57 = vpop.f32.mrb[8].mxu1 }
 0x162   :  { %v5138_v10 = vadd.f32 %v603_v48, %v5068_v54  ;;  %v605_v32 = vpop.f32.mrb[9].mxu0  ;;  %v5141_v14 = vadd.f32 %v676_v57, %v5078_v29  ;;  %v678_v22 = vpop.f32.mrb[9].mxu1 }
 0x163   :  { %v5144_v16 = vadd.f32 %v605_v32, %v5064_v39  ;;  %v607_v24 = vpop.f32.mrb[10].mxu0  ;;  %v5147_v17 = vadd.f32 %v678_v22, %v5071_v40  ;;  %v680_v28 = vpop.f32.mrb[10].mxu1 }
 0x164   :  { %6817 = vst [vmem:[#allocation159_spill] sm:$0xff] %v5138_v10  ;;  %6818 = vst [vmem:[#allocation160_spill] sm:$0xff] %v5141_v14  ;;  %v5150_v45 = vadd.f32 %v607_v24, %v5068_v54  ;;  %v609_v15 = vpop.f32.mrb[11].mxu0  ;;  %v5153_v48 = vadd.f32 %v680_v28, %v5078_v29  ;;  %v682_v57 = vpop.f32.mrb[11].mxu1 }
 0x165   :  { %6819 = vst [vmem:[#allocation161_spill] sm:$0xff] %v5144_v16  ;;  %6820 = vst [vmem:[#allocation162_spill] sm:$0xff] %v5147_v17  ;;  %v5156_v10 = vadd.f32 %v609_v15, %v5064_v39  ;;  %v5159_v32 = vadd.f32 %v682_v57, %v5071_v40  ;;  %v187_v15 = vsub.s32 5, %v5047_v11 }
 0x166   :  { %6821 = vst [vmem:[#allocation163_spill] sm:$0xff] %v5150_v45  ;;  %6822 = vst [vmem:[#allocation164_spill] sm:$0xff] %v5153_v48 }
 0x167   :  { %6823 = vst [vmem:[#allocation165_spill] sm:$0xff] %v5156_v10  ;;  %6824 = vst [vmem:[#allocation166_spill] sm:$0xff] %v5159_v32  ;;  %v183_v32 = vsub.s32 4, %v5047_v11 }
 0x169   :  { %v613_v14 = vpop.f32.mrb[12].mxu0  ;;  %v686_v22 = vpop.f32.mrb[12].mxu1 }
 0x16a   :  { %v5162_v16 = vadd.f32 %v613_v14, %v5068_v54  ;;  %v615_v17 = vpop.f32.mrb[13].mxu0  ;;  %v5165_v24 = vadd.f32 %v686_v22, %v5078_v29  ;;  %v688_v28 = vpop.f32.mrb[13].mxu1  ;;  %v195_v22 = vsub.s32 7, %v5047_v11 }
 0x16b   :  { %v5168_v45 = vadd.f32 %v615_v17, %v5064_v39  ;;  %v617_v48 = vpop.f32.mrb[14].mxu0  ;;  %v5172_v10 = vadd.f32 %v688_v28, %v5071_v40  ;;  %v690_v14 = vpop.f32.mrb[14].mxu1  ;;  %v5188_v28 = vrot.slane %v5055_v55, %v187_v15 }
 0x16c   :  { %6825 = vst [vmem:[#allocation167_spill] sm:$0xff] %v5162_v16  ;;  %6826 = vst [vmem:[#allocation168_spill] sm:$0xff] %v5165_v24  ;;  %v5175_v57 = vadd.f32 %v617_v48, %v5068_v54  ;;  %v5177_v16 = vpop.f32.mrb[15].mxu0  ;;  %v5182_v17 = vadd.f32 %v690_v14, %v5078_v29  ;;  %v5184_v24 = vpop.f32.mrb[15].mxu1  ;;  %v5191_v48 = vrot.slane %v5055_v55, %v183_v32 }
 0x16d   :  { %6827 = vst [vmem:[#allocation169_spill] sm:$0xff] %v5168_v45  ;;  %6828 = vst [vmem:[#allocation170_spill] sm:$0xff] %v5172_v10  ;;  %v191_v45 = vsub.s32 6, %v5047_v11 }
 0x16e   :  { %6829 = vst [vmem:[#allocation171_spill] sm:$0xff] %v5175_v57  ;;  %6830 = vst [vmem:[#allocation172_spill] sm:$0xff] %v5182_v17  ;;  %v5194_v57 = vrot.slane %v5055_v55, %v195_v22 }
 0x16f   :  { %v5199_v61 = vrot.slane %v5055_v55, %v191_v45 }
 0x171   :  { %v5196_v10 = vpop.f32.mrb[16].mxu0  ;;  %v5201_v14 = vpop.f32.mrb[16].mxu1 }
 0x172   :  { %v731_v17 = vpop.f32.mrb[17].mxu0  ;;  %v804_v11 = vpop.f32.mrb[17].mxu1 }
 0x173   :  { %v5204_v6 = vadd.f32 %v731_v17, %v5188_v28  ;;  %v733_v15 = vpop.f32.mrb[18].mxu0  ;;  %v5207_v5 = vadd.f32 %v804_v11, %v5194_v57  ;;  %v806_v22 = vpop.f32.mrb[18].mxu1 }
 0x174   :  { %v5210_v32 = vadd.f32 %v733_v15, %v5191_v48  ;;  %v735_v4 = vpop.f32.mrb[19].mxu0  ;;  %v5213_v44 = vadd.f32 %v806_v22, %v5199_v61  ;;  %v808_v45 = vpop.f32.mrb[19].mxu1 }
 0x175   :  { %6831 = vst [vmem:[#allocation173_spill] sm:$0xff] %v5204_v6  ;;  %6832 = vst [vmem:[#allocation174_spill] sm:$0xff] %v5207_v5  ;;  %v5216_v55 = vadd.f32 %v735_v4, %v5188_v28  ;;  %v5219_v17 = vadd.f32 %v808_v45, %v5194_v57 }
 0x176   :  { %6833 = vst [vmem:[#allocation175_spill] sm:$0xff] %v5210_v32  ;;  %6834 = vst [vmem:[#allocation176_spill] sm:$0xff] %v5213_v44 }
 0x177   :  { %6835 = vst [vmem:[#allocation177_spill] sm:$0xff] %v5216_v55  ;;  %6836 = vst [vmem:[#allocation178_spill] sm:$0xff] %v5219_v17 }
 0x179   :  { %v739_v6 = vpop.f32.mrb[20].mxu0  ;;  %v812_v11 = vpop.f32.mrb[20].mxu1 }
 0x17a   :  { %v5222_v62 = vadd.f32 %v739_v6, %v5191_v48  ;;  %v741_v5 = vpop.f32.mrb[21].mxu0  ;;  %v5225_v15 = vadd.f32 %v812_v11, %v5199_v61  ;;  %v814_v22 = vpop.f32.mrb[21].mxu1 }
 0x17b   :  { %v5228_v32 = vadd.f32 %v741_v5, %v5188_v28  ;;  %v743_v44 = vpop.f32.mrb[22].mxu0  ;;  %v5231_v4 = vadd.f32 %v814_v22, %v5194_v57  ;;  %v816_v17 = vpop.f32.mrb[22].mxu1 }
 0x17c   :  { %6837 = vst [vmem:[#allocation179_spill] sm:$0xff] %v5222_v62  ;;  %6838 = vst [vmem:[#allocation180_spill] sm:$0xff] %v5225_v15  ;;  %v5234_v45 = vadd.f32 %v743_v44, %v5191_v48  ;;  %v745_v55 = vpop.f32.mrb[23].mxu0  ;;  %v5237_v6 = vadd.f32 %v816_v17, %v5199_v61  ;;  %v818_v11 = vpop.f32.mrb[23].mxu1 }
 0x17d   :  { %6839 = vst [vmem:[#allocation181_spill] sm:$0xff] %v5228_v32  ;;  %6840 = vst [vmem:[#allocation182_spill] sm:$0xff] %v5231_v4  ;;  %v5240_v62 = vadd.f32 %v745_v55, %v5188_v28  ;;  %v5243_v5 = vadd.f32 %v818_v11, %v5194_v57 }
 0x17e   :  { %6841 = vst [vmem:[#allocation183_spill] sm:$0xff] %v5234_v45  ;;  %6842 = vst [vmem:[#allocation184_spill] sm:$0xff] %v5237_v6 }
 0x17f   :  { %6843 = vst [vmem:[#allocation185_spill] sm:$0xff] %v5240_v62  ;;  %6844 = vst [vmem:[#allocation186_spill] sm:$0xff] %v5243_v5 }
 0x181   :  { %v749_v32 = vpop.f32.mrb[24].mxu0  ;;  %v822_v22 = vpop.f32.mrb[24].mxu1 }
 0x182   :  { %v5246_v15 = vadd.f32 %v749_v32, %v5191_v48  ;;  %v751_v4 = vpop.f32.mrb[25].mxu0  ;;  %v5249_v44 = vadd.f32 %v822_v22, %v5199_v61  ;;  %v824_v17 = vpop.f32.mrb[25].mxu1 }
 0x183   :  { %v5252_v45 = vadd.f32 %v751_v4, %v5188_v28  ;;  %v753_v6 = vpop.f32.mrb[26].mxu0  ;;  %v5255_v55 = vadd.f32 %v824_v17, %v5194_v57  ;;  %v826_v5 = vpop.f32.mrb[26].mxu1 }
 0x184   :  { %6845 = vst [vmem:[#allocation187_spill] sm:$0xff] %v5246_v15  ;;  %6846 = vst [vmem:[#allocation188_spill] sm:$0xff] %v5249_v44  ;;  %v5258_v11 = vadd.f32 %v753_v6, %v5191_v48  ;;  %v755_v62 = vpop.f32.mrb[27].mxu0  ;;  %v5261_v32 = vadd.f32 %v826_v5, %v5199_v61  ;;  %v828_v22 = vpop.f32.mrb[27].mxu1 }
 0x185   :  { %6847 = vst [vmem:[#allocation189_spill] sm:$0xff] %v5252_v45  ;;  %6848 = vst [vmem:[#allocation190_spill] sm:$0xff] %v5255_v55  ;;  %v5264_v15 = vadd.f32 %v755_v62, %v5188_v28  ;;  %v5267_v4 = vadd.f32 %v828_v22, %v5194_v57 }
 0x186   :  { %6849 = vst [vmem:[#allocation191_spill] sm:$0xff] %v5258_v11  ;;  %6850 = vst [vmem:[#allocation192_spill] sm:$0xff] %v5261_v32 }
 0x187   :  { %6851 = vst [vmem:[#allocation193_spill] sm:$0xff] %v5264_v15  ;;  %6852 = vst [vmem:[#allocation194_spill] sm:$0xff] %v5267_v4 }
 0x189   :  { %v759_v44 = vpop.f32.mrb[28].mxu0  ;;  %v832_v17 = vpop.f32.mrb[28].mxu1 }
 0x18a   :  { %v5270_v45 = vadd.f32 %v759_v44, %v5191_v48  ;;  %v761_v55 = vpop.f32.mrb[29].mxu0  ;;  %v5273_v6 = vadd.f32 %v832_v17, %v5199_v61  ;;  %v834_v5 = vpop.f32.mrb[29].mxu1  ;;  %v584_v17 = vadd.f32 %v5075_v43, %v5068_v54 }
 0x18b   :  { %v5276_v11 = vadd.f32 %v761_v55, %v5188_v28  ;;  %v763_v32 = vpop.f32.mrb[30].mxu0  ;;  %v5279_v62 = vadd.f32 %v834_v5, %v5194_v57  ;;  %v836_v4 = vpop.f32.mrb[30].mxu1  ;;  %v657_v55 = vadd.f32 %v5081_v50, %v5078_v29 }
 0x18c   :  { %6853 = vst [vmem:[#allocation195_spill] sm:$0xff] %v5270_v45  ;;  %6854 = vst [vmem:[#allocation196_spill] sm:$0xff] %v5273_v6  ;;  %v5282_v22 = vadd.f32 %v763_v32, %v5191_v48  ;;  %v765_v15 = vpop.f32.mrb[31].mxu0  ;;  %v5285_v44 = vadd.f32 %v836_v4, %v5199_v61  ;;  %v838_v45 = vpop.f32.mrb[31].mxu1  ;;  %v620_v6 = vadd.f32 %v5177_v16, %v5064_v39 }
 0x18d   :  { %6855 = vst [vmem:[#allocation197_spill] sm:$0xff] %v5276_v11  ;;  %6856 = vst [vmem:[#allocation198_spill] sm:$0xff] %v5279_v62  ;;  %v693_v32 = vadd.f32 %v5184_v24, %v5071_v40 }
 0x18e   :  { %6857 = vst [vmem:[#allocation199_spill] sm:$0xff] %v5282_v22  ;;  %6858 = vst [vmem:[#allocation200_spill] sm:$0xff] %v5285_v44 }
 0x1b1   :  { %v1721_v5 = vpop.f32.mrb[32].mxu0  ;;  %v1762_v62 = vpop.f32.mrb[32].mxu1 }
 0x1b2   :  { %v1851_v22 = vadd.f32 %v1721_v5, %v584_v17  ;;  %v1723_v11 = vpop.f32.mrb[33].mxu0  ;;  %v1853_v60 = vadd.f32 %v1762_v62, %v657_v55  ;;  %v1764_v44 = vpop.f32.mrb[33].mxu1 }
 0x1b3   :  { %v1852_v4 = vadd.f32 %v1723_v11, %v620_v6  ;;  %v1725_v59 = vpop.f32.mrb[34].mxu0  ;;  %v1854_v58 = vadd.f32 %v1764_v44, %v693_v32  ;;  %v1766_v53 = vpop.f32.mrb[34].mxu1 }
 0x1b4   :  { %v1726_v43 = vpop.f32.mrb[35].mxu0  ;;  %v1767_v54 = vpop.f32.mrb[35].mxu1  ;;  %v3947_v52 = vmul.f32 -1.442695, %v1851_v22  ;;  %v3949_v29 = vmul.f32 -1.442695, %v1853_v60  ;;  %v730_v53 = vadd.f32 %v5196_v10, %v5191_v48  ;;  %v803_v60 = vadd.f32 %v5201_v14, %v5199_v61 }
 0x1b5   :  { %v3948_v50 = vmul.f32 -1.442695, %v1852_v4  ;;  %v3950_v51 = vmul.f32 -1.442695, %v1854_v58  ;;  %v766_v58 = vadd.f32 %v765_v15, %v5188_v28 }
 0x1b6   :  { %4065 = vpow2.f32 %v3947_v52 }
 0x1b7   :  { %4067 = vpow2.f32 %v3949_v29 }
 0x1b8   :  { %4069 = vpow2.f32 %v3948_v50 }
 0x1b9   :  { %4071 = vpow2.f32 %v3950_v51  ;;  %v839_v51 = vadd.f32 %v838_v45, %v5194_v57 }
 0x1c0   :  { %v4066_v40 = vpop.eup %4065 }
 0x1c1   :  { %v4068_v39 = vpop.eup %4067  ;;  %v1877_v62 = vadd.f32 1.0, %v4066_v40 }
 0x1c2   :  { %v4070_v16 = vpop.eup %4069  ;;  %v1879_v11 = vadd.f32 1.0, %v4068_v39 }
 0x1c3   :  { %v4072_v24 = vpop.eup %4071  ;;  %v1878_v6 = vadd.f32 1.0, %v4070_v16  ;;  %4073 = vrcp.f32 %v1877_v62 }
 0x1c4   :  { %v1880_v59 = vadd.f32 1.0, %v4072_v24  ;;  %4075 = vrcp.f32 %v1879_v11 }
 0x1c5   :  { %4077 = vrcp.f32 %v1878_v6 }
 0x1c6   :  { %4079 = vrcp.f32 %v1880_v59 }
 0x1cd   :  { %v4074_v57 = vpop.eup %4073 }
 0x1ce   :  { %v4076_v15 = vpop.eup %4075 }
 0x1cf   :  { %v4078_v45 = vpop.eup %4077  ;;  %v1897_v40 = vmul.f32 0.0, %v4076_v15  ;;  %v6870_v15 = vld [vmem:[#allocation92_spill] sm:$0xff] }
 0x1d0   :  { %v4080_v54 = vpop.eup %4079 }
 0x1f1   :  { %v1803_v52 = vpop.f32.mrb[36].mxu0  ;;  %v1844_v44 = vpop.f32.mrb[36].mxu1 }
 0x1f2   :  { %v1855_v22 = vadd.f32 %v1803_v52, %v730_v53  ;;  %v1805_v17 = vpop.f32.mrb[37].mxu0  ;;  %v1857_v55 = vadd.f32 %v1844_v44, %v803_v60  ;;  %v1846_v32 = vpop.f32.mrb[37].mxu1  ;;  %v1898_v53 = vmul.f32 0.0, %v4080_v54  ;;  %v6872_v54 = vld [vmem:[#allocation94_spill] sm:$0xff] }
 0x1f3   :  { %v1856_v5 = vadd.f32 %v1805_v17, %v766_v58  ;;  %v1807_v4 = vpop.f32.mrb[38].mxu0  ;;  %v1858_v48 = vadd.f32 %v1846_v32, %v839_v51  ;;  %v1848_v43 = vpop.f32.mrb[38].mxu1  ;;  %v6861_v32 = vld [vmem:[#allocation83_spill] sm:$0xff] }
 0x1f4   :  { %v3951_v10 = vmul.f32 -1.442695, %v1855_v22  ;;  %v1808_v61 = vpop.f32.mrb[39].mxu0  ;;  %4081 = vtanh.f32 %v1857_v55  ;;  %v1849_v14 = vpop.f32.mrb[39].mxu1  ;;  %v6862_v4 = vld [vmem:[#allocation84_spill] sm:$0xff]  ;;  %v6865_v43 = vld [vmem:[#allocation87_spill] sm:$0xff] }
 0x1f5   :  { %v3952_v28 = vmul.f32 -1.442695, %v1856_v5  ;;  %v6866_v61 = vld [vmem:[#allocation88_spill] sm:$0xff]  ;;  %v6868_v14 = vld [vmem:[#allocation90_spill] sm:$0xff] }
 0x1f6   :  { %4083 = vpow2.f32 %v3951_v10  ;;  %v6863_v10 = vld [vmem:[#allocation85_spill] sm:$0xff] }
 0x1f7   :  { %4085 = vpow2.f32 %v3952_v28  ;;  %v6867_v28 = vld [vmem:[#allocation89_spill] sm:$0xff] }
 0x1f8   :  { %4087 = vtanh.f32 %v1858_v48  ;;  %v6864_v48 = vld [vmem:[#allocation86_spill] sm:$0xff] }
 0x1fe   :  { %v4082_v29 = vpop.eup %4081 }
 0x1ff   :  { %v1899_v39 = vmul.f32 %v4082_v29, %v4074_v57  ;;  %v6869_v57 = vld [vmem:[#allocation91_spill] sm:$0xff] }
 0x200   :  { %v4084_v50 = vpop.eup %4083  ;;  %v6873_v29 = vld [vmem:[#allocation95_spill] sm:$0xff] }
 0x201   :  { %v4086_v16 = vpop.eup %4085  ;;  %v1881_v24 = vadd.f32 1.0, %v4084_v50  ;;  %v5301_v11 = vadd.f32 %v1899_v39, %v1897_v40  ;;  %v6874_v50 = vld [vmem:[#allocation96_spill] sm:$0xff]  ;;  %v6875_v40 = vld [vmem:[#allocation97_spill] sm:$0xff]  ;;  %v6876_v39 = vld [vmem:[#allocation98_spill] sm:$0xff] }
 0x202   :  { %v4088_v62 = vpop.eup %4087  ;;  %v1882_v6 = vadd.f32 1.0, %v4086_v16  ;;  %v6877_v16 = vld [vmem:[#allocation99_spill] sm:$0xff] }
 0x203   :  { %4089 = vrcp.f32 %v1881_v24  ;;  %v1900_v59 = vmul.f32 %v4088_v62, %v4078_v45  ;;  %v6871_v45 = vld [vmem:[#allocation93_spill] sm:$0xff]  ;;  %v6878_v24 = vld [vmem:[#allocation100_spill] sm:$0xff] }
 0x204   :  { %4091 = vtanh.f32 %v5301_v11  ;;  %v6879_v62 = vld [vmem:[#allocation101_spill] sm:$0xff] }
 0x205   :  { %4093 = vrcp.f32 %v1882_v6  ;;  %v5304_v60 = vadd.f32 %v1900_v59, %v1898_v53  ;;  %v6880_v6 = vld [vmem:[#allocation102_spill] sm:$0xff]  ;;  %v6881_v53 = vld [vmem:[#allocation103_spill] sm:$0xff]  ;;  %v6882_v59 = vld [vmem:[#allocation104_spill] sm:$0xff] }
 0x207   :  { %4095 = vtanh.f32 %v5304_v60 }
 0x20d   :  { %v4090_v58 = vpop.eup %4089 }
 0x20e   :  { %v4092_v52 = vpop.eup %4091 }
 0x20f   :  { %v4094_v51 = vpop.eup %4093  ;;  %v5307_v44 = vmul.f32 %v4092_v52, %v4090_v58  ;;  %v6883_v58 = vld [vmem:[#allocation105_spill] sm:$0xff]  ;;  %v6884_v52 = vld [vmem:[#allocation106_spill] sm:$0xff] }
 0x211   :  { %v4096_v22 = vpop.eup %4095  ;;  %6859 = vst [vmem:[#allocation201_spill] sm:$0xff] %v5307_v44  ;;  %v5315_v5 = vpack.c.bf16 %v5307_v44, %v5307_v44  ;;  %v6889_v44 = vld [vmem:[#allocation111_spill] sm:$0xff] }
 0x212   :  { %v5309_v17 = vmul.f32 %v4096_v22, %v4094_v51  ;;  %v6885_v51 = vld [vmem:[#allocation107_spill] sm:$0xff]  ;;  %v6886_v22 = vld [vmem:[#allocation108_spill] sm:$0xff] }
 0x214   :  { %6860 = vst [vmem:[#allocation202_spill] sm:$0xff] %v5309_v17  ;;  %v1922_v55 = vpack.c.bf16 %v5309_v17, %v5309_v17  ;;  %v6888_v17 = vld [vmem:[#allocation110_spill] sm:$0xff] }
 0x216   :  { %1955 = vmatprep.mubr.bf16.mxu0 %v1922_v55  ;;  %1996 = vmatprep.mubr.bf16.mxu1 %v1922_v55 }
 0x217   :  { %1956 = vmatmul.mubr.bf16.vlgmr.msra.gmra.mrb[40].mxu0 %v5315_v5  ;;  %1997 = vmatmul.mubr.bf16.vlgmr.msra.gmra.mrb[40].mxu1 %v5315_v5 }
 0x218   :  { %2006 = vmatpush1.bf16.msra.mxu0 %v6861_v32  ;;  %2047 = vmatpush1.bf16.msra.mxu1 %v6862_v4 }
 0x219   :  { %2037 = vmatprep.mubr.bf16.mxu0 %v1922_v55  ;;  %2078 = vmatprep.mubr.bf16.mxu1 %v1922_v55  ;;  %v6887_v55 = vld [vmem:[#allocation109_spill] sm:$0xff] }
 0x21a   :  { %2007 = vmatprep.subr.bf16.mxu0 %v6863_v10  ;;  %2048 = vmatprep.subr.bf16.mxu1 %v6864_v48 }
 0x21c   :  { %2008 = vmatpush1.bf16.msra.mxu0 %v6865_v43  ;;  %2049 = vmatpush1.bf16.msra.mxu1 %v6866_v61 }
 0x21d   :  { %2009 = vmatprep.subr.bf16.mxu0 %v6867_v28  ;;  %2050 = vmatprep.subr.bf16.mxu1 %v6868_v14 }
 0x220   :  { %2010 = vmatpush1.bf16.msra.mxu0 %v6869_v57  ;;  %2051 = vmatpush1.bf16.msra.mxu1 %v6870_v15 }
 0x221   :  { %2011 = vmatprep.subr.bf16.mxu0 %v6871_v45  ;;  %2052 = vmatprep.subr.bf16.mxu1 %v6872_v54 }
 0x224   :  { %2012 = vmatpush1.bf16.msra.mxu0 %v6873_v29  ;;  %2053 = vmatpush1.bf16.msra.mxu1 %v6874_v50 }
 0x225   :  { %2013 = vmatprep.subr.bf16.mxu0 %v6875_v40  ;;  %2054 = vmatprep.subr.bf16.mxu1 %v6876_v39 }
 0x228   :  { %2014 = vmatpush1.bf16.msra.mxu0 %v6877_v16  ;;  %2055 = vmatpush1.bf16.msra.mxu1 %v6878_v24 }
 0x229   :  { %2015 = vmatprep.subr.bf16.mxu0 %v6879_v62  ;;  %2056 = vmatprep.subr.bf16.mxu1 %v6880_v6  ;;  %v6890_v62 = vld [vmem:[#allocation112_spill] sm:$0xff]  ;;  %v6891_v6 = vld [vmem:[#allocation113_spill] sm:$0xff] }
 0x22c   :  { %2016 = vmatpush1.bf16.msra.mxu0 %v6881_v53  ;;  %2057 = vmatpush1.bf16.msra.mxu1 %v6882_v59  ;;  %v6892_v53 = vld [vmem:[#allocation114_spill] sm:$0xff]  ;;  %v6893_v59 = vld [vmem:[#allocation115_spill] sm:$0xff] }
 0x22d   :  { %2017 = vmatprep.subr.bf16.mxu0 %v6883_v58  ;;  %2058 = vmatprep.subr.bf16.mxu1 %v6884_v52  ;;  %v6894_v58 = vld [vmem:[#allocation116_spill] sm:$0xff]  ;;  %v6895_v52 = vld [vmem:[#allocation117_spill] sm:$0xff] }
 0x230   :  { %2018 = vmatpush1.bf16.msra.mxu0 %v6885_v51  ;;  %2059 = vmatpush1.bf16.msra.mxu1 %v6886_v22  ;;  %v6896_v51 = vld [vmem:[#allocation118_spill] sm:$0xff]  ;;  %v6897_v22 = vld [vmem:[#allocation119_spill] sm:$0xff] }
 0x231   :  { %2019 = vmatprep.subr.bf16.mxu0 %v6887_v55  ;;  %2060 = vmatprep.subr.bf16.mxu1 %v6888_v17  ;;  %v6898_v55 = vld [vmem:[#allocation120_spill] sm:$0xff]  ;;  %v6899_v17 = vld [vmem:[#allocation121_spill] sm:$0xff] }
 0x234   :  { %2020 = vmatpush1.bf16.msra.mxu0 %v6889_v44  ;;  %2061 = vmatpush1.bf16.msra.mxu1 %v6890_v62  ;;  %v6900_v44 = vld [vmem:[#allocation122_spill] sm:$0xff]  ;;  %v6901_v62 = vld [vmem:[#allocation123_spill] sm:$0xff] }
 0x235   :  { %2021 = vmatprep.subr.bf16.mxu0 %v6891_v6  ;;  %2062 = vmatprep.subr.bf16.mxu1 %v6892_v53  ;;  %v6902_v6 = vld [vmem:[#allocation124_spill] sm:$0xff]  ;;  %v6903_v53 = vld [vmem:[#allocation125_spill] sm:$0xff] }
 0x238   :  { %2022 = vmatpush1.bf16.msra.mxu0 %v6893_v59  ;;  %2063 = vmatpush1.bf16.msra.mxu1 %v6894_v58  ;;  %v6904_v59 = vld [vmem:[#allocation126_spill] sm:$0xff]  ;;  %v6905_v58 = vld [vmem:[#allocation127_spill] sm:$0xff] }
 0x239   :  { %2023 = vmatprep.subr.bf16.mxu0 %v6895_v52  ;;  %2064 = vmatprep.subr.bf16.mxu1 %v6896_v51  ;;  %v6906_v52 = vld [vmem:[#allocation128_spill] sm:$0xff]  ;;  %v6907_v51 = vld [vmem:[#allocation129_spill] sm:$0xff] }
 0x23c   :  { %2024 = vmatpush1.bf16.msra.mxu0 %v6897_v22  ;;  %2065 = vmatpush1.bf16.msra.mxu1 %v6898_v55  ;;  %v6908_v22 = vld [vmem:[#allocation130_spill] sm:$0xff] }
 0x23d   :  { %2025 = vmatprep.subr.bf16.mxu0 %v6899_v17  ;;  %2066 = vmatprep.subr.bf16.mxu1 %v6900_v44 }
 0x240   :  { %2026 = vmatpush1.bf16.msra.mxu0 %v6901_v62  ;;  %2067 = vmatpush1.bf16.msra.mxu1 %v6902_v6  ;;  %v6909_v62 = vld [vmem:[#allocation134_spill] sm:$0xff] }
 0x241   :  { %2027 = vmatprep.subr.bf16.mxu0 %v6903_v53  ;;  %2068 = vmatprep.subr.bf16.mxu1 %v6904_v59 }
 0x244   :  { %2028 = vmatpush1.bf16.msra.mxu0 %v6905_v58  ;;  %2069 = vmatpush1.bf16.msra.mxu1 %v6906_v52 }
 0x245   :  { %2029 = vmatprep.subr.bf16.mxu0 %v6907_v51  ;;  %2070 = vmatprep.subr.bf16.mxu1 %v6908_v22 }
 0x248   :  { %2030 = vmatpush1.bf16.msra.mxu0 %v4958_v3  ;;  %2071 = vmatpush1.bf16.msra.mxu1 %v4962_v7 }
 0x249   :  { %2031 = vmatprep.subr.bf16.mxu0 %v4964_v8  ;;  %2072 = vmatprep.subr.bf16.mxu1 %v6909_v62 }
 0x24c   :  { %2032 = vmatpush1.bf16.msra.mxu0 %v4970_v25  ;;  %2073 = vmatpush1.bf16.msra.mxu1 %v4974_v36 }
 0x24d   :  { %2033 = vmatprep.subr.bf16.mxu0 %v4976_v35  ;;  %2074 = vmatprep.subr.bf16.mxu1 %v4979_v0 }
 0x250   :  { %2034 = vmatpush1.bf16.msra.mxu0 %v4982_v1  ;;  %2075 = vmatpush1.bf16.msra.mxu1 %v4986_v56 }
 0x251   :  { %2035 = vmatprep.subr.bf16.mxu0 %v4988_v2  ;;  %2076 = vmatprep.subr.bf16.mxu1 %v4991_v23 }
 0x254   :  { %2036 = vmatpush1.bf16.msra.mxu0 %v4994_v9  ;;  %2077 = vmatpush1.bf16.msra.mxu1 %v4998_v63 }
 0x255   :  { %2161 = vmatprep.subr.bf16.mxu0 %v4597_v12  ;;  %2202 = vmatprep.subr.bf16.mxu1 %v4600_v13 }
 0x257   :  { %2038 = vmatmul.mubr.bf16.vlgmr.msra.gmra.mrb[44].mxu0 %v5315_v5  ;;  %2079 = vmatmul.mubr.bf16.vlgmr.msra.gmra.mrb[44].mxu1 %v5315_v5  ;;  %v6910_v5 = vld [vmem:[#allocation36_spill] sm:$0xff] }
 0x258   :  { %2162 = vmatpush1.bf16.msra.mxu0 %v4603_v18  ;;  %2203 = vmatpush1.bf16.msra.mxu1 %v4606_v19 }
 0x259   :  { %2163 = vmatprep.subr.bf16.mxu0 %v4608_v20  ;;  %2204 = vmatprep.subr.bf16.mxu1 %v4611_v21  ;;  %v6959_v21 = vld [vmem:[#allocation169_spill] sm:$0xff]  ;;  %v6960_v20 = vld [vmem:[#allocation170_spill] sm:$0xff] }
 0x25c   :  { %2164 = vmatpush1.bf16.msra.mxu0 %v4616_v26  ;;  %2205 = vmatpush1.bf16.msra.mxu1 %v4620_v30  ;;  %v6958_v30 = vld [vmem:[#allocation148_spill] sm:$0xff] }
 0x25d   :  { %2165 = vmatprep.subr.bf16.mxu0 %v4622_v31  ;;  %2206 = vmatprep.subr.bf16.mxu1 %v4625_v33  ;;  %v6911_v33 = vld [vmem:[#allocation37_spill] sm:$0xff]  ;;  %v6957_v31 = vld [vmem:[#allocation147_spill] sm:$0xff] }
 0x260   :  { %2166 = vmatpush1.bf16.msra.mxu0 %v4630_v34  ;;  %2207 = vmatpush1.bf16.msra.mxu1 %v4634_v37  ;;  %v6912_v34 = vld [vmem:[#allocation38_spill] sm:$0xff]  ;;  %v6913_v37 = vld [vmem:[#allocation39_spill] sm:$0xff] }
 0x261   :  { %2167 = vmatprep.subr.bf16.mxu0 %v4636_v38  ;;  %2208 = vmatprep.subr.bf16.mxu1 %v4639_v41  ;;  %v6914_v38 = vld [vmem:[#allocation40_spill] sm:$0xff]  ;;  %v6915_v41 = vld [vmem:[#allocation41_spill] sm:$0xff] }
 0x264   :  { %2168 = vmatpush1.bf16.msra.mxu0 %v4643_v42  ;;  %2209 = vmatpush1.bf16.msra.mxu1 %v4648_v46  ;;  %v6916_v42 = vld [vmem:[#allocation42_spill] sm:$0xff]  ;;  %v6917_v46 = vld [vmem:[#allocation43_spill] sm:$0xff] }
 0x265   :  { %2169 = vmatprep.subr.bf16.mxu0 %v4650_v47  ;;  %2210 = vmatprep.subr.bf16.mxu1 %v4653_v49  ;;  %v6918_v47 = vld [vmem:[#allocation44_spill] sm:$0xff]  ;;  %v6919_v49 = vld [vmem:[#allocation45_spill] sm:$0xff] }
 0x268   :  { %2170 = vmatpush1.bf16.msra.mxu0 %v4658_v27  ;;  %2211 = vmatpush1.bf16.msra.mxu1 %v6910_v5  ;;  %v6920_v27 = vld [vmem:[#allocation46_spill] sm:$0xff]  ;;  %v6921_v5 = vld [vmem:[#allocation47_spill] sm:$0xff] }
 0x269   :  { %2171 = vmatprep.subr.bf16.mxu0 %v6911_v33  ;;  %2212 = vmatprep.subr.bf16.mxu1 %v6912_v34  ;;  %v6922_v33 = vld [vmem:[#allocation48_spill] sm:$0xff]  ;;  %v6923_v34 = vld [vmem:[#allocation49_spill] sm:$0xff] }
 0x26c   :  { %2172 = vmatpush1.bf16.msra.mxu0 %v6913_v37  ;;  %2213 = vmatpush1.bf16.msra.mxu1 %v6914_v38  ;;  %v6924_v37 = vld [vmem:[#allocation50_spill] sm:$0xff]  ;;  %v6925_v38 = vld [vmem:[#allocation51_spill] sm:$0xff] }
 0x26d   :  { %2173 = vmatprep.subr.bf16.mxu0 %v6915_v41  ;;  %2214 = vmatprep.subr.bf16.mxu1 %v6916_v42  ;;  %v6926_v41 = vld [vmem:[#allocation52_spill] sm:$0xff]  ;;  %v6927_v42 = vld [vmem:[#allocation53_spill] sm:$0xff] }
 0x270   :  { %2174 = vmatpush1.bf16.msra.mxu0 %v6917_v46  ;;  %2215 = vmatpush1.bf16.msra.mxu1 %v6918_v47  ;;  %v6928_v46 = vld [vmem:[#allocation54_spill] sm:$0xff]  ;;  %v6929_v47 = vld [vmem:[#allocation55_spill] sm:$0xff] }
 0x271   :  { %2175 = vmatprep.subr.bf16.mxu0 %v6919_v49  ;;  %2216 = vmatprep.subr.bf16.mxu1 %v6920_v27  ;;  %v6930_v49 = vld [vmem:[#allocation56_spill] sm:$0xff]  ;;  %v6931_v27 = vld [vmem:[#allocation57_spill] sm:$0xff] }
 0x274   :  { %2176 = vmatpush1.bf16.msra.mxu0 %v6921_v5  ;;  %2217 = vmatpush1.bf16.msra.mxu1 %v6922_v33  ;;  %v6932_v5 = vld [vmem:[#allocation58_spill] sm:$0xff]  ;;  %v6933_v33 = vld [vmem:[#allocation59_spill] sm:$0xff] }
 0x275   :  { %2177 = vmatprep.subr.bf16.mxu0 %v6923_v34  ;;  %2218 = vmatprep.subr.bf16.mxu1 %v6924_v37  ;;  %v6934_v34 = vld [vmem:[#allocation60_spill] sm:$0xff]  ;;  %v6935_v37 = vld [vmem:[#allocation61_spill] sm:$0xff] }
 0x278   :  { %2178 = vmatpush1.bf16.msra.mxu0 %v6925_v38  ;;  %2219 = vmatpush1.bf16.msra.mxu1 %v6926_v41  ;;  %v6936_v38 = vld [vmem:[#allocation62_spill] sm:$0xff]  ;;  %v6937_v41 = vld [vmem:[#allocation63_spill] sm:$0xff] }
 0x279   :  { %2179 = vmatprep.subr.bf16.mxu0 %v6927_v42  ;;  %2220 = vmatprep.subr.bf16.mxu1 %v6928_v46  ;;  %v6938_v42 = vld [vmem:[#allocation64_spill] sm:$0xff]  ;;  %v6939_v46 = vld [vmem:[#allocation65_spill] sm:$0xff] }
 0x27c   :  { %2180 = vmatpush1.bf16.msra.mxu0 %v6929_v47  ;;  %2221 = vmatpush1.bf16.msra.mxu1 %v6930_v49  ;;  %v6940_v47 = vld [vmem:[#allocation66_spill] sm:$0xff]  ;;  %v6941_v49 = vld [vmem:[#allocation67_spill] sm:$0xff] }
 0x27d   :  { %2181 = vmatprep.subr.bf16.mxu0 %v6931_v27  ;;  %2222 = vmatprep.subr.bf16.mxu1 %v6932_v5  ;;  %v6942_v27 = vld [vmem:[#allocation68_spill] sm:$0xff]  ;;  %v6943_v5 = vld [vmem:[#allocation69_spill] sm:$0xff] }
 0x280   :  { %2182 = vmatpush1.bf16.msra.mxu0 %v6933_v33  ;;  %2223 = vmatpush1.bf16.msra.mxu1 %v6934_v34  ;;  %v6944_v33 = vld [vmem:[#allocation70_spill] sm:$0xff]  ;;  %v6945_v34 = vld [vmem:[#allocation71_spill] sm:$0xff] }
 0x281   :  { %2183 = vmatprep.subr.bf16.mxu0 %v6935_v37  ;;  %2224 = vmatprep.subr.bf16.mxu1 %v6936_v38  ;;  %v6946_v37 = vld [vmem:[#allocation72_spill] sm:$0xff]  ;;  %v6947_v38 = vld [vmem:[#allocation73_spill] sm:$0xff] }
 0x284   :  { %2184 = vmatpush1.bf16.msra.mxu0 %v6937_v41  ;;  %2225 = vmatpush1.bf16.msra.mxu1 %v6938_v42  ;;  %v6948_v41 = vld [vmem:[#allocation74_spill] sm:$0xff]  ;;  %v6949_v42 = vld [vmem:[#allocation75_spill] sm:$0xff] }
 0x285   :  { %2185 = vmatprep.subr.bf16.mxu0 %v6939_v46  ;;  %2226 = vmatprep.subr.bf16.mxu1 %v6940_v47  ;;  %v6950_v46 = vld [vmem:[#allocation76_spill] sm:$0xff]  ;;  %v6951_v47 = vld [vmem:[#allocation77_spill] sm:$0xff] }
 0x288   :  { %2186 = vmatpush1.bf16.msra.mxu0 %v6941_v49  ;;  %2227 = vmatpush1.bf16.msra.mxu1 %v6942_v27  ;;  %v6952_v49 = vld [vmem:[#allocation78_spill] sm:$0xff]  ;;  %v6953_v27 = vld [vmem:[#allocation79_spill] sm:$0xff] }
 0x289   :  { %2187 = vmatprep.subr.bf16.mxu0 %v6943_v5  ;;  %2228 = vmatprep.subr.bf16.mxu1 %v6944_v33  ;;  %v6954_v5 = vld [vmem:[#allocation80_spill] sm:$0xff]  ;;  %v6955_v33 = vld [vmem:[#allocation81_spill] sm:$0xff] }
 0x28c   :  { %2188 = vmatpush1.bf16.msra.mxu0 %v6945_v34  ;;  %2229 = vmatpush1.bf16.msra.mxu1 %v6946_v37  ;;  %v6956_v34 = vld [vmem:[#allocation82_spill] sm:$0xff] }
 0x28d   :  { %2189 = vmatprep.subr.bf16.mxu0 %v6947_v38  ;;  %2230 = vmatprep.subr.bf16.mxu1 %v6948_v41 }
 0x290   :  { %2190 = vmatpush1.bf16.msra.mxu0 %v6949_v42  ;;  %2231 = vmatpush1.bf16.msra.mxu1 %v6950_v46 }
 0x291   :  { %2191 = vmatprep.subr.bf16.mxu0 %v6951_v47  ;;  %2232 = vmatprep.subr.bf16.mxu1 %v6952_v49 }
 0x294   :  { %2192 = vmatpush1.bf16.msra.mxu0 %v6953_v27  ;;  %2233 = vmatpush1.bf16.msra.mxu1 %v6954_v5 }
 0x295   :  { %2243 = vmatprep.subr.bf16.mxu0 %v6955_v33  ;;  %2284 = vmatprep.subr.bf16.mxu1 %v6956_v34 }
 0x2ea   :  { %v1957_v37 = vpop.f32.mrb[40].mxu0  ;;  %v1998_v38 = vpop.f32.mrb[40].mxu1 }
 0x2eb   :  { %v2087_v41 = vadd.f32 %v1957_v37, %v6957_v31  ;;  %v2089_v42 = vadd.f32 %v1998_v38, %v6958_v30  ;;  %v1959_v26 = vpop.f32.mrb[41].mxu0  ;;  %v2000_v46 = vpop.f32.mrb[41].mxu1 }
 0x2ec   :  { %v2088_v47 = vadd.f32 %v1959_v26, %v6959_v21  ;;  %v2090_v49 = vadd.f32 %v2000_v46, %v6960_v20  ;;  %v1961_v19 = vpop.f32.mrb[42].mxu0  ;;  %v2002_v27 = vpop.f32.mrb[42].mxu1  ;;  %v6962_v46 = vld [vmem:[#allocation176_spill] sm:$0xff] }
 0x2ed   :  { %v1962_v18 = vpop.f32.mrb[43].mxu0  ;;  %v2003_v5 = vpop.f32.mrb[43].mxu1  ;;  %v3953_v13 = vmul.f32 -1.442695, %v2087_v41  ;;  %v3955_v33 = vmul.f32 -1.442695, %v2089_v42 }
 0x2ee   :  { %v3954_v12 = vmul.f32 -1.442695, %v2088_v47  ;;  %v3956_v34 = vmul.f32 -1.442695, %v2090_v49  ;;  %v6961_v41 = vld [vmem:[#allocation175_spill] sm:$0xff]  ;;  %v6964_v49 = vld [vmem:[#allocation198_spill] sm:$0xff] }
 0x2ef   :  { %4097 = vpow2.f32 %v3953_v13 }
 0x2f0   :  { %4099 = vpow2.f32 %v3955_v33 }
 0x2f1   :  { %4101 = vpow2.f32 %v3954_v12 }
 0x2f2   :  { %4103 = vpow2.f32 %v3956_v34  ;;  %v6963_v34 = vld [vmem:[#allocation197_spill] sm:$0xff] }
 0x2f9   :  { %v4098_v31 = vpop.eup %4097 }
 0x2fa   :  { %v4100_v30 = vpop.eup %4099  ;;  %v2113_v63 = vadd.f32 1.0, %v4098_v31 }
 0x2fb   :  { %v4102_v37 = vpop.eup %4101  ;;  %v2115_v21 = vadd.f32 1.0, %v4100_v30 }
 0x2fc   :  { %v4104_v38 = vpop.eup %4103  ;;  %v2114_v26 = vadd.f32 1.0, %v4102_v37  ;;  %4105 = vrcp.f32 %v2113_v63 }
 0x2fd   :  { %v2116_v20 = vadd.f32 1.0, %v4104_v38  ;;  %4107 = vrcp.f32 %v2115_v21 }
 0x2fe   :  { %4109 = vrcp.f32 %v2114_v26 }
 0x2ff   :  { %4111 = vrcp.f32 %v2116_v20 }
 0x306   :  { %v4106_v21 = vpop.eup %4105 }
 0x307   :  { %v4108_v26 = vpop.eup %4107 }
 0x32a   :  { %v2039_v18 = vpop.f32.mrb[44].mxu0  ;;  %v2080_v19 = vpop.f32.mrb[44].mxu1 }
 0x32b   :  { %v2091_v42 = vadd.f32 %v2039_v18, %v6961_v41  ;;  %v2093_v13 = vadd.f32 %v2080_v19, %v6962_v46  ;;  %v2041_v33 = vpop.f32.mrb[45].mxu0  ;;  %v2082_v12 = vpop.f32.mrb[45].mxu1  ;;  %v2133_v46 = vmul.f32 %v4108_v26, %v5301_v11  ;;  %v6965_v26 = vld [vmem:[#allocation101_spill] sm:$0xff] }
 0x32c   :  { %v2092_v47 = vadd.f32 %v2041_v33, %v6963_v34  ;;  %v2094_v27 = vadd.f32 %v2082_v12, %v6964_v49  ;;  %v2043_v5 = vpop.f32.mrb[46].mxu0  ;;  %v2084_v31 = vpop.f32.mrb[46].mxu1 }
 0x32d   :  { %v3957_v30 = vmul.f32 -1.442695, %v2091_v42  ;;  %4113 = vtanh.f32 %v2093_v13  ;;  %v2044_v63 = vpop.f32.mrb[47].mxu0  ;;  %v2085_v37 = vpop.f32.mrb[47].mxu1 }
 0x32e   :  { %v3958_v38 = vmul.f32 -1.442695, %v2092_v47  ;;  %4115 = vtanh.f32 %v2094_v27  ;;  %v4110_v18 = vpop.eup %4109 }
 0x32f   :  { %4117 = vpow2.f32 %v3957_v30  ;;  %v4112_v19 = vpop.eup %4111 }
 0x330   :  { %4119 = vpow2.f32 %v3958_v38  ;;  %v2134_v34 = vmul.f32 %v4112_v19, %v5304_v60  ;;  %v6967_v19 = vld [vmem:[#allocation103_spill] sm:$0xff] }
 0x337   :  { %v4114_v41 = vpop.eup %4113 }
 0x338   :  { %v4116_v20 = vpop.eup %4115  ;;  %v2135_v33 = vmul.f32 %v4114_v41, %v4106_v21  ;;  %v6968_v41 = vld [vmem:[#allocation104_spill] sm:$0xff] }
 0x339   :  { %v4118_v12 = vpop.eup %4117  ;;  %v2136_v42 = vmul.f32 %v4116_v20, %v4110_v18  ;;  %v6966_v18 = vld [vmem:[#allocation102_spill] sm:$0xff]  ;;  %v6969_v20 = vld [vmem:[#allocation105_spill] sm:$0xff] }
 0x33a   :  { %v4120_v13 = vpop.eup %4119  ;;  %v2117_v49 = vadd.f32 1.0, %v4118_v12  ;;  %v5459_v5 = vadd.f32 %v2135_v33, %v2133_v46  ;;  %v6970_v46 = vld [vmem:[#allocation106_spill] sm:$0xff]  ;;  %v6971_v33 = vld [vmem:[#allocation107_spill] sm:$0xff]  ;;  %v6972_v12 = vld [vmem:[#allocation108_spill] sm:$0xff] }
 0x33b   :  { %v2118_v47 = vadd.f32 1.0, %v4120_v13  ;;  %v5461_v27 = vadd.f32 %v2136_v42, %v2134_v34  ;;  %v6973_v34 = vld [vmem:[#allocation109_spill] sm:$0xff]  ;;  %v6974_v42 = vld [vmem:[#allocation110_spill] sm:$0xff]  ;;  %v6975_v13 = vld [vmem:[#allocation111_spill] sm:$0xff] }
 0x33c   :  { %4121 = vrcp.f32 %v2117_v49  ;;  %v6976_v49 = vld [vmem:[#allocation112_spill] sm:$0xff] }
 0x33d   :  { %4123 = vtanh.f32 %v5459_v5 }
 0x33e   :  { %4125 = vrcp.f32 %v2118_v47  ;;  %v6977_v47 = vld [vmem:[#allocation113_spill] sm:$0xff] }
 0x33f   :  { %4127 = vtanh.f32 %v5461_v27 }
 0x346   :  { %v4122_v31 = vpop.eup %4121 }
 0x347   :  { %v4124_v11 = vpop.eup %4123 }
 0x348   :  { %v4126_v30 = vpop.eup %4125  ;;  %v5465_v37 = vmul.f32 %v4124_v11, %v4122_v31  ;;  %v6978_v31 = vld [vmem:[#allocation114_spill] sm:$0xff]  ;;  %v6979_v11 = vld [vmem:[#allocation115_spill] sm:$0xff] }
 0x349   :  { %v4128_v63 = vpop.eup %4127 }
 0x34a   :  { %v5467_v60 = vmul.f32 %v4128_v63, %v4126_v30  ;;  %v5473_v21 = vpack.c.bf16 %v5465_v37, %v5465_v37  ;;  %v6980_v30 = vld [vmem:[#allocation116_spill] sm:$0xff]  ;;  %v6981_v63 = vld [vmem:[#allocation117_spill] sm:$0xff] }
 0x34c   :  { %v2160_v38 = vpack.c.bf16 %v5467_v60, %v5467_v60 }
 0x34e   :  { %2193 = vmatprep.mubr.bf16.mxu0 %v2160_v38  ;;  %2234 = vmatprep.mubr.bf16.mxu1 %v2160_v38 }
 0x34f   :  { %2194 = vmatmul.mubr.bf16.vlgmr.msra.gmra.mrb[48].mxu0 %v5473_v21  ;;  %2235 = vmatmul.mubr.bf16.vlgmr.msra.gmra.mrb[48].mxu1 %v5473_v21 }
 0x350   :  { %2244 = vmatpush1.bf16.msra.mxu0 %v6861_v32  ;;  %2285 = vmatpush1.bf16.msra.mxu1 %v6862_v4 }
 0x351   :  { %2275 = vmatprep.mubr.bf16.mxu0 %v2160_v38  ;;  %2316 = vmatprep.mubr.bf16.mxu1 %v2160_v38  ;;  %v6982_v38 = vld [vmem:[#allocation118_spill] sm:$0xff] }
 0x352   :  { %2245 = vmatprep.subr.bf16.mxu0 %v6863_v10  ;;  %2286 = vmatprep.subr.bf16.mxu1 %v6864_v48 }
 0x354   :  { %2246 = vmatpush1.bf16.msra.mxu0 %v6865_v43  ;;  %2287 = vmatpush1.bf16.msra.mxu1 %v6866_v61 }
 0x355   :  { %2247 = vmatprep.subr.bf16.mxu0 %v6867_v28  ;;  %2288 = vmatprep.subr.bf16.mxu1 %v6868_v14 }
 0x358   :  { %2248 = vmatpush1.bf16.msra.mxu0 %v6869_v57  ;;  %2289 = vmatpush1.bf16.msra.mxu1 %v6870_v15 }
 0x359   :  { %2249 = vmatprep.subr.bf16.mxu0 %v6871_v45  ;;  %2290 = vmatprep.subr.bf16.mxu1 %v6872_v54 }
 0x35c   :  { %2250 = vmatpush1.bf16.msra.mxu0 %v6873_v29  ;;  %2291 = vmatpush1.bf16.msra.mxu1 %v6874_v50 }
 0x35d   :  { %2251 = vmatprep.subr.bf16.mxu0 %v6875_v40  ;;  %2292 = vmatprep.subr.bf16.mxu1 %v6876_v39 }
 0x360   :  { %2252 = vmatpush1.bf16.msra.mxu0 %v6877_v16  ;;  %2293 = vmatpush1.bf16.msra.mxu1 %v6878_v24 }
 0x361   :  { %2253 = vmatprep.subr.bf16.mxu0 %v6965_v26  ;;  %2294 = vmatprep.subr.bf16.mxu1 %v6966_v18 }
 0x364   :  { %2254 = vmatpush1.bf16.msra.mxu0 %v6967_v19  ;;  %2295 = vmatpush1.bf16.msra.mxu1 %v6968_v41 }
 0x365   :  { %2255 = vmatprep.subr.bf16.mxu0 %v6969_v20  ;;  %2296 = vmatprep.subr.bf16.mxu1 %v6970_v46 }
 0x368   :  { %2256 = vmatpush1.bf16.msra.mxu0 %v6971_v33  ;;  %2297 = vmatpush1.bf16.msra.mxu1 %v6972_v12  ;;  %v6983_v12 = vld [vmem:[#allocation119_spill] sm:$0xff] }
 0x369   :  { %2257 = vmatprep.subr.bf16.mxu0 %v6973_v34  ;;  %2298 = vmatprep.subr.bf16.mxu1 %v6974_v42 }
 0x36c   :  { %2258 = vmatpush1.bf16.msra.mxu0 %v6975_v13  ;;  %2299 = vmatpush1.bf16.msra.mxu1 %v6976_v49  ;;  %v6984_v49 = vld [vmem:[#allocation123_spill] sm:$0xff] }
 0x36d   :  { %2259 = vmatprep.subr.bf16.mxu0 %v6977_v47  ;;  %2300 = vmatprep.subr.bf16.mxu1 %v6978_v31 }
 0x370   :  { %2260 = vmatpush1.bf16.msra.mxu0 %v6979_v11  ;;  %2301 = vmatpush1.bf16.msra.mxu1 %v6980_v30 }
 0x371   :  { %2261 = vmatprep.subr.bf16.mxu0 %v6981_v63  ;;  %2302 = vmatprep.subr.bf16.mxu1 %v6982_v38 }
 0x374   :  { %2262 = vmatpush1.bf16.msra.mxu0 %v6983_v12  ;;  %2303 = vmatpush1.bf16.msra.mxu1 %v6898_v55 }
 0x375   :  { %2263 = vmatprep.subr.bf16.mxu0 %v6899_v17  ;;  %2304 = vmatprep.subr.bf16.mxu1 %v6900_v44 }
 0x378   :  { %2264 = vmatpush1.bf16.msra.mxu0 %v6984_v49  ;;  %2305 = vmatpush1.bf16.msra.mxu1 %v6902_v6 }
 0x379   :  { %2265 = vmatprep.subr.bf16.mxu0 %v6903_v53  ;;  %2306 = vmatprep.subr.bf16.mxu1 %v6904_v59 }
 0x37c   :  { %2266 = vmatpush1.bf16.msra.mxu0 %v6905_v58  ;;  %2307 = vmatpush1.bf16.msra.mxu1 %v6906_v52 }
 0x37d   :  { %2267 = vmatprep.subr.bf16.mxu0 %v6907_v51  ;;  %2308 = vmatprep.subr.bf16.mxu1 %v6908_v22  ;;  %v7054_v22 = vld [vmem:[#allocation165_spill] sm:$0xff]  ;;  %v7055_v51 = vld [vmem:[#allocation166_spill] sm:$0xff] }
 0x380   :  { %2268 = vmatpush1.bf16.msra.mxu0 %v4958_v3  ;;  %2309 = vmatpush1.bf16.msra.mxu1 %v4962_v7  ;;  %v7053_v7 = vld [vmem:[#allocation152_spill] sm:$0xff] }
 0x381   :  { %2269 = vmatprep.subr.bf16.mxu0 %v4964_v8  ;;  %2310 = vmatprep.subr.bf16.mxu1 %v6909_v62  ;;  %v6985_v8 = vld [vmem:[#allocation144_spill] sm:$0xff]  ;;  %v6986_v62 = vld [vmem:[#allocation17_spill] sm:$0xff] }
 0x384   :  { %2270 = vmatpush1.bf16.msra.mxu0 %v4970_v25  ;;  %2311 = vmatpush1.bf16.msra.mxu1 %v4974_v36  ;;  %v6987_v25 = vld [vmem:[#allocation18_spill] sm:$0xff]  ;;  %v7052_v36 = vld [vmem:[#allocation151_spill] sm:$0xff] }
 0x385   :  { %2271 = vmatprep.subr.bf16.mxu0 %v4976_v35  ;;  %2312 = vmatprep.subr.bf16.mxu1 %v4979_v0  ;;  %v6988_v0 = vld [vmem:[#allocation19_spill] sm:$0xff]  ;;  %v6997_v35 = vld [vmem:[#allocation28_spill] sm:$0xff] }
 0x388   :  { %2272 = vmatpush1.bf16.msra.mxu0 %v4982_v1  ;;  %2313 = vmatpush1.bf16.msra.mxu1 %v4986_v56  ;;  %v6989_v1 = vld [vmem:[#allocation20_spill] sm:$0xff]  ;;  %v6990_v56 = vld [vmem:[#allocation21_spill] sm:$0xff] }
 0x389   :  { %2273 = vmatprep.subr.bf16.mxu0 %v4988_v2  ;;  %2314 = vmatprep.subr.bf16.mxu1 %v4991_v23  ;;  %v6991_v2 = vld [vmem:[#allocation22_spill] sm:$0xff]  ;;  %v6992_v23 = vld [vmem:[#allocation23_spill] sm:$0xff] }
 0x38c   :  { %2274 = vmatpush1.bf16.msra.mxu0 %v4994_v9  ;;  %2315 = vmatpush1.bf16.msra.mxu1 %v6985_v8  ;;  %v6993_v9 = vld [vmem:[#allocation24_spill] sm:$0xff]  ;;  %v6994_v8 = vld [vmem:[#allocation25_spill] sm:$0xff] }
 0x38d   :  { %2399 = vmatprep.subr.bf16.mxu0 %v6986_v62  ;;  %2440 = vmatprep.subr.bf16.mxu1 %v6987_v25  ;;  %v6995_v62 = vld [vmem:[#allocation26_spill] sm:$0xff]  ;;  %v6996_v25 = vld [vmem:[#allocation27_spill] sm:$0xff] }
 0x38f   :  { %2276 = vmatmul.mubr.bf16.vlgmr.msra.gmra.mrb[52].mxu0 %v5473_v21  ;;  %2317 = vmatmul.mubr.bf16.vlgmr.msra.gmra.mrb[52].mxu1 %v5473_v21  ;;  %v6998_v21 = vld [vmem:[#allocation29_spill] sm:$0xff] }
 0x390   :  { %2400 = vmatpush1.bf16.msra.mxu0 %v6988_v0  ;;  %2441 = vmatpush1.bf16.msra.mxu1 %v6989_v1  ;;  %v6999_v0 = vld [vmem:[#allocation30_spill] sm:$0xff]  ;;  %v7000_v1 = vld [vmem:[#allocation31_spill] sm:$0xff] }
 0x391   :  { %2401 = vmatprep.subr.bf16.mxu0 %v6990_v56  ;;  %2442 = vmatprep.subr.bf16.mxu1 %v6991_v2  ;;  %v7001_v56 = vld [vmem:[#allocation32_spill] sm:$0xff]  ;;  %v7002_v2 = vld [vmem:[#allocation33_spill] sm:$0xff] }
 0x394   :  { %2402 = vmatpush1.bf16.msra.mxu0 %v6992_v23  ;;  %2443 = vmatpush1.bf16.msra.mxu1 %v6993_v9  ;;  %v7003_v23 = vld [vmem:[#allocation34_spill] sm:$0xff]  ;;  %v7004_v9 = vld [vmem:[#allocation35_spill] sm:$0xff] }
 0x395   :  { %2403 = vmatprep.subr.bf16.mxu0 %v6994_v8  ;;  %2444 = vmatprep.subr.bf16.mxu1 %v6995_v62  ;;  %v7005_v8 = vld [vmem:[#allocation36_spill] sm:$0xff]  ;;  %v7006_v62 = vld [vmem:[#allocation37_spill] sm:$0xff] }
 0x398   :  { %2404 = vmatpush1.bf16.msra.mxu0 %v6996_v25  ;;  %2445 = vmatpush1.bf16.msra.mxu1 %v6997_v35  ;;  %v7007_v25 = vld [vmem:[#allocation38_spill] sm:$0xff]  ;;  %v7008_v35 = vld [vmem:[#allocation39_spill] sm:$0xff] }
 0x399   :  { %2405 = vmatprep.subr.bf16.mxu0 %v6998_v21  ;;  %2446 = vmatprep.subr.bf16.mxu1 %v6999_v0  ;;  %v7009_v21 = vld [vmem:[#allocation40_spill] sm:$0xff]  ;;  %v7010_v0 = vld [vmem:[#allocation41_spill] sm:$0xff] }
 0x39c   :  { %2406 = vmatpush1.bf16.msra.mxu0 %v7000_v1  ;;  %2447 = vmatpush1.bf16.msra.mxu1 %v7001_v56  ;;  %v7011_v1 = vld [vmem:[#allocation42_spill] sm:$0xff]  ;;  %v7012_v56 = vld [vmem:[#allocation43_spill] sm:$0xff] }
 0x39d   :  { %2407 = vmatprep.subr.bf16.mxu0 %v7002_v2  ;;  %2448 = vmatprep.subr.bf16.mxu1 %v7003_v23  ;;  %v7013_v2 = vld [vmem:[#allocation44_spill] sm:$0xff]  ;;  %v7014_v23 = vld [vmem:[#allocation45_spill] sm:$0xff] }
 0x3a0   :  { %2408 = vmatpush1.bf16.msra.mxu0 %v7004_v9  ;;  %2449 = vmatpush1.bf16.msra.mxu1 %v7005_v8  ;;  %v7015_v9 = vld [vmem:[#allocation46_spill] sm:$0xff]  ;;  %v7016_v8 = vld [vmem:[#allocation47_spill] sm:$0xff] }
 0x3a1   :  { %2409 = vmatprep.subr.bf16.mxu0 %v7006_v62  ;;  %2450 = vmatprep.subr.bf16.mxu1 %v7007_v25  ;;  %v7017_v62 = vld [vmem:[#allocation48_spill] sm:$0xff]  ;;  %v7018_v25 = vld [vmem:[#allocation49_spill] sm:$0xff] }
 0x3a4   :  { %2410 = vmatpush1.bf16.msra.mxu0 %v7008_v35  ;;  %2451 = vmatpush1.bf16.msra.mxu1 %v7009_v21  ;;  %v7019_v35 = vld [vmem:[#allocation50_spill] sm:$0xff]  ;;  %v7020_v21 = vld [vmem:[#allocation51_spill] sm:$0xff] }
 0x3a5   :  { %2411 = vmatprep.subr.bf16.mxu0 %v7010_v0  ;;  %2452 = vmatprep.subr.bf16.mxu1 %v7011_v1  ;;  %v7021_v0 = vld [vmem:[#allocation52_spill] sm:$0xff]  ;;  %v7022_v1 = vld [vmem:[#allocation53_spill] sm:$0xff] }
 0x3a8   :  { %2412 = vmatpush1.bf16.msra.mxu0 %v7012_v56  ;;  %2453 = vmatpush1.bf16.msra.mxu1 %v7013_v2  ;;  %v7023_v56 = vld [vmem:[#allocation54_spill] sm:$0xff]  ;;  %v7024_v2 = vld [vmem:[#allocation55_spill] sm:$0xff] }
 0x3a9   :  { %2413 = vmatprep.subr.bf16.mxu0 %v7014_v23  ;;  %2454 = vmatprep.subr.bf16.mxu1 %v7015_v9  ;;  %v7025_v23 = vld [vmem:[#allocation56_spill] sm:$0xff]  ;;  %v7026_v9 = vld [vmem:[#allocation57_spill] sm:$0xff] }
 0x3ac   :  { %2414 = vmatpush1.bf16.msra.mxu0 %v7016_v8  ;;  %2455 = vmatpush1.bf16.msra.mxu1 %v7017_v62  ;;  %v7027_v8 = vld [vmem:[#allocation58_spill] sm:$0xff]  ;;  %v7028_v62 = vld [vmem:[#allocation59_spill] sm:$0xff] }
 0x3ad   :  { %2415 = vmatprep.subr.bf16.mxu0 %v7018_v25  ;;  %2456 = vmatprep.subr.bf16.mxu1 %v7019_v35  ;;  %v7029_v25 = vld [vmem:[#allocation60_spill] sm:$0xff]  ;;  %v7030_v35 = vld [vmem:[#allocation61_spill] sm:$0xff] }
 0x3b0   :  { %2416 = vmatpush1.bf16.msra.mxu0 %v7020_v21  ;;  %2457 = vmatpush1.bf16.msra.mxu1 %v7021_v0  ;;  %v7031_v21 = vld [vmem:[#allocation62_spill] sm:$0xff]  ;;  %v7032_v0 = vld [vmem:[#allocation63_spill] sm:$0xff] }
 0x3b1   :  { %2417 = vmatprep.subr.bf16.mxu0 %v7022_v1  ;;  %2458 = vmatprep.subr.bf16.mxu1 %v7023_v56  ;;  %v7033_v1 = vld [vmem:[#allocation64_spill] sm:$0xff]  ;;  %v7034_v56 = vld [vmem:[#allocation65_spill] sm:$0xff] }
 0x3b4   :  { %2418 = vmatpush1.bf16.msra.mxu0 %v7024_v2  ;;  %2459 = vmatpush1.bf16.msra.mxu1 %v7025_v23  ;;  %v7035_v2 = vld [vmem:[#allocation66_spill] sm:$0xff]  ;;  %v7036_v23 = vld [vmem:[#allocation67_spill] sm:$0xff] }
 0x3b5   :  { %2419 = vmatprep.subr.bf16.mxu0 %v7026_v9  ;;  %2460 = vmatprep.subr.bf16.mxu1 %v7027_v8  ;;  %v7037_v9 = vld [vmem:[#allocation68_spill] sm:$0xff]  ;;  %v7038_v8 = vld [vmem:[#allocation69_spill] sm:$0xff] }
 0x3b8   :  { %2420 = vmatpush1.bf16.msra.mxu0 %v7028_v62  ;;  %2461 = vmatpush1.bf16.msra.mxu1 %v7029_v25  ;;  %v7039_v62 = vld [vmem:[#allocation70_spill] sm:$0xff]  ;;  %v7040_v25 = vld [vmem:[#allocation71_spill] sm:$0xff] }
 0x3b9   :  { %2421 = vmatprep.subr.bf16.mxu0 %v7030_v35  ;;  %2462 = vmatprep.subr.bf16.mxu1 %v7031_v21  ;;  %v7041_v35 = vld [vmem:[#allocation72_spill] sm:$0xff]  ;;  %v7042_v21 = vld [vmem:[#allocation73_spill] sm:$0xff] }
 0x3bc   :  { %2422 = vmatpush1.bf16.msra.mxu0 %v7032_v0  ;;  %2463 = vmatpush1.bf16.msra.mxu1 %v7033_v1  ;;  %v7043_v0 = vld [vmem:[#allocation74_spill] sm:$0xff]  ;;  %v7044_v1 = vld [vmem:[#allocation75_spill] sm:$0xff] }
 0x3bd   :  { %2423 = vmatprep.subr.bf16.mxu0 %v7034_v56  ;;  %2464 = vmatprep.subr.bf16.mxu1 %v7035_v2  ;;  %v7045_v56 = vld [vmem:[#allocation76_spill] sm:$0xff]  ;;  %v7046_v2 = vld [vmem:[#allocation77_spill] sm:$0xff] }
 0x3c0   :  { %2424 = vmatpush1.bf16.msra.mxu0 %v7036_v23  ;;  %2465 = vmatpush1.bf16.msra.mxu1 %v7037_v9  ;;  %v7047_v23 = vld [vmem:[#allocation78_spill] sm:$0xff]  ;;  %v7048_v9 = vld [vmem:[#allocation79_spill] sm:$0xff] }
 0x3c1   :  { %2425 = vmatprep.subr.bf16.mxu0 %v7038_v8  ;;  %2466 = vmatprep.subr.bf16.mxu1 %v7039_v62  ;;  %v7049_v8 = vld [vmem:[#allocation80_spill] sm:$0xff]  ;;  %v7050_v62 = vld [vmem:[#allocation81_spill] sm:$0xff] }
 0x3c4   :  { %2426 = vmatpush1.bf16.msra.mxu0 %v7040_v25  ;;  %2467 = vmatpush1.bf16.msra.mxu1 %v7041_v35  ;;  %v7051_v25 = vld [vmem:[#allocation82_spill] sm:$0xff] }
 0x3c5   :  { %2427 = vmatprep.subr.bf16.mxu0 %v7042_v21  ;;  %2468 = vmatprep.subr.bf16.mxu1 %v7043_v0 }
 0x3c8   :  { %2428 = vmatpush1.bf16.msra.mxu0 %v7044_v1  ;;  %2469 = vmatpush1.bf16.msra.mxu1 %v7045_v56 }
 0x3c9   :  { %2429 = vmatprep.subr.bf16.mxu0 %v7046_v2  ;;  %2470 = vmatprep.subr.bf16.mxu1 %v7047_v23 }
 0x3cc   :  { %2430 = vmatpush1.bf16.msra.mxu0 %v7048_v9  ;;  %2471 = vmatpush1.bf16.msra.mxu1 %v7049_v8 }
 0x3cd   :  { %2481 = vmatprep.subr.bf16.mxu0 %v7050_v62  ;;  %2522 = vmatprep.subr.bf16.mxu1 %v7051_v25 }
 0x422   :  { %v2195_v35 = vpop.f32.mrb[48].mxu0  ;;  %v2236_v21 = vpop.f32.mrb[48].mxu1 }
 0x423   :  { %v2325_v0 = vadd.f32 %v2195_v35, %v7052_v36  ;;  %v2327_v1 = vadd.f32 %v2236_v21, %v7053_v7  ;;  %v2197_v3 = vpop.f32.mrb[49].mxu0  ;;  %v2238_v56 = vpop.f32.mrb[49].mxu1 }
 0x424   :  { %v2326_v2 = vadd.f32 %v2197_v3, %v7054_v22  ;;  %v2328_v23 = vadd.f32 %v2238_v56, %v7055_v51  ;;  %v2199_v52 = vpop.f32.mrb[50].mxu0  ;;  %v2240_v9 = vpop.f32.mrb[50].mxu1 }
 0x425   :  { %v2200_v58 = vpop.f32.mrb[51].mxu0  ;;  %v2241_v8 = vpop.f32.mrb[51].mxu1  ;;  %v3959_v59 = vmul.f32 -1.442695, %v2325_v0  ;;  %v3961_v62 = vmul.f32 -1.442695, %v2327_v1 }
 0x426   :  { %v3960_v53 = vmul.f32 -1.442695, %v2326_v2  ;;  %v3962_v25 = vmul.f32 -1.442695, %v2328_v23  ;;  %v7056_v0 = vld [vmem:[#allocation179_spill] sm:$0xff]  ;;  %v7057_v2 = vld [vmem:[#allocation180_spill] sm:$0xff] }
 0x427   :  { %4129 = vpow2.f32 %v3959_v59  ;;  %v7059_v58 = vld [vmem:[#allocation194_spill] sm:$0xff] }
 0x428   :  { %4131 = vpow2.f32 %v3961_v62 }
 0x429   :  { %4133 = vpow2.f32 %v3960_v53 }
 0x42a   :  { %4135 = vpow2.f32 %v3962_v25  ;;  %v7058_v25 = vld [vmem:[#allocation193_spill] sm:$0xff] }
 0x431   :  { %v4130_v36 = vpop.eup %4129 }
 0x432   :  { %v4132_v7 = vpop.eup %4131  ;;  %v2351_v6 = vadd.f32 1.0, %v4130_v36 }
 0x433   :  { %v4134_v35 = vpop.eup %4133  ;;  %v2353_v3 = vadd.f32 1.0, %v4132_v7 }
 0x434   :  { %v4136_v21 = vpop.eup %4135  ;;  %v2352_v22 = vadd.f32 1.0, %v4134_v35  ;;  %4137 = vrcp.f32 %v2351_v6 }
 0x435   :  { %v2354_v56 = vadd.f32 1.0, %v4136_v21  ;;  %4139 = vrcp.f32 %v2353_v3 }
 0x436   :  { %4141 = vrcp.f32 %v2352_v22 }
 0x437   :  { %4143 = vrcp.f32 %v2354_v56 }
 0x43e   :  { %v4138_v3 = vpop.eup %4137 }
 0x43f   :  { %v4140_v22 = vpop.eup %4139 }
 0x462   :  { %v2277_v9 = vpop.f32.mrb[52].mxu0  ;;  %v2318_v8 = vpop.f32.mrb[52].mxu1 }
 0x463   :  { %v2329_v1 = vadd.f32 %v2277_v9, %v7056_v0  ;;  %v2331_v23 = vadd.f32 %v2318_v8, %v7057_v2  ;;  %v2279_v62 = vpop.f32.mrb[53].mxu0  ;;  %v2320_v53 = vpop.f32.mrb[53].mxu1  ;;  %v2371_v2 = vmul.f32 %v4140_v22, %v5459_v5 }
 0x464   :  { %v2330_v59 = vadd.f32 %v2279_v62, %v7058_v25  ;;  %v2332_v52 = vadd.f32 %v2320_v53, %v7059_v58  ;;  %v2281_v51 = vpop.f32.mrb[54].mxu0  ;;  %v2322_v36 = vpop.f32.mrb[54].mxu1 }
 0x465   :  { %v3963_v7 = vmul.f32 -1.442695, %v2329_v1  ;;  %4145 = vtanh.f32 %v2331_v23  ;;  %v2282_v6 = vpop.f32.mrb[55].mxu0  ;;  %v2323_v35 = vpop.f32.mrb[55].mxu1 }
 0x466   :  { %v3964_v21 = vmul.f32 -1.442695, %v2330_v59  ;;  %4147 = vtanh.f32 %v2332_v52  ;;  %v4142_v9 = vpop.eup %4141  ;;  %v7060_v6 = vld [vmem:[#allocation201_spill] sm:$0xff] }
 0x467   :  { %4149 = vpow2.f32 %v3963_v7  ;;  %v4144_v8 = vpop.eup %4143 }
 0x468   :  { %4151 = vpow2.f32 %v3964_v21  ;;  %v2372_v25 = vmul.f32 %v4144_v8, %v5461_v27  ;;  %v2143_v27 = vmax.f32 %v7060_v6, %v5465_v37  ;;  %v7062_v37 = vld [vmem:[#allocation108_spill] sm:$0xff]  ;;  %v7074_v6 = vld [vmem:[#allocation134_spill] sm:$0xff] }
 0x46f   :  { %v4146_v0 = vpop.eup %4145 }
 0x470   :  { %v4148_v56 = vpop.eup %4147  ;;  %v2373_v62 = vmul.f32 %v4146_v0, %v4138_v3  ;;  %v7061_v3 = vld [vmem:[#allocation202_spill] sm:$0xff] }
 0x471   :  { %v4150_v53 = vpop.eup %4149  ;;  %v2374_v1 = vmul.f32 %v4148_v56, %v4142_v9  ;;  %v2144_v22 = vmax.f32 %v7061_v3, %v5467_v60  ;;  %v7063_v60 = vld [vmem:[#allocation112_spill] sm:$0xff]  ;;  %v7078_v3 = vld [vmem:[#allocation138_spill] sm:$0xff] }
 0x472   :  { %v4152_v23 = vpop.eup %4151  ;;  %v2355_v58 = vadd.f32 1.0, %v4150_v53  ;;  %v5617_v51 = vadd.f32 %v2373_v62, %v2371_v2  ;;  %v7064_v62 = vld [vmem:[#allocation124_spill] sm:$0xff]  ;;  %v7065_v53 = vld [vmem:[#allocation125_spill] sm:$0xff] }
 0x473   :  { %v2356_v59 = vadd.f32 1.0, %v4152_v23  ;;  %v5619_v52 = vadd.f32 %v2374_v1, %v2372_v25  ;;  %v7066_v25 = vld [vmem:[#allocation126_spill] sm:$0xff]  ;;  %v7067_v1 = vld [vmem:[#allocation127_spill] sm:$0xff]  ;;  %v7068_v23 = vld [vmem:[#allocation128_spill] sm:$0xff] }
 0x474   :  { %4153 = vrcp.f32 %v2355_v58  ;;  %v7069_v58 = vld [vmem:[#allocation129_spill] sm:$0xff] }
 0x475   :  { %4155 = vtanh.f32 %v5617_v51 }
 0x476   :  { %4157 = vrcp.f32 %v2356_v59  ;;  %v7070_v59 = vld [vmem:[#allocation130_spill] sm:$0xff] }
 0x477   :  { %4159 = vtanh.f32 %v5619_v52 }
 0x47e   :  { %v4154_v36 = vpop.eup %4153 }
 0x47f   :  { %v4156_v5 = vpop.eup %4155 }
 0x480   :  { %v4158_v7 = vpop.eup %4157  ;;  %v2379_v35 = vmul.f32 %v4156_v5, %v4154_v36  ;;  %v7071_v36 = vld [vmem:[#allocation131_spill] sm:$0xff]  ;;  %v7072_v5 = vld [vmem:[#allocation132_spill] sm:$0xff] }
 0x481   :  { %v4160_v21 = vpop.eup %4159 }
 0x482   :  { %v2380_v9 = vmul.f32 %v4160_v21, %v4158_v7  ;;  %v5627_v8 = vmax.f32 %v2143_v27, %v2379_v35  ;;  %v5631_v2 = vpack.c.bf16 %v2379_v35, %v2379_v35  ;;  %v7073_v7 = vld [vmem:[#allocation133_spill] sm:$0xff]  ;;  %v7075_v27 = vld [vmem:[#allocation135_spill] sm:$0xff]  ;;  %v7076_v35 = vld [vmem:[#allocation136_spill] sm:$0xff] }
 0x483   :  { %v7077_v21 = vld [vmem:[#allocation137_spill] sm:$0xff] }
 0x484   :  { %v5629_v0 = vmax.f32 %v2144_v22, %v2380_v9  ;;  %v2398_v56 = vpack.c.bf16 %v2380_v9, %v2380_v9  ;;  %v7079_v22 = vld [vmem:[#allocation139_spill] sm:$0xff]  ;;  %v7080_v9 = vld [vmem:[#allocation140_spill] sm:$0xff] }
 0x486   :  { %2431 = vmatprep.mubr.bf16.mxu0 %v2398_v56  ;;  %2472 = vmatprep.mubr.bf16.mxu1 %v2398_v56 }
 0x487   :  { %2432 = vmatmul.mubr.bf16.vlgmr.msra.gmra.mrb[56].mxu0 %v5631_v2  ;;  %2473 = vmatmul.mubr.bf16.vlgmr.msra.gmra.mrb[56].mxu1 %v5631_v2 }
 0x488   :  { %2482 = vmatpush1.bf16.msra.mxu0 %v6861_v32  ;;  %2523 = vmatpush1.bf16.msra.mxu1 %v6862_v4 }
 0x489   :  { %2513 = vmatprep.mubr.bf16.mxu0 %v2398_v56  ;;  %2554 = vmatprep.mubr.bf16.mxu1 %v2398_v56  ;;  %v7081_v56 = vld [vmem:[#allocation141_spill] sm:$0xff] }
 0x48a   :  { %2483 = vmatprep.subr.bf16.mxu0 %v6863_v10  ;;  %2524 = vmatprep.subr.bf16.mxu1 %v6864_v48 }
 0x48c   :  { %2484 = vmatpush1.bf16.msra.mxu0 %v6865_v43  ;;  %2525 = vmatpush1.bf16.msra.mxu1 %v6866_v61 }
 0x48d   :  { %2485 = vmatprep.subr.bf16.mxu0 %v6867_v28  ;;  %2526 = vmatprep.subr.bf16.mxu1 %v6868_v14 }
 0x490   :  { %2486 = vmatpush1.bf16.msra.mxu0 %v6869_v57  ;;  %2527 = vmatpush1.bf16.msra.mxu1 %v6870_v15 }
 0x491   :  { %2487 = vmatprep.subr.bf16.mxu0 %v6871_v45  ;;  %2528 = vmatprep.subr.bf16.mxu1 %v6872_v54 }
 0x494   :  { %2488 = vmatpush1.bf16.msra.mxu0 %v6873_v29  ;;  %2529 = vmatpush1.bf16.msra.mxu1 %v6874_v50 }
 0x495   :  { %2489 = vmatprep.subr.bf16.mxu0 %v6875_v40  ;;  %2530 = vmatprep.subr.bf16.mxu1 %v6876_v39 }
 0x498   :  { %2490 = vmatpush1.bf16.msra.mxu0 %v6877_v16  ;;  %2531 = vmatpush1.bf16.msra.mxu1 %v6878_v24 }
 0x499   :  { %2491 = vmatprep.subr.bf16.mxu0 %v6965_v26  ;;  %2532 = vmatprep.subr.bf16.mxu1 %v6966_v18 }
 0x49c   :  { %2492 = vmatpush1.bf16.msra.mxu0 %v6967_v19  ;;  %2533 = vmatpush1.bf16.msra.mxu1 %v6968_v41 }
 0x49d   :  { %2493 = vmatprep.subr.bf16.mxu0 %v6969_v20  ;;  %2534 = vmatprep.subr.bf16.mxu1 %v6970_v46 }
 0x4a0   :  { %2494 = vmatpush1.bf16.msra.mxu0 %v6971_v33  ;;  %2535 = vmatpush1.bf16.msra.mxu1 %v7062_v37 }
 0x4a1   :  { %2495 = vmatprep.subr.bf16.mxu0 %v6973_v34  ;;  %2536 = vmatprep.subr.bf16.mxu1 %v6974_v42 }
 0x4a4   :  { %2496 = vmatpush1.bf16.msra.mxu0 %v6975_v13  ;;  %2537 = vmatpush1.bf16.msra.mxu1 %v7063_v60 }
 0x4a5   :  { %2497 = vmatprep.subr.bf16.mxu0 %v6977_v47  ;;  %2538 = vmatprep.subr.bf16.mxu1 %v6978_v31 }
 0x4a8   :  { %2498 = vmatpush1.bf16.msra.mxu0 %v6979_v11  ;;  %2539 = vmatpush1.bf16.msra.mxu1 %v6980_v30 }
 0x4a9   :  { %2499 = vmatprep.subr.bf16.mxu0 %v6981_v63  ;;  %2540 = vmatprep.subr.bf16.mxu1 %v6982_v38 }
 0x4ac   :  { %2500 = vmatpush1.bf16.msra.mxu0 %v6983_v12  ;;  %2541 = vmatpush1.bf16.msra.mxu1 %v6898_v55 }
 0x4ad   :  { %2501 = vmatprep.subr.bf16.mxu0 %v6899_v17  ;;  %2542 = vmatprep.subr.bf16.mxu1 %v6900_v44 }
 0x4b0   :  { %2502 = vmatpush1.bf16.msra.mxu0 %v6984_v49  ;;  %2543 = vmatpush1.bf16.msra.mxu1 %v7064_v62 }
 0x4b1   :  { %2503 = vmatprep.subr.bf16.mxu0 %v7065_v53  ;;  %2544 = vmatprep.subr.bf16.mxu1 %v7066_v25 }
 0x4b4   :  { %2504 = vmatpush1.bf16.msra.mxu0 %v7067_v1  ;;  %2545 = vmatpush1.bf16.msra.mxu1 %v7068_v23  ;;  %v7153_v23 = vld [vmem:[#allocation161_spill] sm:$0xff]  ;;  %v7154_v1 = vld [vmem:[#allocation162_spill] sm:$0xff] }
 0x4b5   :  { %2505 = vmatprep.subr.bf16.mxu0 %v7069_v58  ;;  %2546 = vmatprep.subr.bf16.mxu1 %v7070_v59  ;;  %v7152_v59 = vld [vmem:[#allocation156_spill] sm:$0xff] }
 0x4b8   :  { %2506 = vmatpush1.bf16.msra.mxu0 %v7071_v36  ;;  %2547 = vmatpush1.bf16.msra.mxu1 %v7072_v5  ;;  %v7082_v36 = vld [vmem:[#allocation142_spill] sm:$0xff]  ;;  %v7083_v5 = vld [vmem:[#allocation143_spill] sm:$0xff] }
 0x4b9   :  { %2507 = vmatprep.subr.bf16.mxu0 %v7073_v7  ;;  %2548 = vmatprep.subr.bf16.mxu1 %v7074_v6  ;;  %v7084_v7 = vld [vmem:[#allocation144_spill] sm:$0xff]  ;;  %v7085_v6 = vld [vmem:[#allocation17_spill] sm:$0xff] }
 0x4bc   :  { %2508 = vmatpush1.bf16.msra.mxu0 %v7075_v27  ;;  %2549 = vmatpush1.bf16.msra.mxu1 %v7076_v35  ;;  %v7086_v27 = vld [vmem:[#allocation18_spill] sm:$0xff]  ;;  %v7151_v35 = vld [vmem:[#allocation155_spill] sm:$0xff] }
 0x4bd   :  { %2509 = vmatprep.subr.bf16.mxu0 %v7077_v21  ;;  %2550 = vmatprep.subr.bf16.mxu1 %v7078_v3  ;;  %v7087_v3 = vld [vmem:[#allocation19_spill] sm:$0xff]  ;;  %v7096_v21 = vld [vmem:[#allocation28_spill] sm:$0xff] }
 0x4c0   :  { %2510 = vmatpush1.bf16.msra.mxu0 %v7079_v22  ;;  %2551 = vmatpush1.bf16.msra.mxu1 %v7080_v9  ;;  %v7088_v22 = vld [vmem:[#allocation20_spill] sm:$0xff]  ;;  %v7089_v9 = vld [vmem:[#allocation21_spill] sm:$0xff] }
 0x4c1   :  { %2511 = vmatprep.subr.bf16.mxu0 %v7081_v56  ;;  %2552 = vmatprep.subr.bf16.mxu1 %v7082_v36  ;;  %v7090_v56 = vld [vmem:[#allocation22_spill] sm:$0xff]  ;;  %v7091_v36 = vld [vmem:[#allocation23_spill] sm:$0xff] }
 0x4c4   :  { %2512 = vmatpush1.bf16.msra.mxu0 %v7083_v5  ;;  %2553 = vmatpush1.bf16.msra.mxu1 %v7084_v7  ;;  %v7092_v5 = vld [vmem:[#allocation24_spill] sm:$0xff]  ;;  %v7093_v7 = vld [vmem:[#allocation25_spill] sm:$0xff] }
 0x4c5   :  { %2631 = vmatprep.subr.bf16.mxu0 %v7085_v6  ;;  %2672 = vmatprep.subr.bf16.mxu1 %v7086_v27  ;;  %v7094_v6 = vld [vmem:[#allocation26_spill] sm:$0xff]  ;;  %v7095_v27 = vld [vmem:[#allocation27_spill] sm:$0xff] }
 0x4c7   :  { %2514 = vmatmul.mubr.bf16.vlgmr.msra.gmra.mrb[60].mxu0 %v5631_v2  ;;  %2555 = vmatmul.mubr.bf16.vlgmr.msra.gmra.mrb[60].mxu1 %v5631_v2  ;;  %v7097_v2 = vld [vmem:[#allocation29_spill] sm:$0xff] }
 0x4c8   :  { %2632 = vmatpush1.bf16.msra.mxu0 %v7087_v3  ;;  %2673 = vmatpush1.bf16.msra.mxu1 %v7088_v22  ;;  %v7098_v3 = vld [vmem:[#allocation30_spill] sm:$0xff]  ;;  %v7099_v22 = vld [vmem:[#allocation31_spill] sm:$0xff] }
 0x4c9   :  { %2633 = vmatprep.subr.bf16.mxu0 %v7089_v9  ;;  %2674 = vmatprep.subr.bf16.mxu1 %v7090_v56  ;;  %v7100_v9 = vld [vmem:[#allocation32_spill] sm:$0xff]  ;;  %v7101_v56 = vld [vmem:[#allocation33_spill] sm:$0xff] }
 0x4cc   :  { %2634 = vmatpush1.bf16.msra.mxu0 %v7091_v36  ;;  %2675 = vmatpush1.bf16.msra.mxu1 %v7092_v5  ;;  %v7102_v36 = vld [vmem:[#allocation34_spill] sm:$0xff]  ;;  %v7103_v5 = vld [vmem:[#allocation35_spill] sm:$0xff] }
 0x4cd   :  { %2635 = vmatprep.subr.bf16.mxu0 %v7093_v7  ;;  %2676 = vmatprep.subr.bf16.mxu1 %v7094_v6  ;;  %v7104_v7 = vld [vmem:[#allocation36_spill] sm:$0xff]  ;;  %v7105_v6 = vld [vmem:[#allocation37_spill] sm:$0xff] }
 0x4d0   :  { %2636 = vmatpush1.bf16.msra.mxu0 %v7095_v27  ;;  %2677 = vmatpush1.bf16.msra.mxu1 %v7096_v21  ;;  %v7106_v27 = vld [vmem:[#allocation38_spill] sm:$0xff]  ;;  %v7107_v21 = vld [vmem:[#allocation39_spill] sm:$0xff] }
 0x4d1   :  { %2637 = vmatprep.subr.bf16.mxu0 %v7097_v2  ;;  %2678 = vmatprep.subr.bf16.mxu1 %v7098_v3  ;;  %v7108_v2 = vld [vmem:[#allocation40_spill] sm:$0xff]  ;;  %v7109_v3 = vld [vmem:[#allocation41_spill] sm:$0xff] }
 0x4d4   :  { %2638 = vmatpush1.bf16.msra.mxu0 %v7099_v22  ;;  %2679 = vmatpush1.bf16.msra.mxu1 %v7100_v9  ;;  %v7110_v22 = vld [vmem:[#allocation42_spill] sm:$0xff]  ;;  %v7111_v9 = vld [vmem:[#allocation43_spill] sm:$0xff] }
 0x4d5   :  { %2639 = vmatprep.subr.bf16.mxu0 %v7101_v56  ;;  %2680 = vmatprep.subr.bf16.mxu1 %v7102_v36  ;;  %v7112_v56 = vld [vmem:[#allocation44_spill] sm:$0xff]  ;;  %v7113_v36 = vld [vmem:[#allocation45_spill] sm:$0xff] }
 0x4d8   :  { %2640 = vmatpush1.bf16.msra.mxu0 %v7103_v5  ;;  %2681 = vmatpush1.bf16.msra.mxu1 %v7104_v7  ;;  %v7114_v5 = vld [vmem:[#allocation46_spill] sm:$0xff]  ;;  %v7115_v7 = vld [vmem:[#allocation47_spill] sm:$0xff] }
 0x4d9   :  { %2641 = vmatprep.subr.bf16.mxu0 %v7105_v6  ;;  %2682 = vmatprep.subr.bf16.mxu1 %v7106_v27  ;;  %v7116_v6 = vld [vmem:[#allocation48_spill] sm:$0xff]  ;;  %v7117_v27 = vld [vmem:[#allocation49_spill] sm:$0xff] }
 0x4dc   :  { %2642 = vmatpush1.bf16.msra.mxu0 %v7107_v21  ;;  %2683 = vmatpush1.bf16.msra.mxu1 %v7108_v2  ;;  %v7118_v21 = vld [vmem:[#allocation50_spill] sm:$0xff]  ;;  %v7119_v2 = vld [vmem:[#allocation51_spill] sm:$0xff] }
 0x4dd   :  { %2643 = vmatprep.subr.bf16.mxu0 %v7109_v3  ;;  %2684 = vmatprep.subr.bf16.mxu1 %v7110_v22  ;;  %v7120_v3 = vld [vmem:[#allocation52_spill] sm:$0xff]  ;;  %v7121_v22 = vld [vmem:[#allocation53_spill] sm:$0xff] }
 0x4e0   :  { %2644 = vmatpush1.bf16.msra.mxu0 %v7111_v9  ;;  %2685 = vmatpush1.bf16.msra.mxu1 %v7112_v56  ;;  %v7122_v9 = vld [vmem:[#allocation54_spill] sm:$0xff]  ;;  %v7123_v56 = vld [vmem:[#allocation55_spill] sm:$0xff] }
 0x4e1   :  { %2645 = vmatprep.subr.bf16.mxu0 %v7113_v36  ;;  %2686 = vmatprep.subr.bf16.mxu1 %v7114_v5  ;;  %v7124_v36 = vld [vmem:[#allocation56_spill] sm:$0xff]  ;;  %v7125_v5 = vld [vmem:[#allocation57_spill] sm:$0xff] }
 0x4e4   :  { %2646 = vmatpush1.bf16.msra.mxu0 %v7115_v7  ;;  %2687 = vmatpush1.bf16.msra.mxu1 %v7116_v6  ;;  %v7126_v7 = vld [vmem:[#allocation58_spill] sm:$0xff]  ;;  %v7127_v6 = vld [vmem:[#allocation59_spill] sm:$0xff] }
 0x4e5   :  { %2647 = vmatprep.subr.bf16.mxu0 %v7117_v27  ;;  %2688 = vmatprep.subr.bf16.mxu1 %v7118_v21  ;;  %v7128_v27 = vld [vmem:[#allocation60_spill] sm:$0xff]  ;;  %v7129_v21 = vld [vmem:[#allocation61_spill] sm:$0xff] }
 0x4e8   :  { %2648 = vmatpush1.bf16.msra.mxu0 %v7119_v2  ;;  %2689 = vmatpush1.bf16.msra.mxu1 %v7120_v3  ;;  %v7130_v2 = vld [vmem:[#allocation62_spill] sm:$0xff]  ;;  %v7131_v3 = vld [vmem:[#allocation63_spill] sm:$0xff] }
 0x4e9   :  { %2649 = vmatprep.subr.bf16.mxu0 %v7121_v22  ;;  %2690 = vmatprep.subr.bf16.mxu1 %v7122_v9  ;;  %v7132_v22 = vld [vmem:[#allocation64_spill] sm:$0xff]  ;;  %v7133_v9 = vld [vmem:[#allocation65_spill] sm:$0xff] }
 0x4ec   :  { %2650 = vmatpush1.bf16.msra.mxu0 %v7123_v56  ;;  %2691 = vmatpush1.bf16.msra.mxu1 %v7124_v36  ;;  %v7134_v56 = vld [vmem:[#allocation66_spill] sm:$0xff]  ;;  %v7135_v36 = vld [vmem:[#allocation67_spill] sm:$0xff] }
 0x4ed   :  { %2651 = vmatprep.subr.bf16.mxu0 %v7125_v5  ;;  %2692 = vmatprep.subr.bf16.mxu1 %v7126_v7  ;;  %v7136_v5 = vld [vmem:[#allocation68_spill] sm:$0xff]  ;;  %v7137_v7 = vld [vmem:[#allocation69_spill] sm:$0xff] }
 0x4f0   :  { %2652 = vmatpush1.bf16.msra.mxu0 %v7127_v6  ;;  %2693 = vmatpush1.bf16.msra.mxu1 %v7128_v27  ;;  %v7138_v6 = vld [vmem:[#allocation70_spill] sm:$0xff]  ;;  %v7139_v27 = vld [vmem:[#allocation71_spill] sm:$0xff] }
 0x4f1   :  { %2653 = vmatprep.subr.bf16.mxu0 %v7129_v21  ;;  %2694 = vmatprep.subr.bf16.mxu1 %v7130_v2  ;;  %v7140_v21 = vld [vmem:[#allocation72_spill] sm:$0xff]  ;;  %v7141_v2 = vld [vmem:[#allocation73_spill] sm:$0xff] }
 0x4f4   :  { %2654 = vmatpush1.bf16.msra.mxu0 %v7131_v3  ;;  %2695 = vmatpush1.bf16.msra.mxu1 %v7132_v22  ;;  %v7142_v3 = vld [vmem:[#allocation74_spill] sm:$0xff]  ;;  %v7143_v22 = vld [vmem:[#allocation75_spill] sm:$0xff] }
 0x4f5   :  { %2655 = vmatprep.subr.bf16.mxu0 %v7133_v9  ;;  %2696 = vmatprep.subr.bf16.mxu1 %v7134_v56  ;;  %v7144_v9 = vld [vmem:[#allocation76_spill] sm:$0xff]  ;;  %v7145_v56 = vld [vmem:[#allocation77_spill] sm:$0xff] }
 0x4f8   :  { %2656 = vmatpush1.bf16.msra.mxu0 %v7135_v36  ;;  %2697 = vmatpush1.bf16.msra.mxu1 %v7136_v5  ;;  %v7146_v36 = vld [vmem:[#allocation78_spill] sm:$0xff]  ;;  %v7147_v5 = vld [vmem:[#allocation79_spill] sm:$0xff] }
 0x4f9   :  { %2657 = vmatprep.subr.bf16.mxu0 %v7137_v7  ;;  %2698 = vmatprep.subr.bf16.mxu1 %v7138_v6  ;;  %v7148_v7 = vld [vmem:[#allocation80_spill] sm:$0xff]  ;;  %v7149_v6 = vld [vmem:[#allocation81_spill] sm:$0xff] }
 0x4fc   :  { %2658 = vmatpush1.bf16.msra.mxu0 %v7139_v27  ;;  %2699 = vmatpush1.bf16.msra.mxu1 %v7140_v21  ;;  %v7150_v27 = vld [vmem:[#allocation82_spill] sm:$0xff] }
 0x4fd   :  { %2659 = vmatprep.subr.bf16.mxu0 %v7141_v2  ;;  %2700 = vmatprep.subr.bf16.mxu1 %v7142_v3 }
 0x500   :  { %2660 = vmatpush1.bf16.msra.mxu0 %v7143_v22  ;;  %2701 = vmatpush1.bf16.msra.mxu1 %v7144_v9 }
 0x501   :  { %2661 = vmatprep.subr.bf16.mxu0 %v7145_v56  ;;  %2702 = vmatprep.subr.bf16.mxu1 %v7146_v36 }
 0x504   :  { %2662 = vmatpush1.bf16.msra.mxu0 %v7147_v5  ;;  %2703 = vmatpush1.bf16.msra.mxu1 %v7148_v7 }
 0x505   :  { %2713 = vmatprep.subr.bf16.mxu0 %v7149_v6  ;;  %2754 = vmatprep.subr.bf16.mxu1 %v7150_v27 }
 0x55a   :  { %v2433_v21 = vpop.f32.mrb[56].mxu0  ;;  %v2474_v2 = vpop.f32.mrb[56].mxu1 }
 0x55b   :  { %v2563_v3 = vadd.f32 %v2433_v21, %v7151_v35  ;;  %v2565_v22 = vadd.f32 %v2474_v2, %v7152_v59  ;;  %v2435_v58 = vpop.f32.mrb[57].mxu0  ;;  %v2476_v9 = vpop.f32.mrb[57].mxu1 }
 0x55c   :  { %v2564_v56 = vadd.f32 %v2435_v58, %v7153_v23  ;;  %v2566_v36 = vadd.f32 %v2476_v9, %v7154_v1  ;;  %v2437_v25 = vpop.f32.mrb[58].mxu0  ;;  %v2478_v5 = vpop.f32.mrb[58].mxu1 }
 0x55d   :  { %v2438_v53 = vpop.f32.mrb[59].mxu0  ;;  %v2479_v7 = vpop.f32.mrb[59].mxu1  ;;  %v3965_v62 = vmul.f32 -1.442695, %v2563_v3  ;;  %v3967_v6 = vmul.f32 -1.442695, %v2565_v22 }
 0x55e   :  { %v3966_v49 = vmul.f32 -1.442695, %v2564_v56  ;;  %v3968_v27 = vmul.f32 -1.442695, %v2566_v36  ;;  %v7155_v5 = vld [vmem:[#allocation183_spill] sm:$0xff]  ;;  %v7156_v36 = vld [vmem:[#allocation184_spill] sm:$0xff] }
 0x55f   :  { %4161 = vpow2.f32 %v3965_v62  ;;  %v7158_v22 = vld [vmem:[#allocation190_spill] sm:$0xff] }
 0x560   :  { %4163 = vpow2.f32 %v3967_v6 }
 0x561   :  { %4165 = vpow2.f32 %v3966_v49 }
 0x562   :  { %4167 = vpow2.f32 %v3968_v27  ;;  %v7157_v27 = vld [vmem:[#allocation189_spill] sm:$0xff] }
 0x569   :  { %v4162_v35 = vpop.eup %4161 }
 0x56a   :  { %v4164_v59 = vpop.eup %4163  ;;  %v2589_v44 = vadd.f32 1.0, %v4162_v35 }
 0x56b   :  { %v4166_v21 = vpop.eup %4165  ;;  %v2591_v23 = vadd.f32 1.0, %v4164_v59 }
 0x56c   :  { %v4168_v2 = vpop.eup %4167  ;;  %v2590_v58 = vadd.f32 1.0, %v4166_v21  ;;  %4169 = vrcp.f32 %v2589_v44 }
 0x56d   :  { %v2592_v1 = vadd.f32 1.0, %v4168_v2  ;;  %4171 = vrcp.f32 %v2591_v23 }
 0x56e   :  { %4173 = vrcp.f32 %v2590_v58 }
 0x56f   :  { %4175 = vrcp.f32 %v2592_v1 }
 0x576   :  { %v4170_v23 = vpop.eup %4169 }
 0x577   :  { %v4172_v58 = vpop.eup %4171 }
 0x59a   :  { %v2515_v53 = vpop.f32.mrb[60].mxu0  ;;  %v2556_v25 = vpop.f32.mrb[60].mxu1 }
 0x59b   :  { %v2567_v7 = vadd.f32 %v2515_v53, %v7155_v5  ;;  %v2569_v62 = vadd.f32 %v2556_v25, %v7156_v36  ;;  %v2517_v6 = vpop.f32.mrb[61].mxu0  ;;  %v2558_v49 = vpop.f32.mrb[61].mxu1  ;;  %v2609_v36 = vmul.f32 %v4172_v58, %v5617_v51 }
 0x59c   :  { %v2568_v3 = vadd.f32 %v2517_v6, %v7157_v27  ;;  %v2570_v9 = vadd.f32 %v2558_v49, %v7158_v22  ;;  %v2519_v56 = vpop.f32.mrb[62].mxu0  ;;  %v2560_v35 = vpop.f32.mrb[62].mxu1 }
 0x59d   :  { %v3969_v59 = vmul.f32 -1.442695, %v2567_v7  ;;  %4177 = vtanh.f32 %v2569_v62  ;;  %v2520_v44 = vpop.f32.mrb[63].mxu0  ;;  %v2561_v21 = vpop.f32.mrb[63].mxu1 }
 0x59e   :  { %v3970_v2 = vmul.f32 -1.442695, %v2568_v3  ;;  %4179 = vtanh.f32 %v2570_v9  ;;  %v4174_v53 = vpop.eup %4173 }
 0x59f   :  { %4181 = vpow2.f32 %v3969_v59  ;;  %v4176_v25 = vpop.eup %4175 }
 0x5a0   :  { %4183 = vpow2.f32 %v3970_v2  ;;  %v2610_v27 = vmul.f32 %v4176_v25, %v5619_v52  ;;  %v7159_v25 = vld [vmem:[#allocation122_spill] sm:$0xff]  ;;  %v7176_v2 = vld [vmem:[#allocation139_spill] sm:$0xff] }
 0x5a7   :  { %v4178_v5 = vpop.eup %4177 }
 0x5a8   :  { %v4180_v1 = vpop.eup %4179  ;;  %v2611_v6 = vmul.f32 %v4178_v5, %v4170_v23  ;;  %v7160_v5 = vld [vmem:[#allocation123_spill] sm:$0xff]  ;;  %v7175_v23 = vld [vmem:[#allocation138_spill] sm:$0xff] }
 0x5a9   :  { %v4182_v49 = vpop.eup %4181  ;;  %v2612_v7 = vmul.f32 %v4180_v1, %v4174_v53  ;;  %v7161_v1 = vld [vmem:[#allocation124_spill] sm:$0xff] }
 0x5aa   :  { %v4184_v62 = vpop.eup %4183  ;;  %v2593_v22 = vadd.f32 1.0, %v4182_v49  ;;  %v5775_v56 = vadd.f32 %v2611_v6, %v2609_v36  ;;  %v7162_v36 = vld [vmem:[#allocation125_spill] sm:$0xff]  ;;  %v7163_v6 = vld [vmem:[#allocation126_spill] sm:$0xff]  ;;  %v7164_v49 = vld [vmem:[#allocation127_spill] sm:$0xff] }
 0x5ab   :  { %v2594_v3 = vadd.f32 1.0, %v4184_v62  ;;  %v5777_v9 = vadd.f32 %v2612_v7, %v2610_v27  ;;  %v7165_v27 = vld [vmem:[#allocation128_spill] sm:$0xff]  ;;  %v7166_v7 = vld [vmem:[#allocation129_spill] sm:$0xff]  ;;  %v7167_v62 = vld [vmem:[#allocation130_spill] sm:$0xff] }
 0x5ac   :  { %4185 = vrcp.f32 %v2593_v22  ;;  %v7168_v22 = vld [vmem:[#allocation131_spill] sm:$0xff] }
 0x5ad   :  { %4187 = vtanh.f32 %v5775_v56 }
 0x5ae   :  { %4189 = vrcp.f32 %v2594_v3  ;;  %v7169_v3 = vld [vmem:[#allocation132_spill] sm:$0xff] }
 0x5af   :  { %4191 = vtanh.f32 %v5777_v9 }
 0x5b6   :  { %v4186_v35 = vpop.eup %4185 }
 0x5b7   :  { %v4188_v51 = vpop.eup %4187 }
 0x5b8   :  { %v4190_v59 = vpop.eup %4189  ;;  %v5781_v44 = vmul.f32 %v4188_v51, %v4186_v35  ;;  %v7170_v35 = vld [vmem:[#allocation133_spill] sm:$0xff]  ;;  %v7171_v51 = vld [vmem:[#allocation134_spill] sm:$0xff] }
 0x5b9   :  { %v4192_v52 = vpop.eup %4191 }
 0x5ba   :  { %v5783_v21 = vmul.f32 %v4192_v52, %v4190_v59  ;;  %v5793_v53 = vpack.c.bf16 %v5781_v44, %v5781_v44  ;;  %v7172_v59 = vld [vmem:[#allocation135_spill] sm:$0xff]  ;;  %v7173_v52 = vld [vmem:[#allocation136_spill] sm:$0xff] }
 0x5bc   :  { %v2630_v58 = vpack.c.bf16 %v5783_v21, %v5783_v21 }
 0x5be   :  { %2663 = vmatprep.mubr.bf16.mxu0 %v2630_v58  ;;  %2704 = vmatprep.mubr.bf16.mxu1 %v2630_v58 }
 0x5bf   :  { %2664 = vmatmul.mubr.bf16.vlgmr.msra.gmra.mrb[64].mxu0 %v5793_v53  ;;  %2705 = vmatmul.mubr.bf16.vlgmr.msra.gmra.mrb[64].mxu1 %v5793_v53 }
 0x5c0   :  { %2714 = vmatpush1.bf16.msra.mxu0 %v6861_v32  ;;  %2755 = vmatpush1.bf16.msra.mxu1 %v6862_v4 }
 0x5c1   :  { %2745 = vmatprep.mubr.bf16.mxu0 %v2630_v58  ;;  %2786 = vmatprep.mubr.bf16.mxu1 %v2630_v58  ;;  %v7174_v58 = vld [vmem:[#allocation137_spill] sm:$0xff] }
 0x5c2   :  { %2715 = vmatprep.subr.bf16.mxu0 %v6863_v10  ;;  %2756 = vmatprep.subr.bf16.mxu1 %v6864_v48 }
 0x5c4   :  { %2716 = vmatpush1.bf16.msra.mxu0 %v6865_v43  ;;  %2757 = vmatpush1.bf16.msra.mxu1 %v6866_v61 }
 0x5c5   :  { %2717 = vmatprep.subr.bf16.mxu0 %v6867_v28  ;;  %2758 = vmatprep.subr.bf16.mxu1 %v6868_v14 }
 0x5c8   :  { %2718 = vmatpush1.bf16.msra.mxu0 %v6869_v57  ;;  %2759 = vmatpush1.bf16.msra.mxu1 %v6870_v15 }
 0x5c9   :  { %2719 = vmatprep.subr.bf16.mxu0 %v6871_v45  ;;  %2760 = vmatprep.subr.bf16.mxu1 %v6872_v54 }
 0x5cc   :  { %2720 = vmatpush1.bf16.msra.mxu0 %v6873_v29  ;;  %2761 = vmatpush1.bf16.msra.mxu1 %v6874_v50 }
 0x5cd   :  { %2721 = vmatprep.subr.bf16.mxu0 %v6875_v40  ;;  %2762 = vmatprep.subr.bf16.mxu1 %v6876_v39 }
 0x5d0   :  { %2722 = vmatpush1.bf16.msra.mxu0 %v6877_v16  ;;  %2763 = vmatpush1.bf16.msra.mxu1 %v6878_v24 }
 0x5d1   :  { %2723 = vmatprep.subr.bf16.mxu0 %v6965_v26  ;;  %2764 = vmatprep.subr.bf16.mxu1 %v6966_v18 }
 0x5d4   :  { %2724 = vmatpush1.bf16.msra.mxu0 %v6967_v19  ;;  %2765 = vmatpush1.bf16.msra.mxu1 %v6968_v41 }
 0x5d5   :  { %2725 = vmatprep.subr.bf16.mxu0 %v6969_v20  ;;  %2766 = vmatprep.subr.bf16.mxu1 %v6970_v46 }
 0x5d8   :  { %2726 = vmatpush1.bf16.msra.mxu0 %v6971_v33  ;;  %2767 = vmatpush1.bf16.msra.mxu1 %v7062_v37 }
 0x5d9   :  { %2727 = vmatprep.subr.bf16.mxu0 %v6973_v34  ;;  %2768 = vmatprep.subr.bf16.mxu1 %v6974_v42 }
 0x5dc   :  { %2728 = vmatpush1.bf16.msra.mxu0 %v6975_v13  ;;  %2769 = vmatpush1.bf16.msra.mxu1 %v7063_v60 }
 0x5dd   :  { %2729 = vmatprep.subr.bf16.mxu0 %v6977_v47  ;;  %2770 = vmatprep.subr.bf16.mxu1 %v6978_v31 }
 0x5e0   :  { %2730 = vmatpush1.bf16.msra.mxu0 %v6979_v11  ;;  %2771 = vmatpush1.bf16.msra.mxu1 %v6980_v30 }
 0x5e1   :  { %2731 = vmatprep.subr.bf16.mxu0 %v6981_v63  ;;  %2772 = vmatprep.subr.bf16.mxu1 %v6982_v38 }
 0x5e4   :  { %2732 = vmatpush1.bf16.msra.mxu0 %v6983_v12  ;;  %2773 = vmatpush1.bf16.msra.mxu1 %v6898_v55 }
 0x5e5   :  { %2733 = vmatprep.subr.bf16.mxu0 %v6899_v17  ;;  %2774 = vmatprep.subr.bf16.mxu1 %v7159_v25 }
 0x5e8   :  { %2734 = vmatpush1.bf16.msra.mxu0 %v7160_v5  ;;  %2775 = vmatpush1.bf16.msra.mxu1 %v7161_v1 }
 0x5e9   :  { %2735 = vmatprep.subr.bf16.mxu0 %v7162_v36  ;;  %2776 = vmatprep.subr.bf16.mxu1 %v7163_v6  ;;  %v7250_v6 = vld [vmem:[#allocation157_spill] sm:$0xff]  ;;  %v7251_v36 = vld [vmem:[#allocation158_spill] sm:$0xff] }
 0x5ec   :  { %2736 = vmatpush1.bf16.msra.mxu0 %v7164_v49  ;;  %2777 = vmatpush1.bf16.msra.mxu1 %v7165_v27  ;;  %v7249_v27 = vld [vmem:[#allocation160_spill] sm:$0xff] }
 0x5ed   :  { %2737 = vmatprep.subr.bf16.mxu0 %v7166_v7  ;;  %2778 = vmatprep.subr.bf16.mxu1 %v7167_v62  ;;  %v7177_v7 = vld [vmem:[#allocation140_spill] sm:$0xff]  ;;  %v7178_v62 = vld [vmem:[#allocation141_spill] sm:$0xff] }
 0x5f0   :  { %2738 = vmatpush1.bf16.msra.mxu0 %v7168_v22  ;;  %2779 = vmatpush1.bf16.msra.mxu1 %v7169_v3  ;;  %v7179_v22 = vld [vmem:[#allocation142_spill] sm:$0xff]  ;;  %v7180_v3 = vld [vmem:[#allocation143_spill] sm:$0xff] }
 0x5f1   :  { %2739 = vmatprep.subr.bf16.mxu0 %v7170_v35  ;;  %2780 = vmatprep.subr.bf16.mxu1 %v7171_v51  ;;  %v7181_v35 = vld [vmem:[#allocation144_spill] sm:$0xff]  ;;  %v7182_v51 = vld [vmem:[#allocation17_spill] sm:$0xff] }
 0x5f4   :  { %2740 = vmatpush1.bf16.msra.mxu0 %v7172_v59  ;;  %2781 = vmatpush1.bf16.msra.mxu1 %v7173_v52  ;;  %v7183_v59 = vld [vmem:[#allocation18_spill] sm:$0xff]  ;;  %v7248_v52 = vld [vmem:[#allocation159_spill] sm:$0xff] }
 0x5f5   :  { %2741 = vmatprep.subr.bf16.mxu0 %v7174_v58  ;;  %2782 = vmatprep.subr.bf16.mxu1 %v7175_v23  ;;  %v7184_v23 = vld [vmem:[#allocation19_spill] sm:$0xff]  ;;  %v7193_v58 = vld [vmem:[#allocation28_spill] sm:$0xff] }
 0x5f8   :  { %2742 = vmatpush1.bf16.msra.mxu0 %v7176_v2  ;;  %2783 = vmatpush1.bf16.msra.mxu1 %v7177_v7  ;;  %v7185_v2 = vld [vmem:[#allocation20_spill] sm:$0xff]  ;;  %v7186_v7 = vld [vmem:[#allocation21_spill] sm:$0xff] }
 0x5f9   :  { %2743 = vmatprep.subr.bf16.mxu0 %v7178_v62  ;;  %2784 = vmatprep.subr.bf16.mxu1 %v7179_v22  ;;  %v7187_v62 = vld [vmem:[#allocation22_spill] sm:$0xff]  ;;  %v7188_v22 = vld [vmem:[#allocation23_spill] sm:$0xff] }
 0x5fc   :  { %2744 = vmatpush1.bf16.msra.mxu0 %v7180_v3  ;;  %2785 = vmatpush1.bf16.msra.mxu1 %v7181_v35  ;;  %v7189_v3 = vld [vmem:[#allocation24_spill] sm:$0xff]  ;;  %v7190_v35 = vld [vmem:[#allocation25_spill] sm:$0xff] }
 0x5fd   :  { %2863 = vmatprep.subr.bf16.mxu0 %v7182_v51  ;;  %2904 = vmatprep.subr.bf16.mxu1 %v7183_v59  ;;  %v7191_v51 = vld [vmem:[#allocation26_spill] sm:$0xff]  ;;  %v7192_v59 = vld [vmem:[#allocation27_spill] sm:$0xff] }
 0x5ff   :  { %2746 = vmatmul.mubr.bf16.vlgmr.msra.gmra.mrb[68].mxu0 %v5793_v53  ;;  %2787 = vmatmul.mubr.bf16.vlgmr.msra.gmra.mrb[68].mxu1 %v5793_v53  ;;  %v7194_v53 = vld [vmem:[#allocation29_spill] sm:$0xff] }
 0x600   :  { %2864 = vmatpush1.bf16.msra.mxu0 %v7184_v23  ;;  %2905 = vmatpush1.bf16.msra.mxu1 %v7185_v2  ;;  %v7195_v23 = vld [vmem:[#allocation30_spill] sm:$0xff]  ;;  %v7196_v2 = vld [vmem:[#allocation31_spill] sm:$0xff] }
 0x601   :  { %2865 = vmatprep.subr.bf16.mxu0 %v7186_v7  ;;  %2906 = vmatprep.subr.bf16.mxu1 %v7187_v62  ;;  %v7197_v7 = vld [vmem:[#allocation32_spill] sm:$0xff]  ;;  %v7198_v62 = vld [vmem:[#allocation33_spill] sm:$0xff] }
 0x604   :  { %2866 = vmatpush1.bf16.msra.mxu0 %v7188_v22  ;;  %2907 = vmatpush1.bf16.msra.mxu1 %v7189_v3  ;;  %v7199_v22 = vld [vmem:[#allocation34_spill] sm:$0xff]  ;;  %v7200_v3 = vld [vmem:[#allocation35_spill] sm:$0xff] }
 0x605   :  { %2867 = vmatprep.subr.bf16.mxu0 %v7190_v35  ;;  %2908 = vmatprep.subr.bf16.mxu1 %v7191_v51  ;;  %v7201_v35 = vld [vmem:[#allocation36_spill] sm:$0xff]  ;;  %v7202_v51 = vld [vmem:[#allocation37_spill] sm:$0xff] }
 0x608   :  { %2868 = vmatpush1.bf16.msra.mxu0 %v7192_v59  ;;  %2909 = vmatpush1.bf16.msra.mxu1 %v7193_v58  ;;  %v7203_v59 = vld [vmem:[#allocation38_spill] sm:$0xff]  ;;  %v7204_v58 = vld [vmem:[#allocation39_spill] sm:$0xff] }
 0x609   :  { %2869 = vmatprep.subr.bf16.mxu0 %v7194_v53  ;;  %2910 = vmatprep.subr.bf16.mxu1 %v7195_v23  ;;  %v7205_v53 = vld [vmem:[#allocation40_spill] sm:$0xff]  ;;  %v7206_v23 = vld [vmem:[#allocation41_spill] sm:$0xff] }
 0x60c   :  { %2870 = vmatpush1.bf16.msra.mxu0 %v7196_v2  ;;  %2911 = vmatpush1.bf16.msra.mxu1 %v7197_v7  ;;  %v7207_v2 = vld [vmem:[#allocation42_spill] sm:$0xff]  ;;  %v7208_v7 = vld [vmem:[#allocation43_spill] sm:$0xff] }
 0x60d   :  { %2871 = vmatprep.subr.bf16.mxu0 %v7198_v62  ;;  %2912 = vmatprep.subr.bf16.mxu1 %v7199_v22  ;;  %v7209_v62 = vld [vmem:[#allocation44_spill] sm:$0xff]  ;;  %v7210_v22 = vld [vmem:[#allocation45_spill] sm:$0xff] }
 0x610   :  { %2872 = vmatpush1.bf16.msra.mxu0 %v7200_v3  ;;  %2913 = vmatpush1.bf16.msra.mxu1 %v7201_v35  ;;  %v7211_v3 = vld [vmem:[#allocation46_spill] sm:$0xff]  ;;  %v7212_v35 = vld [vmem:[#allocation47_spill] sm:$0xff] }
 0x611   :  { %2873 = vmatprep.subr.bf16.mxu0 %v7202_v51  ;;  %2914 = vmatprep.subr.bf16.mxu1 %v7203_v59  ;;  %v7213_v51 = vld [vmem:[#allocation48_spill] sm:$0xff]  ;;  %v7214_v59 = vld [vmem:[#allocation49_spill] sm:$0xff] }
 0x614   :  { %2874 = vmatpush1.bf16.msra.mxu0 %v7204_v58  ;;  %2915 = vmatpush1.bf16.msra.mxu1 %v7205_v53  ;;  %v7215_v58 = vld [vmem:[#allocation50_spill] sm:$0xff]  ;;  %v7216_v53 = vld [vmem:[#allocation51_spill] sm:$0xff] }
 0x615   :  { %2875 = vmatprep.subr.bf16.mxu0 %v7206_v23  ;;  %2916 = vmatprep.subr.bf16.mxu1 %v7207_v2  ;;  %v7217_v23 = vld [vmem:[#allocation52_spill] sm:$0xff]  ;;  %v7218_v2 = vld [vmem:[#allocation53_spill] sm:$0xff] }
 0x618   :  { %2876 = vmatpush1.bf16.msra.mxu0 %v7208_v7  ;;  %2917 = vmatpush1.bf16.msra.mxu1 %v7209_v62  ;;  %v7219_v7 = vld [vmem:[#allocation54_spill] sm:$0xff]  ;;  %v7220_v62 = vld [vmem:[#allocation55_spill] sm:$0xff] }
 0x619   :  { %2877 = vmatprep.subr.bf16.mxu0 %v7210_v22  ;;  %2918 = vmatprep.subr.bf16.mxu1 %v7211_v3  ;;  %v7221_v22 = vld [vmem:[#allocation56_spill] sm:$0xff]  ;;  %v7222_v3 = vld [vmem:[#allocation57_spill] sm:$0xff] }
 0x61c   :  { %2878 = vmatpush1.bf16.msra.mxu0 %v7212_v35  ;;  %2919 = vmatpush1.bf16.msra.mxu1 %v7213_v51  ;;  %v7223_v35 = vld [vmem:[#allocation58_spill] sm:$0xff]  ;;  %v7224_v51 = vld [vmem:[#allocation59_spill] sm:$0xff] }
 0x61d   :  { %2879 = vmatprep.subr.bf16.mxu0 %v7214_v59  ;;  %2920 = vmatprep.subr.bf16.mxu1 %v7215_v58  ;;  %v7225_v59 = vld [vmem:[#allocation60_spill] sm:$0xff]  ;;  %v7226_v58 = vld [vmem:[#allocation61_spill] sm:$0xff] }
 0x620   :  { %2880 = vmatpush1.bf16.msra.mxu0 %v7216_v53  ;;  %2921 = vmatpush1.bf16.msra.mxu1 %v7217_v23  ;;  %v7227_v53 = vld [vmem:[#allocation62_spill] sm:$0xff]  ;;  %v7228_v23 = vld [vmem:[#allocation63_spill] sm:$0xff] }
 0x621   :  { %2881 = vmatprep.subr.bf16.mxu0 %v7218_v2  ;;  %2922 = vmatprep.subr.bf16.mxu1 %v7219_v7  ;;  %v7229_v2 = vld [vmem:[#allocation64_spill] sm:$0xff]  ;;  %v7230_v7 = vld [vmem:[#allocation65_spill] sm:$0xff] }
 0x624   :  { %2882 = vmatpush1.bf16.msra.mxu0 %v7220_v62  ;;  %2923 = vmatpush1.bf16.msra.mxu1 %v7221_v22  ;;  %v7231_v62 = vld [vmem:[#allocation66_spill] sm:$0xff]  ;;  %v7232_v22 = vld [vmem:[#allocation67_spill] sm:$0xff] }
 0x625   :  { %2883 = vmatprep.subr.bf16.mxu0 %v7222_v3  ;;  %2924 = vmatprep.subr.bf16.mxu1 %v7223_v35  ;;  %v7233_v3 = vld [vmem:[#allocation68_spill] sm:$0xff]  ;;  %v7234_v35 = vld [vmem:[#allocation69_spill] sm:$0xff] }
 0x628   :  { %2884 = vmatpush1.bf16.msra.mxu0 %v7224_v51  ;;  %2925 = vmatpush1.bf16.msra.mxu1 %v7225_v59  ;;  %v7235_v51 = vld [vmem:[#allocation70_spill] sm:$0xff]  ;;  %v7236_v59 = vld [vmem:[#allocation71_spill] sm:$0xff] }
 0x629   :  { %2885 = vmatprep.subr.bf16.mxu0 %v7226_v58  ;;  %2926 = vmatprep.subr.bf16.mxu1 %v7227_v53  ;;  %v7237_v58 = vld [vmem:[#allocation72_spill] sm:$0xff]  ;;  %v7238_v53 = vld [vmem:[#allocation73_spill] sm:$0xff] }
 0x62c   :  { %2886 = vmatpush1.bf16.msra.mxu0 %v7228_v23  ;;  %2927 = vmatpush1.bf16.msra.mxu1 %v7229_v2  ;;  %v7239_v23 = vld [vmem:[#allocation74_spill] sm:$0xff]  ;;  %v7240_v2 = vld [vmem:[#allocation75_spill] sm:$0xff] }
 0x62d   :  { %2887 = vmatprep.subr.bf16.mxu0 %v7230_v7  ;;  %2928 = vmatprep.subr.bf16.mxu1 %v7231_v62  ;;  %v7241_v7 = vld [vmem:[#allocation76_spill] sm:$0xff]  ;;  %v7242_v62 = vld [vmem:[#allocation77_spill] sm:$0xff] }
 0x630   :  { %2888 = vmatpush1.bf16.msra.mxu0 %v7232_v22  ;;  %2929 = vmatpush1.bf16.msra.mxu1 %v7233_v3  ;;  %v7243_v22 = vld [vmem:[#allocation78_spill] sm:$0xff]  ;;  %v7244_v3 = vld [vmem:[#allocation79_spill] sm:$0xff] }
 0x631   :  { %2889 = vmatprep.subr.bf16.mxu0 %v7234_v35  ;;  %2930 = vmatprep.subr.bf16.mxu1 %v7235_v51  ;;  %v7245_v35 = vld [vmem:[#allocation80_spill] sm:$0xff]  ;;  %v7246_v51 = vld [vmem:[#allocation81_spill] sm:$0xff] }
 0x634   :  { %2890 = vmatpush1.bf16.msra.mxu0 %v7236_v59  ;;  %2931 = vmatpush1.bf16.msra.mxu1 %v7237_v58  ;;  %v7247_v59 = vld [vmem:[#allocation82_spill] sm:$0xff] }
 0x635   :  { %2891 = vmatprep.subr.bf16.mxu0 %v7238_v53  ;;  %2932 = vmatprep.subr.bf16.mxu1 %v7239_v23 }
 0x638   :  { %2892 = vmatpush1.bf16.msra.mxu0 %v7240_v2  ;;  %2933 = vmatpush1.bf16.msra.mxu1 %v7241_v7 }
 0x639   :  { %2893 = vmatprep.subr.bf16.mxu0 %v7242_v62  ;;  %2934 = vmatprep.subr.bf16.mxu1 %v7243_v22 }
 0x63c   :  { %2894 = vmatpush1.bf16.msra.mxu0 %v7244_v3  ;;  %2935 = vmatpush1.bf16.msra.mxu1 %v7245_v35 }
 0x63d   :  { %2945 = vmatprep.subr.bf16.mxu0 %v7246_v51  ;;  %2986 = vmatprep.subr.bf16.mxu1 %v7247_v59 }
 0x692   :  { %v2665_v58 = vpop.f32.mrb[64].mxu0  ;;  %v2706_v53 = vpop.f32.mrb[64].mxu1 }
 0x693   :  { %v2795_v23 = vadd.f32 %v2665_v58, %v7248_v52  ;;  %v2797_v2 = vadd.f32 %v2706_v53, %v7249_v27  ;;  %v2667_v49 = vpop.f32.mrb[65].mxu0  ;;  %v2708_v7 = vpop.f32.mrb[65].mxu1 }
 0x694   :  { %v2796_v62 = vadd.f32 %v2667_v49, %v7250_v6  ;;  %v2798_v22 = vadd.f32 %v2708_v7, %v7251_v36  ;;  %v2669_v1 = vpop.f32.mrb[66].mxu0  ;;  %v2710_v3 = vpop.f32.mrb[66].mxu1  ;;  %v7253_v7 = vld [vmem:[#allocation188_spill] sm:$0xff] }
 0x695   :  { %v2670_v5 = vpop.f32.mrb[67].mxu0  ;;  %v2711_v35 = vpop.f32.mrb[67].mxu1  ;;  %v3971_v25 = vmul.f32 -1.442695, %v2795_v23  ;;  %v3973_v51 = vmul.f32 -1.442695, %v2797_v2 }
 0x696   :  { %v3972_v17 = vmul.f32 -1.442695, %v2796_v62  ;;  %v3974_v59 = vmul.f32 -1.442695, %v2798_v22  ;;  %v7252_v2 = vld [vmem:[#allocation187_spill] sm:$0xff]  ;;  %v7254_v22 = vld [vmem:[#allocation185_spill] sm:$0xff] }
 0x697   :  { %4193 = vpow2.f32 %v3971_v25  ;;  %v7255_v35 = vld [vmem:[#allocation186_spill] sm:$0xff] }
 0x698   :  { %4195 = vpow2.f32 %v3973_v51 }
 0x699   :  { %4197 = vpow2.f32 %v3972_v17 }
 0x69a   :  { %4199 = vpow2.f32 %v3974_v59 }
 0x6a1   :  { %v4194_v52 = vpop.eup %4193 }
 0x6a2   :  { %v4196_v27 = vpop.eup %4195  ;;  %v2821_v55 = vadd.f32 1.0, %v4194_v52 }
 0x6a3   :  { %v4198_v58 = vpop.eup %4197  ;;  %v2823_v6 = vadd.f32 1.0, %v4196_v27 }
 0x6a4   :  { %v4200_v53 = vpop.eup %4199  ;;  %v2822_v49 = vadd.f32 1.0, %v4198_v58  ;;  %4201 = vrcp.f32 %v2821_v55 }
 0x6a5   :  { %v2824_v36 = vadd.f32 1.0, %v4200_v53  ;;  %4203 = vrcp.f32 %v2823_v6 }
 0x6a6   :  { %4205 = vrcp.f32 %v2822_v49 }
 0x6a7   :  { %4207 = vrcp.f32 %v2824_v36 }
 0x6ae   :  { %v4202_v6 = vpop.eup %4201 }
 0x6af   :  { %v4204_v49 = vpop.eup %4203 }
 0x6d2   :  { %v2747_v5 = vpop.f32.mrb[68].mxu0  ;;  %v2788_v1 = vpop.f32.mrb[68].mxu1 }
 0x6d3   :  { %v2799_v23 = vadd.f32 %v2747_v5, %v7252_v2  ;;  %v2801_v25 = vadd.f32 %v2788_v1, %v7253_v7  ;;  %v2749_v62 = vpop.f32.mrb[69].mxu0  ;;  %v2790_v17 = vpop.f32.mrb[69].mxu1  ;;  %v2841_v7 = vmul.f32 %v4204_v49, %v5775_v56 }
 0x6d4   :  { %v2800_v3 = vadd.f32 %v2749_v62, %v7254_v22  ;;  %v2802_v51 = vadd.f32 %v2790_v17, %v7255_v35  ;;  %v2751_v59 = vpop.f32.mrb[70].mxu0  ;;  %v2792_v52 = vpop.f32.mrb[70].mxu1 }
 0x6d5   :  { %v3975_v27 = vmul.f32 -1.442695, %v2799_v23  ;;  %4209 = vtanh.f32 %v2801_v25  ;;  %v2752_v55 = vpop.f32.mrb[71].mxu0  ;;  %v2793_v58 = vpop.f32.mrb[71].mxu1 }
 0x6d6   :  { %v3976_v53 = vmul.f32 -1.442695, %v2800_v3  ;;  %4211 = vtanh.f32 %v2802_v51  ;;  %v4206_v5 = vpop.eup %4205 }
 0x6d7   :  { %4213 = vpow2.f32 %v3975_v27  ;;  %v4208_v1 = vpop.eup %4207 }
 0x6d8   :  { %4215 = vpow2.f32 %v3976_v53  ;;  %v2842_v22 = vmul.f32 %v4208_v1, %v5777_v9  ;;  %v7256_v53 = vmax.f32 %v5627_v8, %v5781_v44  ;;  %v7258_v8 = vld [vmem:[#allocation120_spill] sm:$0xff]  ;;  %v7260_v44 = vld [vmem:[#allocation122_spill] sm:$0xff] }
 0x6df   :  { %v4210_v2 = vpop.eup %4209 }
 0x6e0   :  { %v4212_v36 = vpop.eup %4211  ;;  %v2843_v62 = vmul.f32 %v4210_v2, %v4202_v6 }
 0x6e1   :  { %v4214_v17 = vpop.eup %4213  ;;  %v2844_v23 = vmul.f32 %v4212_v36, %v4206_v5  ;;  %v7257_v5 = vmax.f32 %v5629_v0, %v5783_v21  ;;  %v7259_v0 = vld [vmem:[#allocation121_spill] sm:$0xff]  ;;  %v7261_v21 = vld [vmem:[#allocation123_spill] sm:$0xff]  ;;  %v7262_v36 = vld [vmem:[#allocation124_spill] sm:$0xff] }
 0x6e2   :  { %v4216_v25 = vpop.eup %4215  ;;  %v2825_v35 = vadd.f32 1.0, %v4214_v17  ;;  %v5937_v59 = vadd.f32 %v2843_v62, %v2841_v7  ;;  %v7263_v7 = vld [vmem:[#allocation125_spill] sm:$0xff]  ;;  %v7264_v62 = vld [vmem:[#allocation126_spill] sm:$0xff]  ;;  %v7265_v17 = vld [vmem:[#allocation127_spill] sm:$0xff] }
 0x6e3   :  { %v2826_v3 = vadd.f32 1.0, %v4216_v25  ;;  %v5939_v51 = vadd.f32 %v2844_v23, %v2842_v22  ;;  %v7266_v22 = vld [vmem:[#allocation128_spill] sm:$0xff]  ;;  %v7267_v23 = vld [vmem:[#allocation129_spill] sm:$0xff]  ;;  %v7268_v25 = vld [vmem:[#allocation130_spill] sm:$0xff] }
 0x6e4   :  { %4217 = vrcp.f32 %v2825_v35  ;;  %v7269_v35 = vld [vmem:[#allocation131_spill] sm:$0xff] }
 0x6e5   :  { %4219 = vtanh.f32 %v5937_v59 }
 0x6e6   :  { %4221 = vrcp.f32 %v2826_v3  ;;  %v7270_v3 = vld [vmem:[#allocation132_spill] sm:$0xff] }
 0x6e7   :  { %4223 = vtanh.f32 %v5939_v51 }
 0x6ee   :  { %v4218_v52 = vpop.eup %4217 }
 0x6ef   :  { %v4220_v56 = vpop.eup %4219 }
 0x6f0   :  { %v4222_v27 = vpop.eup %4221  ;;  %v2849_v55 = vmul.f32 %v4220_v56, %v4218_v52  ;;  %v7271_v52 = vld [vmem:[#allocation133_spill] sm:$0xff]  ;;  %v7272_v56 = vld [vmem:[#allocation134_spill] sm:$0xff] }
 0x6f1   :  { %v4224_v58 = vpop.eup %4223 }
 0x6f2   :  { %v2850_v9 = vmul.f32 %v4224_v58, %v4222_v27  ;;  %v5946_v6 = vmax.f32 %v7256_v53, %v2849_v55  ;;  %v5953_v2 = vpack.c.bf16 %v2849_v55, %v2849_v55  ;;  %v7273_v27 = vld [vmem:[#allocation135_spill] sm:$0xff]  ;;  %v7274_v55 = vld [vmem:[#allocation136_spill] sm:$0xff]  ;;  %v7275_v58 = vld [vmem:[#allocation137_spill] sm:$0xff] }
 0x6f3   :  { %v7277_v53 = vld [vmem:[#allocation139_spill] sm:$0xff] }
 0x6f4   :  { %v2862_v49 = vpack.c.bf16 %v2850_v9, %v2850_v9  ;;  %v5951_v1 = vmax.f32 %v7257_v5, %v2850_v9  ;;  %v7276_v9 = vld [vmem:[#allocation138_spill] sm:$0xff]  ;;  %v7279_v5 = vld [vmem:[#allocation141_spill] sm:$0xff] }
 0x6f6   :  { %2895 = vmatprep.mubr.bf16.mxu0 %v2862_v49  ;;  %2936 = vmatprep.mubr.bf16.mxu1 %v2862_v49 }
 0x6f7   :  { %2896 = vmatmul.mubr.bf16.vlgmr.msra.gmra.mrb[72].mxu0 %v5953_v2  ;;  %2937 = vmatmul.mubr.bf16.vlgmr.msra.gmra.mrb[72].mxu1 %v5953_v2 }
 0x6f8   :  { %2946 = vmatpush1.bf16.msra.mxu0 %v6861_v32  ;;  %2987 = vmatpush1.bf16.msra.mxu1 %v6862_v4 }
 0x6f9   :  { %2977 = vmatprep.mubr.bf16.mxu0 %v2862_v49  ;;  %3018 = vmatprep.mubr.bf16.mxu1 %v2862_v49  ;;  %v7278_v49 = vld [vmem:[#allocation140_spill] sm:$0xff] }
 0x6fa   :  { %2947 = vmatprep.subr.bf16.mxu0 %v6863_v10  ;;  %2988 = vmatprep.subr.bf16.mxu1 %v6864_v48 }
 0x6fc   :  { %2948 = vmatpush1.bf16.msra.mxu0 %v6865_v43  ;;  %2989 = vmatpush1.bf16.msra.mxu1 %v6866_v61 }
 0x6fd   :  { %2949 = vmatprep.subr.bf16.mxu0 %v6867_v28  ;;  %2990 = vmatprep.subr.bf16.mxu1 %v6868_v14 }
 0x700   :  { %2950 = vmatpush1.bf16.msra.mxu0 %v6869_v57  ;;  %2991 = vmatpush1.bf16.msra.mxu1 %v6870_v15 }
 0x701   :  { %2951 = vmatprep.subr.bf16.mxu0 %v6871_v45  ;;  %2992 = vmatprep.subr.bf16.mxu1 %v6872_v54 }
 0x704   :  { %2952 = vmatpush1.bf16.msra.mxu0 %v6873_v29  ;;  %2993 = vmatpush1.bf16.msra.mxu1 %v6874_v50 }
 0x705   :  { %2953 = vmatprep.subr.bf16.mxu0 %v6875_v40  ;;  %2994 = vmatprep.subr.bf16.mxu1 %v6876_v39 }
 0x708   :  { %2954 = vmatpush1.bf16.msra.mxu0 %v6877_v16  ;;  %2995 = vmatpush1.bf16.msra.mxu1 %v6878_v24 }
 0x709   :  { %2955 = vmatprep.subr.bf16.mxu0 %v6965_v26  ;;  %2996 = vmatprep.subr.bf16.mxu1 %v6966_v18 }
 0x70c   :  { %2956 = vmatpush1.bf16.msra.mxu0 %v6967_v19  ;;  %2997 = vmatpush1.bf16.msra.mxu1 %v6968_v41 }
 0x70d   :  { %2957 = vmatprep.subr.bf16.mxu0 %v6969_v20  ;;  %2998 = vmatprep.subr.bf16.mxu1 %v6970_v46 }
 0x710   :  { %2958 = vmatpush1.bf16.msra.mxu0 %v6971_v33  ;;  %2999 = vmatpush1.bf16.msra.mxu1 %v7062_v37 }
 0x711   :  { %2959 = vmatprep.subr.bf16.mxu0 %v6973_v34  ;;  %3000 = vmatprep.subr.bf16.mxu1 %v6974_v42 }
 0x714   :  { %2960 = vmatpush1.bf16.msra.mxu0 %v6975_v13  ;;  %3001 = vmatpush1.bf16.msra.mxu1 %v7063_v60 }
 0x715   :  { %2961 = vmatprep.subr.bf16.mxu0 %v6977_v47  ;;  %3002 = vmatprep.subr.bf16.mxu1 %v6978_v31 }
 0x718   :  { %2962 = vmatpush1.bf16.msra.mxu0 %v6979_v11  ;;  %3003 = vmatpush1.bf16.msra.mxu1 %v6980_v30 }
 0x719   :  { %2963 = vmatprep.subr.bf16.mxu0 %v6981_v63  ;;  %3004 = vmatprep.subr.bf16.mxu1 %v6982_v38 }
 0x71c   :  { %2964 = vmatpush1.bf16.msra.mxu0 %v6983_v12  ;;  %3005 = vmatpush1.bf16.msra.mxu1 %v7258_v8 }
 0x71d   :  { %2965 = vmatprep.subr.bf16.mxu0 %v7259_v0  ;;  %3006 = vmatprep.subr.bf16.mxu1 %v7260_v44 }
 0x720   :  { %2966 = vmatpush1.bf16.msra.mxu0 %v7261_v21  ;;  %3007 = vmatpush1.bf16.msra.mxu1 %v7262_v36 }
 0x721   :  { %2967 = vmatprep.subr.bf16.mxu0 %v7263_v7  ;;  %3008 = vmatprep.subr.bf16.mxu1 %v7264_v62 }
 0x724   :  { %2968 = vmatpush1.bf16.msra.mxu0 %v7265_v17  ;;  %3009 = vmatpush1.bf16.msra.mxu1 %v7266_v22  ;;  %v7351_v22 = vld [vmem:[#allocation153_spill] sm:$0xff]  ;;  %v7352_v17 = vld [vmem:[#allocation154_spill] sm:$0xff] }
 0x725   :  { %2969 = vmatprep.subr.bf16.mxu0 %v7267_v23  ;;  %3010 = vmatprep.subr.bf16.mxu1 %v7268_v25  ;;  %v7350_v25 = vld [vmem:[#allocation164_spill] sm:$0xff] }
 0x728   :  { %2970 = vmatpush1.bf16.msra.mxu0 %v7269_v35  ;;  %3011 = vmatpush1.bf16.msra.mxu1 %v7270_v3  ;;  %v7280_v35 = vld [vmem:[#allocation142_spill] sm:$0xff]  ;;  %v7281_v3 = vld [vmem:[#allocation143_spill] sm:$0xff] }
 0x729   :  { %2971 = vmatprep.subr.bf16.mxu0 %v7271_v52  ;;  %3012 = vmatprep.subr.bf16.mxu1 %v7272_v56  ;;  %v7282_v52 = vld [vmem:[#allocation144_spill] sm:$0xff]  ;;  %v7283_v56 = vld [vmem:[#allocation17_spill] sm:$0xff] }
 0x72c   :  { %2972 = vmatpush1.bf16.msra.mxu0 %v7273_v27  ;;  %3013 = vmatpush1.bf16.msra.mxu1 %v7274_v55  ;;  %v7284_v27 = vld [vmem:[#allocation18_spill] sm:$0xff]  ;;  %v7349_v55 = vld [vmem:[#allocation163_spill] sm:$0xff] }
 0x72d   :  { %2973 = vmatprep.subr.bf16.mxu0 %v7275_v58  ;;  %3014 = vmatprep.subr.bf16.mxu1 %v7276_v9  ;;  %v7285_v9 = vld [vmem:[#allocation19_spill] sm:$0xff]  ;;  %v7294_v58 = vld [vmem:[#allocation28_spill] sm:$0xff] }
 0x730   :  { %2974 = vmatpush1.bf16.msra.mxu0 %v7277_v53  ;;  %3015 = vmatpush1.bf16.msra.mxu1 %v7278_v49  ;;  %v7286_v53 = vld [vmem:[#allocation20_spill] sm:$0xff]  ;;  %v7287_v49 = vld [vmem:[#allocation21_spill] sm:$0xff] }
 0x731   :  { %2975 = vmatprep.subr.bf16.mxu0 %v7279_v5  ;;  %3016 = vmatprep.subr.bf16.mxu1 %v7280_v35  ;;  %v7288_v5 = vld [vmem:[#allocation22_spill] sm:$0xff]  ;;  %v7289_v35 = vld [vmem:[#allocation23_spill] sm:$0xff] }
 0x734   :  { %2976 = vmatpush1.bf16.msra.mxu0 %v7281_v3  ;;  %3017 = vmatpush1.bf16.msra.mxu1 %v7282_v52  ;;  %v7290_v3 = vld [vmem:[#allocation24_spill] sm:$0xff]  ;;  %v7291_v52 = vld [vmem:[#allocation25_spill] sm:$0xff] }
 0x735   :  { %3095 = vmatprep.subr.bf16.mxu0 %v7283_v56  ;;  %3136 = vmatprep.subr.bf16.mxu1 %v7284_v27  ;;  %v7292_v56 = vld [vmem:[#allocation26_spill] sm:$0xff]  ;;  %v7293_v27 = vld [vmem:[#allocation27_spill] sm:$0xff] }
 0x737   :  { %2978 = vmatmul.mubr.bf16.vlgmr.msra.gmra.mrb[76].mxu0 %v5953_v2  ;;  %3019 = vmatmul.mubr.bf16.vlgmr.msra.gmra.mrb[76].mxu1 %v5953_v2  ;;  %v7295_v2 = vld [vmem:[#allocation29_spill] sm:$0xff] }
 0x738   :  { %3096 = vmatpush1.bf16.msra.mxu0 %v7285_v9  ;;  %3137 = vmatpush1.bf16.msra.mxu1 %v7286_v53  ;;  %v7296_v9 = vld [vmem:[#allocation30_spill] sm:$0xff]  ;;  %v7297_v53 = vld [vmem:[#allocation31_spill] sm:$0xff] }
 0x739   :  { %3097 = vmatprep.subr.bf16.mxu0 %v7287_v49  ;;  %3138 = vmatprep.subr.bf16.mxu1 %v7288_v5  ;;  %v7298_v49 = vld [vmem:[#allocation32_spill] sm:$0xff]  ;;  %v7299_v5 = vld [vmem:[#allocation33_spill] sm:$0xff] }
 0x73c   :  { %3098 = vmatpush1.bf16.msra.mxu0 %v7289_v35  ;;  %3139 = vmatpush1.bf16.msra.mxu1 %v7290_v3  ;;  %v7300_v35 = vld [vmem:[#allocation34_spill] sm:$0xff]  ;;  %v7301_v3 = vld [vmem:[#allocation35_spill] sm:$0xff] }
 0x73d   :  { %3099 = vmatprep.subr.bf16.mxu0 %v7291_v52  ;;  %3140 = vmatprep.subr.bf16.mxu1 %v7292_v56  ;;  %v7302_v52 = vld [vmem:[#allocation36_spill] sm:$0xff]  ;;  %v7303_v56 = vld [vmem:[#allocation37_spill] sm:$0xff] }
 0x740   :  { %3100 = vmatpush1.bf16.msra.mxu0 %v7293_v27  ;;  %3141 = vmatpush1.bf16.msra.mxu1 %v7294_v58  ;;  %v7304_v27 = vld [vmem:[#allocation38_spill] sm:$0xff]  ;;  %v7305_v58 = vld [vmem:[#allocation39_spill] sm:$0xff] }
 0x741   :  { %3101 = vmatprep.subr.bf16.mxu0 %v7295_v2  ;;  %3142 = vmatprep.subr.bf16.mxu1 %v7296_v9  ;;  %v7306_v2 = vld [vmem:[#allocation40_spill] sm:$0xff]  ;;  %v7307_v9 = vld [vmem:[#allocation41_spill] sm:$0xff] }
 0x744   :  { %3102 = vmatpush1.bf16.msra.mxu0 %v7297_v53  ;;  %3143 = vmatpush1.bf16.msra.mxu1 %v7298_v49  ;;  %v7308_v53 = vld [vmem:[#allocation42_spill] sm:$0xff]  ;;  %v7309_v49 = vld [vmem:[#allocation43_spill] sm:$0xff] }
 0x745   :  { %3103 = vmatprep.subr.bf16.mxu0 %v7299_v5  ;;  %3144 = vmatprep.subr.bf16.mxu1 %v7300_v35  ;;  %v7310_v5 = vld [vmem:[#allocation44_spill] sm:$0xff]  ;;  %v7311_v35 = vld [vmem:[#allocation45_spill] sm:$0xff] }
 0x748   :  { %3104 = vmatpush1.bf16.msra.mxu0 %v7301_v3  ;;  %3145 = vmatpush1.bf16.msra.mxu1 %v7302_v52  ;;  %v7312_v3 = vld [vmem:[#allocation46_spill] sm:$0xff]  ;;  %v7313_v52 = vld [vmem:[#allocation47_spill] sm:$0xff] }
 0x749   :  { %3105 = vmatprep.subr.bf16.mxu0 %v7303_v56  ;;  %3146 = vmatprep.subr.bf16.mxu1 %v7304_v27  ;;  %v7314_v56 = vld [vmem:[#allocation48_spill] sm:$0xff]  ;;  %v7315_v27 = vld [vmem:[#allocation49_spill] sm:$0xff] }
 0x74c   :  { %3106 = vmatpush1.bf16.msra.mxu0 %v7305_v58  ;;  %3147 = vmatpush1.bf16.msra.mxu1 %v7306_v2  ;;  %v7316_v58 = vld [vmem:[#allocation50_spill] sm:$0xff]  ;;  %v7317_v2 = vld [vmem:[#allocation51_spill] sm:$0xff] }
 0x74d   :  { %3107 = vmatprep.subr.bf16.mxu0 %v7307_v9  ;;  %3148 = vmatprep.subr.bf16.mxu1 %v7308_v53  ;;  %v7318_v9 = vld [vmem:[#allocation52_spill] sm:$0xff]  ;;  %v7319_v53 = vld [vmem:[#allocation53_spill] sm:$0xff] }
 0x750   :  { %3108 = vmatpush1.bf16.msra.mxu0 %v7309_v49  ;;  %3149 = vmatpush1.bf16.msra.mxu1 %v7310_v5  ;;  %v7320_v49 = vld [vmem:[#allocation54_spill] sm:$0xff]  ;;  %v7321_v5 = vld [vmem:[#allocation55_spill] sm:$0xff] }
 0x751   :  { %3109 = vmatprep.subr.bf16.mxu0 %v7311_v35  ;;  %3150 = vmatprep.subr.bf16.mxu1 %v7312_v3  ;;  %v7322_v35 = vld [vmem:[#allocation56_spill] sm:$0xff]  ;;  %v7323_v3 = vld [vmem:[#allocation57_spill] sm:$0xff] }
 0x754   :  { %3110 = vmatpush1.bf16.msra.mxu0 %v7313_v52  ;;  %3151 = vmatpush1.bf16.msra.mxu1 %v7314_v56  ;;  %v7324_v52 = vld [vmem:[#allocation58_spill] sm:$0xff]  ;;  %v7325_v56 = vld [vmem:[#allocation59_spill] sm:$0xff] }
 0x755   :  { %3111 = vmatprep.subr.bf16.mxu0 %v7315_v27  ;;  %3152 = vmatprep.subr.bf16.mxu1 %v7316_v58  ;;  %v7326_v27 = vld [vmem:[#allocation60_spill] sm:$0xff]  ;;  %v7327_v58 = vld [vmem:[#allocation61_spill] sm:$0xff] }
 0x758   :  { %3112 = vmatpush1.bf16.msra.mxu0 %v7317_v2  ;;  %3153 = vmatpush1.bf16.msra.mxu1 %v7318_v9  ;;  %v7328_v2 = vld [vmem:[#allocation62_spill] sm:$0xff]  ;;  %v7329_v9 = vld [vmem:[#allocation63_spill] sm:$0xff] }
 0x759   :  { %3113 = vmatprep.subr.bf16.mxu0 %v7319_v53  ;;  %3154 = vmatprep.subr.bf16.mxu1 %v7320_v49  ;;  %v7330_v53 = vld [vmem:[#allocation64_spill] sm:$0xff]  ;;  %v7331_v49 = vld [vmem:[#allocation65_spill] sm:$0xff] }
 0x75c   :  { %3114 = vmatpush1.bf16.msra.mxu0 %v7321_v5  ;;  %3155 = vmatpush1.bf16.msra.mxu1 %v7322_v35  ;;  %v7332_v5 = vld [vmem:[#allocation66_spill] sm:$0xff]  ;;  %v7333_v35 = vld [vmem:[#allocation67_spill] sm:$0xff] }
 0x75d   :  { %3115 = vmatprep.subr.bf16.mxu0 %v7323_v3  ;;  %3156 = vmatprep.subr.bf16.mxu1 %v7324_v52  ;;  %v7334_v3 = vld [vmem:[#allocation68_spill] sm:$0xff]  ;;  %v7335_v52 = vld [vmem:[#allocation69_spill] sm:$0xff] }
 0x760   :  { %3116 = vmatpush1.bf16.msra.mxu0 %v7325_v56  ;;  %3157 = vmatpush1.bf16.msra.mxu1 %v7326_v27  ;;  %v7336_v56 = vld [vmem:[#allocation70_spill] sm:$0xff]  ;;  %v7337_v27 = vld [vmem:[#allocation71_spill] sm:$0xff] }
 0x761   :  { %3117 = vmatprep.subr.bf16.mxu0 %v7327_v58  ;;  %3158 = vmatprep.subr.bf16.mxu1 %v7328_v2  ;;  %v7338_v58 = vld [vmem:[#allocation72_spill] sm:$0xff]  ;;  %v7339_v2 = vld [vmem:[#allocation73_spill] sm:$0xff] }
 0x764   :  { %3118 = vmatpush1.bf16.msra.mxu0 %v7329_v9  ;;  %3159 = vmatpush1.bf16.msra.mxu1 %v7330_v53  ;;  %v7340_v9 = vld [vmem:[#allocation74_spill] sm:$0xff]  ;;  %v7341_v53 = vld [vmem:[#allocation75_spill] sm:$0xff] }
 0x765   :  { %3119 = vmatprep.subr.bf16.mxu0 %v7331_v49  ;;  %3160 = vmatprep.subr.bf16.mxu1 %v7332_v5  ;;  %v7342_v49 = vld [vmem:[#allocation76_spill] sm:$0xff]  ;;  %v7343_v5 = vld [vmem:[#allocation77_spill] sm:$0xff] }
 0x768   :  { %3120 = vmatpush1.bf16.msra.mxu0 %v7333_v35  ;;  %3161 = vmatpush1.bf16.msra.mxu1 %v7334_v3  ;;  %v7344_v35 = vld [vmem:[#allocation78_spill] sm:$0xff]  ;;  %v7345_v3 = vld [vmem:[#allocation79_spill] sm:$0xff] }
 0x769   :  { %3121 = vmatprep.subr.bf16.mxu0 %v7335_v52  ;;  %3162 = vmatprep.subr.bf16.mxu1 %v7336_v56  ;;  %v7346_v52 = vld [vmem:[#allocation80_spill] sm:$0xff]  ;;  %v7347_v56 = vld [vmem:[#allocation81_spill] sm:$0xff] }
 0x76c   :  { %3122 = vmatpush1.bf16.msra.mxu0 %v7337_v27  ;;  %3163 = vmatpush1.bf16.msra.mxu1 %v7338_v58  ;;  %v7348_v27 = vld [vmem:[#allocation82_spill] sm:$0xff] }
 0x76d   :  { %3123 = vmatprep.subr.bf16.mxu0 %v7339_v2  ;;  %3164 = vmatprep.subr.bf16.mxu1 %v7340_v9 }
 0x770   :  { %3124 = vmatpush1.bf16.msra.mxu0 %v7341_v53  ;;  %3165 = vmatpush1.bf16.msra.mxu1 %v7342_v49 }
 0x771   :  { %3125 = vmatprep.subr.bf16.mxu0 %v7343_v5  ;;  %3166 = vmatprep.subr.bf16.mxu1 %v7344_v35 }
 0x774   :  { %3126 = vmatpush1.bf16.msra.mxu0 %v7345_v3  ;;  %3167 = vmatpush1.bf16.msra.mxu1 %v7346_v52 }
 0x775   :  { %3177 = vmatprep.subr.bf16.mxu0 %v7347_v56  ;;  %3218 = vmatprep.subr.bf16.mxu1 %v7348_v27 }
 0x7ca   :  { %v2897_v58 = vpop.f32.mrb[72].mxu0  ;;  %v2938_v2 = vpop.f32.mrb[72].mxu1 }
 0x7cb   :  { %v3027_v9 = vadd.f32 %v2897_v58, %v7349_v55  ;;  %v3029_v53 = vadd.f32 %v2938_v2, %v7350_v25  ;;  %v2899_v23 = vpop.f32.mrb[73].mxu0  ;;  %v2940_v49 = vpop.f32.mrb[73].mxu1 }
 0x7cc   :  { %v3028_v5 = vadd.f32 %v2899_v23, %v7351_v22  ;;  %v3030_v35 = vadd.f32 %v2940_v49, %v7352_v17  ;;  %v2901_v62 = vpop.f32.mrb[74].mxu0  ;;  %v2942_v3 = vpop.f32.mrb[74].mxu1 }
 0x7cd   :  { %v2902_v7 = vpop.f32.mrb[75].mxu0  ;;  %v2943_v52 = vpop.f32.mrb[75].mxu1  ;;  %v3977_v36 = vmul.f32 -1.442695, %v3027_v9  ;;  %v3979_v56 = vmul.f32 -1.442695, %v3029_v53 }
 0x7ce   :  { %v3978_v21 = vmul.f32 -1.442695, %v3028_v5  ;;  %v3980_v27 = vmul.f32 -1.442695, %v3030_v35  ;;  %v7353_v3 = vld [vmem:[#allocation191_spill] sm:$0xff]  ;;  %v7354_v35 = vld [vmem:[#allocation192_spill] sm:$0xff] }
 0x7cf   :  { %4225 = vpow2.f32 %v3977_v36  ;;  %v7356_v53 = vld [vmem:[#allocation182_spill] sm:$0xff] }
 0x7d0   :  { %4227 = vpow2.f32 %v3979_v56 }
 0x7d1   :  { %4229 = vpow2.f32 %v3978_v21 }
 0x7d2   :  { %4231 = vpow2.f32 %v3980_v27  ;;  %v7355_v27 = vld [vmem:[#allocation181_spill] sm:$0xff] }
 0x7d9   :  { %v4226_v55 = vpop.eup %4225 }
 0x7da   :  { %v4228_v25 = vpop.eup %4227  ;;  %v3053_v44 = vadd.f32 1.0, %v4226_v55 }
 0x7db   :  { %v4230_v58 = vpop.eup %4229  ;;  %v3055_v22 = vadd.f32 1.0, %v4228_v25 }
 0x7dc   :  { %v4232_v2 = vpop.eup %4231  ;;  %v3054_v23 = vadd.f32 1.0, %v4230_v58  ;;  %4233 = vrcp.f32 %v3053_v44 }
 0x7dd   :  { %v3056_v17 = vadd.f32 1.0, %v4232_v2  ;;  %4235 = vrcp.f32 %v3055_v22 }
 0x7de   :  { %4237 = vrcp.f32 %v3054_v23 }
 0x7df   :  { %4239 = vrcp.f32 %v3056_v17 }
 0x7e6   :  { %v4234_v22 = vpop.eup %4233 }
 0x7e7   :  { %v4236_v23 = vpop.eup %4235 }
 0x80a   :  { %v2979_v7 = vpop.f32.mrb[76].mxu0  ;;  %v3020_v62 = vpop.f32.mrb[76].mxu1 }
 0x80b   :  { %v3031_v52 = vadd.f32 %v2979_v7, %v7353_v3  ;;  %v3033_v36 = vadd.f32 %v3020_v62, %v7354_v35  ;;  %v2981_v56 = vpop.f32.mrb[77].mxu0  ;;  %v3022_v21 = vpop.f32.mrb[77].mxu1  ;;  %v3073_v35 = vmul.f32 %v4236_v23, %v5937_v59  ;;  %v7373_v23 = vld [vmem:[#allocation138_spill] sm:$0xff] }
 0x80c   :  { %v3032_v9 = vadd.f32 %v2981_v56, %v7355_v27  ;;  %v3034_v49 = vadd.f32 %v3022_v21, %v7356_v53  ;;  %v2983_v5 = vpop.f32.mrb[78].mxu0  ;;  %v3024_v55 = vpop.f32.mrb[78].mxu1 }
 0x80d   :  { %v3981_v25 = vmul.f32 -1.442695, %v3031_v52  ;;  %4241 = vtanh.f32 %v3033_v36  ;;  %v2984_v44 = vpop.f32.mrb[79].mxu0  ;;  %v3025_v58 = vpop.f32.mrb[79].mxu1 }
 0x80e   :  { %v3982_v2 = vmul.f32 -1.442695, %v3032_v9  ;;  %4243 = vtanh.f32 %v3034_v49  ;;  %v4238_v7 = vpop.eup %4237 }
 0x80f   :  { %4245 = vpow2.f32 %v3981_v25  ;;  %v4240_v62 = vpop.eup %4239 }
 0x810   :  { %4247 = vpow2.f32 %v3982_v2  ;;  %v3074_v27 = vmul.f32 %v4240_v62, %v5939_v51  ;;  %v7357_v62 = vld [vmem:[#allocation122_spill] sm:$0xff]  ;;  %v7374_v2 = vld [vmem:[#allocation139_spill] sm:$0xff] }
 0x817   :  { %v4242_v3 = vpop.eup %4241 }
 0x818   :  { %v4244_v17 = vpop.eup %4243  ;;  %v3075_v56 = vmul.f32 %v4242_v3, %v4234_v22  ;;  %v7358_v3 = vld [vmem:[#allocation123_spill] sm:$0xff] }
 0x819   :  { %v4246_v21 = vpop.eup %4245  ;;  %v3076_v52 = vmul.f32 %v4244_v17, %v4238_v7  ;;  %v7359_v17 = vld [vmem:[#allocation124_spill] sm:$0xff] }
 0x81a   :  { %v4248_v36 = vpop.eup %4247  ;;  %v3057_v53 = vadd.f32 1.0, %v4246_v21  ;;  %v6097_v5 = vadd.f32 %v3075_v56, %v3073_v35  ;;  %v7360_v35 = vld [vmem:[#allocation125_spill] sm:$0xff]  ;;  %v7361_v56 = vld [vmem:[#allocation126_spill] sm:$0xff]  ;;  %v7362_v21 = vld [vmem:[#allocation127_spill] sm:$0xff] }
 0x81b   :  { %v3058_v9 = vadd.f32 1.0, %v4248_v36  ;;  %v6099_v49 = vadd.f32 %v3076_v52, %v3074_v27  ;;  %v7363_v27 = vld [vmem:[#allocation128_spill] sm:$0xff]  ;;  %v7364_v52 = vld [vmem:[#allocation129_spill] sm:$0xff]  ;;  %v7365_v36 = vld [vmem:[#allocation130_spill] sm:$0xff] }
 0x81c   :  { %4249 = vrcp.f32 %v3057_v53  ;;  %v7366_v53 = vld [vmem:[#allocation131_spill] sm:$0xff] }
 0x81d   :  { %4251 = vtanh.f32 %v6097_v5 }
 0x81e   :  { %4253 = vrcp.f32 %v3058_v9  ;;  %v7367_v9 = vld [vmem:[#allocation132_spill] sm:$0xff] }
 0x81f   :  { %4255 = vtanh.f32 %v6099_v49 }
 0x826   :  { %v4250_v55 = vpop.eup %4249 }
 0x827   :  { %v4252_v59 = vpop.eup %4251 }
 0x828   :  { %v4254_v25 = vpop.eup %4253  ;;  %v6103_v44 = vmul.f32 %v4252_v59, %v4250_v55  ;;  %v7368_v55 = vld [vmem:[#allocation133_spill] sm:$0xff]  ;;  %v7369_v59 = vld [vmem:[#allocation134_spill] sm:$0xff] }
 0x829   :  { %v4256_v51 = vpop.eup %4255 }
 0x82a   :  { %v6105_v58 = vmul.f32 %v4256_v51, %v4254_v25  ;;  %v6115_v7 = vpack.c.bf16 %v6103_v44, %v6103_v44  ;;  %v7370_v25 = vld [vmem:[#allocation135_spill] sm:$0xff]  ;;  %v7371_v51 = vld [vmem:[#allocation136_spill] sm:$0xff] }
 0x82c   :  { %v3094_v22 = vpack.c.bf16 %v6105_v58, %v6105_v58 }
 0x82e   :  { %3127 = vmatprep.mubr.bf16.mxu0 %v3094_v22  ;;  %3168 = vmatprep.mubr.bf16.mxu1 %v3094_v22 }
 0x82f   :  { %3128 = vmatmul.mubr.bf16.vlgmr.msra.gmra.mrb[80].mxu0 %v6115_v7  ;;  %3169 = vmatmul.mubr.bf16.vlgmr.msra.gmra.mrb[80].mxu1 %v6115_v7 }
 0x830   :  { %3178 = vmatpush1.bf16.msra.mxu0 %v6861_v32  ;;  %3219 = vmatpush1.bf16.msra.mxu1 %v6862_v4 }
 0x831   :  { %3209 = vmatprep.mubr.bf16.mxu0 %v3094_v22  ;;  %3250 = vmatprep.mubr.bf16.mxu1 %v3094_v22  ;;  %v7372_v22 = vld [vmem:[#allocation137_spill] sm:$0xff] }
 0x832   :  { %3179 = vmatprep.subr.bf16.mxu0 %v6863_v10  ;;  %3220 = vmatprep.subr.bf16.mxu1 %v6864_v48 }
 0x834   :  { %3180 = vmatpush1.bf16.msra.mxu0 %v6865_v43  ;;  %3221 = vmatpush1.bf16.msra.mxu1 %v6866_v61 }
 0x835   :  { %3181 = vmatprep.subr.bf16.mxu0 %v6867_v28  ;;  %3222 = vmatprep.subr.bf16.mxu1 %v6868_v14 }
 0x838   :  { %3182 = vmatpush1.bf16.msra.mxu0 %v6869_v57  ;;  %3223 = vmatpush1.bf16.msra.mxu1 %v6870_v15 }
 0x839   :  { %3183 = vmatprep.subr.bf16.mxu0 %v6871_v45  ;;  %3224 = vmatprep.subr.bf16.mxu1 %v6872_v54 }
 0x83c   :  { %3184 = vmatpush1.bf16.msra.mxu0 %v6873_v29  ;;  %3225 = vmatpush1.bf16.msra.mxu1 %v6874_v50 }
 0x83d   :  { %3185 = vmatprep.subr.bf16.mxu0 %v6875_v40  ;;  %3226 = vmatprep.subr.bf16.mxu1 %v6876_v39 }
 0x840   :  { %3186 = vmatpush1.bf16.msra.mxu0 %v6877_v16  ;;  %3227 = vmatpush1.bf16.msra.mxu1 %v6878_v24 }
 0x841   :  { %3187 = vmatprep.subr.bf16.mxu0 %v6965_v26  ;;  %3228 = vmatprep.subr.bf16.mxu1 %v6966_v18 }
 0x844   :  { %3188 = vmatpush1.bf16.msra.mxu0 %v6967_v19  ;;  %3229 = vmatpush1.bf16.msra.mxu1 %v6968_v41 }
 0x845   :  { %3189 = vmatprep.subr.bf16.mxu0 %v6969_v20  ;;  %3230 = vmatprep.subr.bf16.mxu1 %v6970_v46 }
 0x848   :  { %3190 = vmatpush1.bf16.msra.mxu0 %v6971_v33  ;;  %3231 = vmatpush1.bf16.msra.mxu1 %v7062_v37 }
 0x849   :  { %3191 = vmatprep.subr.bf16.mxu0 %v6973_v34  ;;  %3232 = vmatprep.subr.bf16.mxu1 %v6974_v42 }
 0x84c   :  { %3192 = vmatpush1.bf16.msra.mxu0 %v6975_v13  ;;  %3233 = vmatpush1.bf16.msra.mxu1 %v7063_v60 }
 0x84d   :  { %3193 = vmatprep.subr.bf16.mxu0 %v6977_v47  ;;  %3234 = vmatprep.subr.bf16.mxu1 %v6978_v31 }
 0x850   :  { %3194 = vmatpush1.bf16.msra.mxu0 %v6979_v11  ;;  %3235 = vmatpush1.bf16.msra.mxu1 %v6980_v30 }
 0x851   :  { %3195 = vmatprep.subr.bf16.mxu0 %v6981_v63  ;;  %3236 = vmatprep.subr.bf16.mxu1 %v6982_v38 }
 0x854   :  { %3196 = vmatpush1.bf16.msra.mxu0 %v6983_v12  ;;  %3237 = vmatpush1.bf16.msra.mxu1 %v7258_v8 }
 0x855   :  { %3197 = vmatprep.subr.bf16.mxu0 %v7259_v0  ;;  %3238 = vmatprep.subr.bf16.mxu1 %v7357_v62 }
 0x858   :  { %3198 = vmatpush1.bf16.msra.mxu0 %v7358_v3  ;;  %3239 = vmatpush1.bf16.msra.mxu1 %v7359_v17 }
 0x859   :  { %3199 = vmatprep.subr.bf16.mxu0 %v7360_v35  ;;  %3240 = vmatprep.subr.bf16.mxu1 %v7361_v56  ;;  %v7448_v56 = vld [vmem:[#allocation149_spill] sm:$0xff]  ;;  %v7449_v35 = vld [vmem:[#allocation150_spill] sm:$0xff] }
 0x85c   :  { %3200 = vmatpush1.bf16.msra.mxu0 %v7362_v21  ;;  %3241 = vmatpush1.bf16.msra.mxu1 %v7363_v27  ;;  %v7447_v27 = vld [vmem:[#allocation168_spill] sm:$0xff] }
 0x85d   :  { %3201 = vmatprep.subr.bf16.mxu0 %v7364_v52  ;;  %3242 = vmatprep.subr.bf16.mxu1 %v7365_v36  ;;  %v7375_v52 = vld [vmem:[#allocation140_spill] sm:$0xff]  ;;  %v7376_v36 = vld [vmem:[#allocation141_spill] sm:$0xff] }
 0x860   :  { %3202 = vmatpush1.bf16.msra.mxu0 %v7366_v53  ;;  %3243 = vmatpush1.bf16.msra.mxu1 %v7367_v9  ;;  %v7377_v53 = vld [vmem:[#allocation142_spill] sm:$0xff]  ;;  %v7378_v9 = vld [vmem:[#allocation143_spill] sm:$0xff] }
 0x861   :  { %3203 = vmatprep.subr.bf16.mxu0 %v7368_v55  ;;  %3244 = vmatprep.subr.bf16.mxu1 %v7369_v59  ;;  %v7379_v55 = vld [vmem:[#allocation144_spill] sm:$0xff]  ;;  %v7380_v59 = vld [vmem:[#allocation17_spill] sm:$0xff] }
 0x864   :  { %3204 = vmatpush1.bf16.msra.mxu0 %v7370_v25  ;;  %3245 = vmatpush1.bf16.msra.mxu1 %v7371_v51  ;;  %v7381_v25 = vld [vmem:[#allocation18_spill] sm:$0xff]  ;;  %v7446_v51 = vld [vmem:[#allocation167_spill] sm:$0xff] }
 0x865   :  { %3205 = vmatprep.subr.bf16.mxu0 %v7372_v22  ;;  %3246 = vmatprep.subr.bf16.mxu1 %v7373_v23  ;;  %v7382_v23 = vld [vmem:[#allocation19_spill] sm:$0xff]  ;;  %v7391_v22 = vld [vmem:[#allocation28_spill] sm:$0xff] }
 0x868   :  { %3206 = vmatpush1.bf16.msra.mxu0 %v7374_v2  ;;  %3247 = vmatpush1.bf16.msra.mxu1 %v7375_v52  ;;  %v7383_v2 = vld [vmem:[#allocation20_spill] sm:$0xff]  ;;  %v7384_v52 = vld [vmem:[#allocation21_spill] sm:$0xff] }
 0x869   :  { %3207 = vmatprep.subr.bf16.mxu0 %v7376_v36  ;;  %3248 = vmatprep.subr.bf16.mxu1 %v7377_v53  ;;  %v7385_v36 = vld [vmem:[#allocation22_spill] sm:$0xff]  ;;  %v7386_v53 = vld [vmem:[#allocation23_spill] sm:$0xff] }
 0x86c   :  { %3208 = vmatpush1.bf16.msra.mxu0 %v7378_v9  ;;  %3249 = vmatpush1.bf16.msra.mxu1 %v7379_v55  ;;  %v7387_v9 = vld [vmem:[#allocation24_spill] sm:$0xff]  ;;  %v7388_v55 = vld [vmem:[#allocation25_spill] sm:$0xff] }
 0x86d   :  { %3327 = vmatprep.subr.bf16.mxu0 %v7380_v59  ;;  %3368 = vmatprep.subr.bf16.mxu1 %v7381_v25  ;;  %v7389_v59 = vld [vmem:[#allocation26_spill] sm:$0xff]  ;;  %v7390_v25 = vld [vmem:[#allocation27_spill] sm:$0xff] }
 0x86f   :  { %3210 = vmatmul.mubr.bf16.vlgmr.msra.gmra.mrb[84].mxu0 %v6115_v7  ;;  %3251 = vmatmul.mubr.bf16.vlgmr.msra.gmra.mrb[84].mxu1 %v6115_v7  ;;  %v7392_v7 = vld [vmem:[#allocation29_spill] sm:$0xff] }
 0x870   :  { %3328 = vmatpush1.bf16.msra.mxu0 %v7382_v23  ;;  %3369 = vmatpush1.bf16.msra.mxu1 %v7383_v2  ;;  %v7393_v23 = vld [vmem:[#allocation30_spill] sm:$0xff]  ;;  %v7394_v2 = vld [vmem:[#allocation31_spill] sm:$0xff] }
 0x871   :  { %3329 = vmatprep.subr.bf16.mxu0 %v7384_v52  ;;  %3370 = vmatprep.subr.bf16.mxu1 %v7385_v36  ;;  %v7395_v52 = vld [vmem:[#allocation32_spill] sm:$0xff]  ;;  %v7396_v36 = vld [vmem:[#allocation33_spill] sm:$0xff] }
 0x874   :  { %3330 = vmatpush1.bf16.msra.mxu0 %v7386_v53  ;;  %3371 = vmatpush1.bf16.msra.mxu1 %v7387_v9  ;;  %v7397_v53 = vld [vmem:[#allocation34_spill] sm:$0xff]  ;;  %v7398_v9 = vld [vmem:[#allocation35_spill] sm:$0xff] }
 0x875   :  { %3331 = vmatprep.subr.bf16.mxu0 %v7388_v55  ;;  %3372 = vmatprep.subr.bf16.mxu1 %v7389_v59  ;;  %v7399_v55 = vld [vmem:[#allocation36_spill] sm:$0xff]  ;;  %v7400_v59 = vld [vmem:[#allocation37_spill] sm:$0xff] }
 0x878   :  { %3332 = vmatpush1.bf16.msra.mxu0 %v7390_v25  ;;  %3373 = vmatpush1.bf16.msra.mxu1 %v7391_v22  ;;  %v7401_v25 = vld [vmem:[#allocation38_spill] sm:$0xff]  ;;  %v7402_v22 = vld [vmem:[#allocation39_spill] sm:$0xff] }
 0x879   :  { %3333 = vmatprep.subr.bf16.mxu0 %v7392_v7  ;;  %3374 = vmatprep.subr.bf16.mxu1 %v7393_v23  ;;  %v7403_v7 = vld [vmem:[#allocation40_spill] sm:$0xff]  ;;  %v7404_v23 = vld [vmem:[#allocation41_spill] sm:$0xff] }
 0x87c   :  { %3334 = vmatpush1.bf16.msra.mxu0 %v7394_v2  ;;  %3375 = vmatpush1.bf16.msra.mxu1 %v7395_v52  ;;  %v7405_v2 = vld [vmem:[#allocation42_spill] sm:$0xff]  ;;  %v7406_v52 = vld [vmem:[#allocation43_spill] sm:$0xff] }
 0x87d   :  { %3335 = vmatprep.subr.bf16.mxu0 %v7396_v36  ;;  %3376 = vmatprep.subr.bf16.mxu1 %v7397_v53  ;;  %v7407_v36 = vld [vmem:[#allocation44_spill] sm:$0xff]  ;;  %v7408_v53 = vld [vmem:[#allocation45_spill] sm:$0xff] }
 0x880   :  { %3336 = vmatpush1.bf16.msra.mxu0 %v7398_v9  ;;  %3377 = vmatpush1.bf16.msra.mxu1 %v7399_v55  ;;  %v7409_v9 = vld [vmem:[#allocation46_spill] sm:$0xff]  ;;  %v7410_v55 = vld [vmem:[#allocation47_spill] sm:$0xff] }
 0x881   :  { %3337 = vmatprep.subr.bf16.mxu0 %v7400_v59  ;;  %3378 = vmatprep.subr.bf16.mxu1 %v7401_v25  ;;  %v7411_v59 = vld [vmem:[#allocation48_spill] sm:$0xff]  ;;  %v7412_v25 = vld [vmem:[#allocation49_spill] sm:$0xff] }
 0x884   :  { %3338 = vmatpush1.bf16.msra.mxu0 %v7402_v22  ;;  %3379 = vmatpush1.bf16.msra.mxu1 %v7403_v7  ;;  %v7413_v22 = vld [vmem:[#allocation50_spill] sm:$0xff]  ;;  %v7414_v7 = vld [vmem:[#allocation51_spill] sm:$0xff] }
 0x885   :  { %3339 = vmatprep.subr.bf16.mxu0 %v7404_v23  ;;  %3380 = vmatprep.subr.bf16.mxu1 %v7405_v2  ;;  %v7415_v23 = vld [vmem:[#allocation52_spill] sm:$0xff]  ;;  %v7416_v2 = vld [vmem:[#allocation53_spill] sm:$0xff] }
 0x888   :  { %3340 = vmatpush1.bf16.msra.mxu0 %v7406_v52  ;;  %3381 = vmatpush1.bf16.msra.mxu1 %v7407_v36  ;;  %v7417_v52 = vld [vmem:[#allocation54_spill] sm:$0xff]  ;;  %v7418_v36 = vld [vmem:[#allocation55_spill] sm:$0xff] }
 0x889   :  { %3341 = vmatprep.subr.bf16.mxu0 %v7408_v53  ;;  %3382 = vmatprep.subr.bf16.mxu1 %v7409_v9  ;;  %v7419_v53 = vld [vmem:[#allocation56_spill] sm:$0xff]  ;;  %v7420_v9 = vld [vmem:[#allocation57_spill] sm:$0xff] }
 0x88c   :  { %3342 = vmatpush1.bf16.msra.mxu0 %v7410_v55  ;;  %3383 = vmatpush1.bf16.msra.mxu1 %v7411_v59  ;;  %v7421_v55 = vld [vmem:[#allocation58_spill] sm:$0xff]  ;;  %v7422_v59 = vld [vmem:[#allocation59_spill] sm:$0xff] }
 0x88d   :  { %3343 = vmatprep.subr.bf16.mxu0 %v7412_v25  ;;  %3384 = vmatprep.subr.bf16.mxu1 %v7413_v22  ;;  %v7423_v25 = vld [vmem:[#allocation60_spill] sm:$0xff]  ;;  %v7424_v22 = vld [vmem:[#allocation61_spill] sm:$0xff] }
 0x890   :  { %3344 = vmatpush1.bf16.msra.mxu0 %v7414_v7  ;;  %3385 = vmatpush1.bf16.msra.mxu1 %v7415_v23  ;;  %v7425_v7 = vld [vmem:[#allocation62_spill] sm:$0xff]  ;;  %v7426_v23 = vld [vmem:[#allocation63_spill] sm:$0xff] }
 0x891   :  { %3345 = vmatprep.subr.bf16.mxu0 %v7416_v2  ;;  %3386 = vmatprep.subr.bf16.mxu1 %v7417_v52  ;;  %v7427_v2 = vld [vmem:[#allocation64_spill] sm:$0xff]  ;;  %v7428_v52 = vld [vmem:[#allocation65_spill] sm:$0xff] }
 0x894   :  { %3346 = vmatpush1.bf16.msra.mxu0 %v7418_v36  ;;  %3387 = vmatpush1.bf16.msra.mxu1 %v7419_v53  ;;  %v7429_v36 = vld [vmem:[#allocation66_spill] sm:$0xff]  ;;  %v7430_v53 = vld [vmem:[#allocation67_spill] sm:$0xff] }
 0x895   :  { %3347 = vmatprep.subr.bf16.mxu0 %v7420_v9  ;;  %3388 = vmatprep.subr.bf16.mxu1 %v7421_v55  ;;  %v7431_v9 = vld [vmem:[#allocation68_spill] sm:$0xff]  ;;  %v7432_v55 = vld [vmem:[#allocation69_spill] sm:$0xff] }
 0x898   :  { %3348 = vmatpush1.bf16.msra.mxu0 %v7422_v59  ;;  %3389 = vmatpush1.bf16.msra.mxu1 %v7423_v25  ;;  %v7433_v59 = vld [vmem:[#allocation70_spill] sm:$0xff]  ;;  %v7434_v25 = vld [vmem:[#allocation71_spill] sm:$0xff] }
 0x899   :  { %3349 = vmatprep.subr.bf16.mxu0 %v7424_v22  ;;  %3390 = vmatprep.subr.bf16.mxu1 %v7425_v7  ;;  %v7435_v22 = vld [vmem:[#allocation72_spill] sm:$0xff]  ;;  %v7436_v7 = vld [vmem:[#allocation73_spill] sm:$0xff] }
 0x89c   :  { %3350 = vmatpush1.bf16.msra.mxu0 %v7426_v23  ;;  %3391 = vmatpush1.bf16.msra.mxu1 %v7427_v2  ;;  %v7437_v23 = vld [vmem:[#allocation74_spill] sm:$0xff]  ;;  %v7438_v2 = vld [vmem:[#allocation75_spill] sm:$0xff] }
 0x89d   :  { %3351 = vmatprep.subr.bf16.mxu0 %v7428_v52  ;;  %3392 = vmatprep.subr.bf16.mxu1 %v7429_v36  ;;  %v7439_v52 = vld [vmem:[#allocation76_spill] sm:$0xff]  ;;  %v7440_v36 = vld [vmem:[#allocation77_spill] sm:$0xff] }
 0x8a0   :  { %3352 = vmatpush1.bf16.msra.mxu0 %v7430_v53  ;;  %3393 = vmatpush1.bf16.msra.mxu1 %v7431_v9  ;;  %v7441_v53 = vld [vmem:[#allocation78_spill] sm:$0xff]  ;;  %v7442_v9 = vld [vmem:[#allocation79_spill] sm:$0xff] }
 0x8a1   :  { %3353 = vmatprep.subr.bf16.mxu0 %v7432_v55  ;;  %3394 = vmatprep.subr.bf16.mxu1 %v7433_v59  ;;  %v7443_v55 = vld [vmem:[#allocation80_spill] sm:$0xff]  ;;  %v7444_v59 = vld [vmem:[#allocation81_spill] sm:$0xff] }
 0x8a4   :  { %3354 = vmatpush1.bf16.msra.mxu0 %v7434_v25  ;;  %3395 = vmatpush1.bf16.msra.mxu1 %v7435_v22  ;;  %v7445_v25 = vld [vmem:[#allocation82_spill] sm:$0xff] }
 0x8a5   :  { %3355 = vmatprep.subr.bf16.mxu0 %v7436_v7  ;;  %3396 = vmatprep.subr.bf16.mxu1 %v7437_v23 }
 0x8a8   :  { %3356 = vmatpush1.bf16.msra.mxu0 %v7438_v2  ;;  %3397 = vmatpush1.bf16.msra.mxu1 %v7439_v52 }
 0x8a9   :  { %3357 = vmatprep.subr.bf16.mxu0 %v7440_v36  ;;  %3398 = vmatprep.subr.bf16.mxu1 %v7441_v53 }
 0x8ac   :  { %3358 = vmatpush1.bf16.msra.mxu0 %v7442_v9  ;;  %3399 = vmatpush1.bf16.msra.mxu1 %v7443_v55 }
 0x8ad   :  { %3409 = vmatprep.subr.bf16.mxu0 %v7444_v59  ;;  %3450 = vmatprep.subr.bf16.mxu1 %v7445_v25 }
 0x902   :  { %v3129_v22 = vpop.f32.mrb[80].mxu0  ;;  %v3170_v7 = vpop.f32.mrb[80].mxu1 }
 0x903   :  { %v3259_v23 = vadd.f32 %v3129_v22, %v7446_v51  ;;  %v3261_v2 = vadd.f32 %v3170_v7, %v7447_v27  ;;  %v3131_v21 = vpop.f32.mrb[81].mxu0  ;;  %v3172_v52 = vpop.f32.mrb[81].mxu1 }
 0x904   :  { %v3260_v36 = vadd.f32 %v3131_v21, %v7448_v56  ;;  %v3262_v53 = vadd.f32 %v3172_v52, %v7449_v35  ;;  %v3133_v17 = vpop.f32.mrb[82].mxu0  ;;  %v3174_v9 = vpop.f32.mrb[82].mxu1  ;;  %v7451_v52 = vld [vmem:[#allocation196_spill] sm:$0xff] }
 0x905   :  { %v3134_v3 = vpop.f32.mrb[83].mxu0  ;;  %v3175_v55 = vpop.f32.mrb[83].mxu1  ;;  %v3983_v62 = vmul.f32 -1.442695, %v3259_v23  ;;  %v3985_v59 = vmul.f32 -1.442695, %v3261_v2 }
 0x906   :  { %v3984_v0 = vmul.f32 -1.442695, %v3260_v36  ;;  %v3986_v25 = vmul.f32 -1.442695, %v3262_v53  ;;  %v7450_v23 = vld [vmem:[#allocation195_spill] sm:$0xff]  ;;  %v7452_v53 = vld [vmem:[#allocation177_spill] sm:$0xff] }
 0x907   :  { %4257 = vpow2.f32 %v3983_v62  ;;  %v7453_v55 = vld [vmem:[#allocation178_spill] sm:$0xff] }
 0x908   :  { %4259 = vpow2.f32 %v3985_v59 }
 0x909   :  { %4261 = vpow2.f32 %v3984_v0 }
 0x90a   :  { %4263 = vpow2.f32 %v3986_v25 }
 0x911   :  { %v4258_v51 = vpop.eup %4257 }
 0x912   :  { %v4260_v27 = vpop.eup %4259  ;;  %v3285_v8 = vadd.f32 1.0, %v4258_v51 }
 0x913   :  { %v4262_v22 = vpop.eup %4261  ;;  %v3287_v56 = vadd.f32 1.0, %v4260_v27 }
 0x914   :  { %v4264_v7 = vpop.eup %4263  ;;  %v3286_v21 = vadd.f32 1.0, %v4262_v22  ;;  %4265 = vrcp.f32 %v3285_v8 }
 0x915   :  { %v3288_v35 = vadd.f32 1.0, %v4264_v7  ;;  %4267 = vrcp.f32 %v3287_v56 }
 0x916   :  { %4269 = vrcp.f32 %v3286_v21 }
 0x917   :  { %4271 = vrcp.f32 %v3288_v35 }
 0x91e   :  { %v4266_v56 = vpop.eup %4265 }
 0x91f   :  { %v4268_v21 = vpop.eup %4267 }
 0x942   :  { %v3211_v3 = vpop.f32.mrb[84].mxu0  ;;  %v3252_v17 = vpop.f32.mrb[84].mxu1 }
 0x943   :  { %v3263_v2 = vadd.f32 %v3211_v3, %v7450_v23  ;;  %v3265_v62 = vadd.f32 %v3252_v17, %v7451_v52  ;;  %v3213_v36 = vpop.f32.mrb[85].mxu0  ;;  %v3254_v0 = vpop.f32.mrb[85].mxu1  ;;  %v3305_v52 = vmul.f32 %v4268_v21, %v6097_v5 }
 0x944   :  { %v3264_v9 = vadd.f32 %v3213_v36, %v7452_v53  ;;  %v3266_v59 = vadd.f32 %v3254_v0, %v7453_v55  ;;  %v3215_v25 = vpop.f32.mrb[86].mxu0  ;;  %v3256_v51 = vpop.f32.mrb[86].mxu1 }
 0x945   :  { %v3987_v27 = vmul.f32 -1.442695, %v3263_v2  ;;  %4273 = vtanh.f32 %v3265_v62  ;;  %v3216_v8 = vpop.f32.mrb[87].mxu0  ;;  %v3257_v22 = vpop.f32.mrb[87].mxu1 }
 0x946   :  { %v3988_v7 = vmul.f32 -1.442695, %v3264_v9  ;;  %4275 = vtanh.f32 %v3266_v59  ;;  %v4270_v3 = vpop.eup %4269 }
 0x947   :  { %4277 = vpow2.f32 %v3987_v27  ;;  %v4272_v17 = vpop.eup %4271 }
 0x948   :  { %4279 = vpow2.f32 %v3988_v7  ;;  %v3306_v53 = vmul.f32 %v4272_v17, %v6099_v49  ;;  %v7454_v7 = vmax.f32 %v5946_v6, %v6103_v44  ;;  %v4061_v6 = vld [vmem:[#allocation11 + $0x70] sm:$0xff]   ;;  %v4063_v44 = vld [vmem:[#allocation11 + $0x78] sm:$0xff]  }
 0x94f   :  { %v4274_v23 = vpop.eup %4273 }
 0x950   :  { %v4276_v35 = vpop.eup %4275  ;;  %v3307_v36 = vmul.f32 %v4274_v23, %v4266_v56 }
 0x951   :  { %v4278_v0 = vpop.eup %4277  ;;  %v3308_v2 = vmul.f32 %v4276_v35, %v4270_v3  ;;  %v7455_v3 = vmax.f32 %v5951_v1, %v6105_v58  ;;  %v4062_v1 = vld [vmem:[#allocation11 + $0x30] sm:$0xff]   ;;  %v4064_v58 = vld [vmem:[#allocation11 + $0x38] sm:$0xff]  }
 0x952   :  { %v4280_v62 = vpop.eup %4279  ;;  %v3289_v55 = vadd.f32 1.0, %v4278_v0  ;;  %v6259_v25 = vadd.f32 %v3307_v36, %v3305_v52  ;;  %v7481_v36 = vld [vmem:[#allocation171_spill] sm:$0xff] }
 0x953   :  { %v3290_v9 = vadd.f32 1.0, %v4280_v62  ;;  %v6261_v59 = vadd.f32 %v3308_v2, %v3306_v53  ;;  %v7482_v53 = vld [vmem:[#allocation172_spill] sm:$0xff] }
 0x954   :  { %4281 = vrcp.f32 %v3289_v55 }
 0x955   :  { %4283 = vtanh.f32 %v6259_v25 }
 0x956   :  { %4285 = vrcp.f32 %v3290_v9  ;;  %v7483_v9 = vld [vmem:[#allocation145_spill] sm:$0xff] }
 0x957   :  { %4287 = vtanh.f32 %v6261_v59 }
 0x95e   :  { %v4282_v51 = vpop.eup %4281 }
 0x95f   :  { %v4284_v5 = vpop.eup %4283 }
 0x960   :  { %v4286_v27 = vpop.eup %4285  ;;  %v3313_v8 = vmul.f32 %v4284_v5, %v4282_v51  ;;  %v7484_v5 = vld [vmem:[#allocation146_spill] sm:$0xff] }
 0x961   :  { %v4288_v22 = vpop.eup %4287 }
 0x962   :  { %v3314_v49 = vmul.f32 %v4288_v22, %v4286_v27  ;;  %v6268_v56 = vmax.f32 %v7454_v7, %v3313_v8  ;;  %v6275_v23 = vpack.c.bf16 %v3313_v8, %v3313_v8 }
 0x964   :  { %v3326_v21 = vpack.c.bf16 %v3314_v49, %v3314_v49  ;;  %v6273_v17 = vmax.f32 %v7455_v3, %v3314_v49 }
 0x966   :  { %3359 = vmatprep.mubr.bf16.mxu0 %v3326_v21  ;;  %3400 = vmatprep.mubr.bf16.mxu1 %v3326_v21 }
 0x967   :  { %3360 = vmatmul.mubr.bf16.vlgmr.msra.gmra.mrb[88].mxu0 %v6275_v23  ;;  %3401 = vmatmul.mubr.bf16.vlgmr.msra.gmra.mrb[88].mxu1 %v6275_v23 }
 0x968   :  { %3410 = vmatpush1.bf16.msra.mxu0 %v6861_v32  ;;  %3451 = vmatpush1.bf16.msra.mxu1 %v6862_v4  ;;  %v7456_v32 = vld [vmem:[#allocation120_spill] sm:$0xff]  ;;  %v7457_v4 = vld [vmem:[#allocation121_spill] sm:$0xff] }
 0x969   :  { %3441 = vmatprep.mubr.bf16.mxu0 %v3326_v21  ;;  %3482 = vmatprep.mubr.bf16.mxu1 %v3326_v21 }
 0x96a   :  { %3411 = vmatprep.subr.bf16.mxu0 %v6863_v10  ;;  %3452 = vmatprep.subr.bf16.mxu1 %v6864_v48  ;;  %v7458_v10 = vld [vmem:[#allocation122_spill] sm:$0xff]  ;;  %v7459_v48 = vld [vmem:[#allocation123_spill] sm:$0xff] }
 0x96c   :  { %3412 = vmatpush1.bf16.msra.mxu0 %v6865_v43  ;;  %3453 = vmatpush1.bf16.msra.mxu1 %v6866_v61  ;;  %v7460_v43 = vld [vmem:[#allocation124_spill] sm:$0xff]  ;;  %v7461_v61 = vld [vmem:[#allocation125_spill] sm:$0xff] }
 0x96d   :  { %3413 = vmatprep.subr.bf16.mxu0 %v6867_v28  ;;  %3454 = vmatprep.subr.bf16.mxu1 %v6868_v14  ;;  %v7462_v28 = vld [vmem:[#allocation126_spill] sm:$0xff]  ;;  %v7463_v14 = vld [vmem:[#allocation127_spill] sm:$0xff] }
 0x970   :  { %3414 = vmatpush1.bf16.msra.mxu0 %v6869_v57  ;;  %3455 = vmatpush1.bf16.msra.mxu1 %v6870_v15  ;;  %v7464_v57 = vld [vmem:[#allocation128_spill] sm:$0xff]  ;;  %v7465_v15 = vld [vmem:[#allocation129_spill] sm:$0xff] }
 0x971   :  { %3415 = vmatprep.subr.bf16.mxu0 %v6871_v45  ;;  %3456 = vmatprep.subr.bf16.mxu1 %v6872_v54  ;;  %v7466_v45 = vld [vmem:[#allocation130_spill] sm:$0xff]  ;;  %v7467_v54 = vld [vmem:[#allocation131_spill] sm:$0xff] }
 0x974   :  { %3416 = vmatpush1.bf16.msra.mxu0 %v6873_v29  ;;  %3457 = vmatpush1.bf16.msra.mxu1 %v6874_v50  ;;  %v7468_v29 = vld [vmem:[#allocation132_spill] sm:$0xff]  ;;  %v7469_v50 = vld [vmem:[#allocation133_spill] sm:$0xff] }
 0x975   :  { %3417 = vmatprep.subr.bf16.mxu0 %v6875_v40  ;;  %3458 = vmatprep.subr.bf16.mxu1 %v6876_v39  ;;  %v7470_v40 = vld [vmem:[#allocation134_spill] sm:$0xff]  ;;  %v7471_v39 = vld [vmem:[#allocation135_spill] sm:$0xff] }
 0x978   :  { %3418 = vmatpush1.bf16.msra.mxu0 %v6877_v16  ;;  %3459 = vmatpush1.bf16.msra.mxu1 %v6878_v24  ;;  %v7472_v16 = vld [vmem:[#allocation136_spill] sm:$0xff]  ;;  %v7473_v24 = vld [vmem:[#allocation137_spill] sm:$0xff] }
 0x979   :  { %3419 = vmatprep.subr.bf16.mxu0 %v6965_v26  ;;  %3460 = vmatprep.subr.bf16.mxu1 %v6966_v18  ;;  %v7474_v26 = vld [vmem:[#allocation138_spill] sm:$0xff]  ;;  %v7475_v18 = vld [vmem:[#allocation139_spill] sm:$0xff] }
 0x97c   :  { %3420 = vmatpush1.bf16.msra.mxu0 %v6967_v19  ;;  %3461 = vmatpush1.bf16.msra.mxu1 %v6968_v41  ;;  %v7476_v19 = vld [vmem:[#allocation140_spill] sm:$0xff]  ;;  %v7477_v41 = vld [vmem:[#allocation141_spill] sm:$0xff] }
 0x97d   :  { %3421 = vmatprep.subr.bf16.mxu0 %v6969_v20  ;;  %3462 = vmatprep.subr.bf16.mxu1 %v6970_v46  ;;  %v7478_v20 = vld [vmem:[#allocation142_spill] sm:$0xff]  ;;  %v7479_v46 = vld [vmem:[#allocation143_spill] sm:$0xff] }
 0x980   :  { %3422 = vmatpush1.bf16.msra.mxu0 %v6971_v33  ;;  %3463 = vmatpush1.bf16.msra.mxu1 %v7062_v37  ;;  %v7480_v33 = vld [vmem:[#allocation144_spill] sm:$0xff]  ;;  %v4059_v37 = vld [vmem:[#allocation11 + $0x68] sm:$0xff]  }
 0x981   :  { %3423 = vmatprep.subr.bf16.mxu0 %v6973_v34  ;;  %3464 = vmatprep.subr.bf16.mxu1 %v6974_v42  ;;  %v4050_v34 = vld [vmem:[#allocation11] sm:$0xff]   ;;  %v4051_v42 = vld [vmem:[#allocation11 + $0x48] sm:$0xff]  }
 0x984   :  { %3424 = vmatpush1.bf16.msra.mxu0 %v6975_v13  ;;  %3465 = vmatpush1.bf16.msra.mxu1 %v7063_v60  ;;  %v4052_v13 = vld [vmem:[#allocation11 + $0x8] sm:$0xff]  }
 0x985   :  { %3425 = vmatprep.subr.bf16.mxu0 %v6977_v47  ;;  %3466 = vmatprep.subr.bf16.mxu1 %v6978_v31  ;;  %v4053_v47 = vld [vmem:[#allocation11 + $0x50] sm:$0xff]   ;;  %v4060_v60 = vld [vmem:[#allocation11 + $0x28] sm:$0xff]  }
 0x986   :  { %v4054_v31 = vld [vmem:[#allocation11 + $0x10] sm:$0xff]  }
 0x988   :  { %3426 = vmatpush1.bf16.msra.mxu0 %v6979_v11  ;;  %3467 = vmatpush1.bf16.msra.mxu1 %v6980_v30  ;;  %v4055_v11 = vld [vmem:[#allocation11 + $0x58] sm:$0xff]  }
 0x989   :  { %3427 = vmatprep.subr.bf16.mxu0 %v6981_v63  ;;  %3468 = vmatprep.subr.bf16.mxu1 %v6982_v38  ;;  %v4056_v30 = vld [vmem:[#allocation11 + $0x18] sm:$0xff]   ;;  %v4057_v63 = vld [vmem:[#allocation11 + $0x60] sm:$0xff]  }
 0x98a   :  { %v4058_v38 = vld [vmem:[#allocation11 + $0x20] sm:$0xff]  }
 0x98c   :  { %3428 = vmatpush1.bf16.msra.mxu0 %v6983_v12  ;;  %3469 = vmatpush1.bf16.msra.mxu1 %v7456_v32  ;;  %v4049_v12 = vld [vmem:[#allocation11 + $0x40] sm:$0xff]  }
 0x98d   :  { %3429 = vmatprep.subr.bf16.mxu0 %v7457_v4  ;;  %3470 = vmatprep.subr.bf16.mxu1 %v7458_v10 }
 0x990   :  { %3430 = vmatpush1.bf16.msra.mxu0 %v7459_v48  ;;  %3471 = vmatpush1.bf16.msra.mxu1 %v7460_v43 }
 0x991   :  { %3431 = vmatprep.subr.bf16.mxu0 %v7461_v61  ;;  %3472 = vmatprep.subr.bf16.mxu1 %v7462_v28 }
 0x994   :  { %3432 = vmatpush1.bf16.msra.mxu0 %v7463_v14  ;;  %3473 = vmatpush1.bf16.msra.mxu1 %v7464_v57 }
 0x995   :  { %3433 = vmatprep.subr.bf16.mxu0 %v7465_v15  ;;  %3474 = vmatprep.subr.bf16.mxu1 %v7466_v45 }
 0x998   :  { %3434 = vmatpush1.bf16.msra.mxu0 %v7467_v54  ;;  %3475 = vmatpush1.bf16.msra.mxu1 %v7468_v29  ;;  %v7485_v54 = vld [vmem:[#allocation199_spill] sm:$0xff] }
 0x999   :  { %3435 = vmatprep.subr.bf16.mxu0 %v7469_v50  ;;  %3476 = vmatprep.subr.bf16.mxu1 %v7470_v40  ;;  %v7486_v50 = vld [vmem:[#allocation200_spill] sm:$0xff] }
 0x99c   :  { %3436 = vmatpush1.bf16.msra.mxu0 %v7471_v39  ;;  %3477 = vmatpush1.bf16.msra.mxu1 %v7472_v16 }
 0x99d   :  { %3437 = vmatprep.subr.bf16.mxu0 %v7473_v24  ;;  %3478 = vmatprep.subr.bf16.mxu1 %v7474_v26  ;;  %v7487_v24 = vld [vmem:[#allocation173_spill] sm:$0xff] }
 0x9a0   :  { %3438 = vmatpush1.bf16.msra.mxu0 %v7475_v18  ;;  %3479 = vmatpush1.bf16.msra.mxu1 %v7476_v19  ;;  %v7488_v18 = vld [vmem:[#allocation174_spill] sm:$0xff] }
 0x9a1   :  { %3439 = vmatprep.subr.bf16.mxu0 %v7477_v41  ;;  %3480 = vmatprep.subr.bf16.mxu1 %v7478_v20 }
 0x9a4   :  { %3440 = vmatpush1.bf16.msra.mxu0 %v7479_v46  ;;  %3481 = vmatpush1.bf16.msra.mxu1 %v7480_v33 }
 0x9a5   :  { %4012 = vmatprep.subr.bf16.mxu0 %v4049_v12 }
 0x9a7   :  { %3442 = vmatmul.mubr.bf16.vlgmr.msra.gmra.mrb[92].mxu0 %v6275_v23  ;;  %3483 = vmatmul.mubr.bf16.vlgmr.msra.gmra.mrb[92].mxu1 %v6275_v23 }
 0x9a8   :  { %4013 = vmatpush3.bf16.msra.mxu0 %v4050_v34 }
 0x9a9   :  { %4014 = vmatprep.subr.bf16.mxu0 %v4051_v42 }
 0x9ac   :  { %4015 = vmatpush3.bf16.msra.mxu0 %v4052_v13 }
 0x9ad   :  { %4016 = vmatprep.subr.bf16.mxu0 %v4053_v47 }
 0x9b0   :  { %4017 = vmatpush3.bf16.msra.mxu0 %v4054_v31 }
 0x9b1   :  { %4018 = vmatprep.subr.bf16.mxu0 %v4055_v11 }
 0x9b4   :  { %4019 = vmatpush3.bf16.msra.mxu0 %v4056_v30 }
 0x9b5   :  { %4020 = vmatprep.subr.bf16.mxu0 %v4057_v63 }
 0x9b8   :  { %4021 = vmatpush3.bf16.msra.mxu0 %v4058_v38 }
 0x9b9   :  { %4022 = vmatprep.subr.bf16.mxu0 %v4059_v37 }
 0x9bc   :  { %4023 = vmatpush3.bf16.msra.mxu0 %v4060_v60 }
 0x9bd   :  { %4024 = vmatprep.subr.bf16.mxu0 %v4061_v6 }
 0x9c0   :  { %4025 = vmatpush3.bf16.msra.mxu0 %v4062_v1 }
 0x9c1   :  { %4026 = vmatprep.subr.bf16.mxu0 %v4063_v44 }
 0x9c4   :  { %4027 = vmatpush3.bf16.msra.mxu0 %v4064_v58 }
 0xa3a   :  { %v3361_v35 = vpop.f32.mrb[88].mxu0  ;;  %v3402_v52 = vpop.f32.mrb[88].mxu1 }
 0xa3b   :  { %v3491_v0 = vadd.f32 %v3361_v35, %v7481_v36  ;;  %v3493_v2 = vadd.f32 %v3402_v52, %v7482_v53  ;;  %v3363_v62 = vpop.f32.mrb[89].mxu0  ;;  %v3404_v55 = vpop.f32.mrb[89].mxu1 }
 0xa3c   :  { %v3492_v51 = vadd.f32 %v3363_v62, %v7483_v9  ;;  %v3494_v27 = vadd.f32 %v3404_v55, %v7484_v5  ;;  %v3365_v8 = vpop.f32.mrb[90].mxu0  ;;  %v3406_v22 = vpop.f32.mrb[90].mxu1 }
 0xa3d   :  { %v3366_v49 = vpop.f32.mrb[91].mxu0  ;;  %v3407_v7 = vpop.f32.mrb[91].mxu1  ;;  %v3989_v21 = vmul.f32 -1.442695, %v3491_v0  ;;  %v3991_v3 = vmul.f32 -1.442695, %v3493_v2 }
 0xa3e   :  { %v3990_v23 = vmul.f32 -1.442695, %v3492_v51  ;;  %v3992_v32 = vmul.f32 -1.442695, %v3494_v27  ;;  %v3995_v27 = vld [vmem:[%s6375_s5] ss:$0 sm:$0xff] }
 0xa3f   :  { %4289 = vpow2.f32 %v3989_v21 }
 0xa40   :  { %4291 = vpow2.f32 %v3991_v3 }
 0xa41   :  { %4293 = vpow2.f32 %v3990_v23 }
 0xa42   :  { %4295 = vpow2.f32 %v3992_v32 }
 0xa49   :  { %v4290_v4 = vpop.eup %4289 }
 0xa4a   :  { %v4292_v10 = vpop.eup %4291  ;;  %v3517_v61 = vadd.f32 1.0, %v4290_v4 }
 0xa4b   :  { %v4294_v48 = vpop.eup %4293  ;;  %v3519_v28 = vadd.f32 1.0, %v4292_v10 }
 0xa4c   :  { %v4296_v43 = vpop.eup %4295  ;;  %v3518_v14 = vadd.f32 1.0, %v4294_v48  ;;  %4297 = vrcp.f32 %v3517_v61 }
 0xa4d   :  { %v3520_v57 = vadd.f32 1.0, %v4296_v43  ;;  %4299 = vrcp.f32 %v3519_v28 }
 0xa4e   :  { %4301 = vrcp.f32 %v3518_v14 }
 0xa4f   :  { %4303 = vrcp.f32 %v3520_v57 }
 0xa56   :  { %v4298_v42 = vpop.eup %4297 }
 0xa57   :  { %v4300_v13 = vpop.eup %4299 }
 0xa58   :  { %v4302_v47 = vpop.eup %4301  ;;  %v3537_v63 = vmul.f32 %v4300_v13, %v6259_v25 }
 0xa59   :  { %v4304_v31 = vpop.eup %4303 }
 0xa5a   :  { %v3538_v60 = vmul.f32 %v4304_v31, %v6261_v59 }
 0xa7a   :  { %v3443_v15 = vpop.f32.mrb[92].mxu0  ;;  %v3484_v45 = vpop.f32.mrb[92].mxu1 }
 0xa7b   :  { %v3495_v29 = vadd.f32 %v3443_v15, %v7485_v54  ;;  %v3497_v40 = vadd.f32 %v3484_v45, %v7486_v50  ;;  %v3445_v39 = vpop.f32.mrb[93].mxu0  ;;  %v3486_v16 = vpop.f32.mrb[93].mxu1 }
 0xa7c   :  { %v3496_v26 = vadd.f32 %v3445_v39, %v7487_v24  ;;  %v3498_v19 = vadd.f32 %v3486_v16, %v7488_v18  ;;  %v3447_v41 = vpop.f32.mrb[94].mxu0  ;;  %v3488_v20 = vpop.f32.mrb[94].mxu1 }
 0xa7d   :  { %v3993_v46 = vmul.f32 -1.442695, %v3495_v29  ;;  %4305 = vtanh.f32 %v3497_v40  ;;  %v3448_v33 = vpop.f32.mrb[95].mxu0  ;;  %v3489_v12 = vpop.f32.mrb[95].mxu1 }
 0xa7e   :  { %v3994_v34 = vmul.f32 -1.442695, %v3496_v26  ;;  %4307 = vtanh.f32 %v3498_v19 }
 0xa7f   :  { %4309 = vpow2.f32 %v3993_v46 }
 0xa80   :  { %4311 = vpow2.f32 %v3994_v34 }
 0xa87   :  { %v4306_v11 = vpop.eup %4305 }
 0xa88   :  { %v4308_v30 = vpop.eup %4307  ;;  %v3539_v38 = vmul.f32 %v4306_v11, %v4298_v42 }
 0xa89   :  { %v4310_v37 = vpop.eup %4309  ;;  %v3540_v6 = vmul.f32 %v4308_v30, %v4302_v47 }
 0xa8a   :  { %v4312_v1 = vpop.eup %4311  ;;  %v3521_v44 = vadd.f32 1.0, %v4310_v37  ;;  %v3541_v58 = vadd.f32 %v3539_v38, %v3537_v63 }
 0xa8b   :  { %v3522_v35 = vadd.f32 1.0, %v4312_v1  ;;  %v3542_v52 = vadd.f32 %v3540_v6, %v3538_v60 }
 0xa8c   :  { %4313 = vrcp.f32 %v3521_v44 }
 0xa8d   :  { %4315 = vtanh.f32 %v3541_v58 }
 0xa8e   :  { %4317 = vrcp.f32 %v3522_v35 }
 0xa8f   :  { %4319 = vtanh.f32 %v3542_v52 }
 0xa96   :  { %v4314_v36 = vpop.eup %4313 }
 0xa97   :  { %v4316_v0 = vpop.eup %4315 }
 0xa98   :  { %v4318_v53 = vpop.eup %4317  ;;  %v3545_v2 = vmul.f32 %v4316_v0, %v4314_v36 }
 0xa99   :  { %v4320_v62 = vpop.eup %4319 }
 0xa9a   :  { %v3546_v25 = vmul.f32 %v4320_v62, %v4318_v53  ;;  %v3547_v55 = vmax.f32 %v6268_v56, %v3545_v2 }
 0xa9c   :  { %v3548_v59 = vmax.f32 %v6273_v17, %v3546_v25  ;;  %v3549_v51 = vpack.c.bf16 %v3547_v55, %v3547_v55 }
 0xa9e   :  { %v3550_v9 = vpack.c.bf16 %v3548_v59, %v3548_v59 }
 0xaa0   :  { %3718 = vmatprep.mubr.bf16.mxu0 %v3550_v9 }
 0xaa1   :  { %3719 = vmatmul.mubr.bf16.vlgmr.msra.gmra.mrb[96].mxu0 %v3549_v51 }
 0xb74   :  { %v4028_v5 = vpop.f32.mrb[96].mxu0 }
 0xb75   :  { %v4029_v8 = vpop.f32.mrb[97].mxu0 }
 0xb76   :  { %v4030_v22 = vadd.f32 %v4029_v8, %v4028_v5  ;;  %v4031_v49 = vpop.f32.mrb[98].mxu0 }
 0xb77   :  { %v4032_v7 = vpop.f32.mrb[99].mxu0 }
 0xb78   :  { %v3721_v21 = vadd.f32 %v4030_v22, %v3995_v27 }
 0xb7a   :  { %3726 = vst [vmem:[#allocation12] sm:$0xff] %v3721_v21 }
 0xb7b   :  { %4442 = shalt.err (!%p4439_p2)
}
 0xb7c   :  { %s4443_s5 = scalar_lea.hbm %s6376_s6, 128 }
 0xb7d   :  { %p4444_p3 = scmp.ne.s32.totalorder %s6376_s6, %s4443_s5  ;;  %p4447_p4 = scmp.lt.u32.totalorder %s4443_s5, %s6376_s6 }
 0xb7f   :  { %p4449_p5 = pnand %p4447_p4, %p4444_p3 }
 0xb81   :  { %4452 = shalt.err (!%p4449_p5)
}
 0xb82   :  { %3736 = dma.vmem_to_hbm [thread:$0]  %s3734_s8, 128, %s6376_s6, [#allocation5]  }
 0xb83   :  { %4459 = dma.done.wait [#allocation5], 128  }
 0xb84   :  { %4460 = vsyncadd [#allocation5], 4294967168 }
 0xb85   :  { %3740 = vsyncpa [#allocation4], 1 }
 0xb86   :  { %3741 = vsyncpa [#allocation7], 1 }
 0xb87   :  { %3742 = vsyncpa [#allocation10], 1 }
 0xb88   :  { %3743 = vsyncpa [#allocation5], 1 }

</bundles_post_ra>
